<compile_context>
chip_gen: v6e
topology: v6e:2x2x1
jax: 0.10.0
libtpu: 0.0.40
codegen_flags: <defaults>
</compile_context>

<pallas_src>
import functools
import math

import jax
import jax.numpy as jnp
from jax import lax
from jax.experimental import pallas as pl
from jax.experimental.pallas import tpu as pltpu

_MiB = 1024 * 1024


def _vmem_capacity_bytes():
    """Physical VMEM per TensorCore (128 MiB v5e/v6e, 64 MiB v7x)."""
    try:
        info = pltpu.get_tpu_info()
        cap = getattr(info, "vmem_capacity_bytes", None)
        if cap:
            return int(cap)
    except Exception:
        pass
    return 64 * _MiB        # conservative (v7x per-core) fallback


def _pick_tile(total, unit, budget_bytes, bytes_per_unit):
    """Largest divisor of `total` that is a multiple of `unit` and whose
    streaming footprint (tile * bytes_per_unit) fits `budget_bytes`.  Never
    blindly falls back to the full extent: if nothing fits the budget, the
    smallest layout-legal divisor is used instead."""
    cands = sorted(set(
        [d for d in range(unit, total + 1, unit) if total % d == 0] + [total]))
    fitting = [d for d in cands if d * bytes_per_unit <= budget_bytes]
    return max(fitting) if fitting else min(cands)


# ---------------------------------------------------------------------------
# Kernel 1: encoders + momentum update (+ l_pos), tiled over the Din axis.
# ---------------------------------------------------------------------------
def _encoder_kernel(xq_ref, xk_ref,
                    wpq_ref, bpq_ref, wfq_ref, bfq_ref,
                    wpk_ref, bpk_ref, wfk_ref, bfk_ref,
                    pred_q_ref, feat_q_ref, feat_k_ref, l_pos_ref,
                    new_wpk_ref, new_bpk_ref, new_wfk_ref, new_bfk_ref,
                    *, m, inv_T, compute_dtype):
    r = pl.program_id(0)
    keep = 1.0 - m

    wpq = wpq_ref[...]
    wfq = wfq_ref[...]

    # Momentum update streamed per Din tile (f32 master math), written back in
    # place (aliased) in the parameters' stored dtype.
    new_wfk = wfk_ref[...].astype(jnp.float32) * keep + wfq.astype(jnp.float32) * m
    new_wfk_ref[...] = new_wfk.astype(new_wfk_ref.dtype)
    new_wpk = wpk_ref[...].astype(jnp.float32) * keep + wpq.astype(jnp.float32) * m
    new_wpk_ref[...] = new_wpk.astype(new_wpk_ref.dtype)

    @pl.when(r == 0)
    def _init():
        new_bfk = (bfk_ref[...].astype(jnp.float32) * keep
                   + bfq_ref[...].astype(jnp.float32) * m)
        new_bfk_ref[...] = new_bfk.astype(new_bfk_ref.dtype)
        new_bpk = (bpk_ref[...].astype(jnp.float32) * keep
                   + bpq_ref[...].astype(jnp.float32) * m)
        new_bpk_ref[...] = new_bpk.astype(new_bpk_ref.dtype)
        pred_q_ref[...] = jnp.broadcast_to(bpq_ref[...].astype(jnp.float32),
                                           pred_q_ref.shape)
        feat_q_ref[...] = jnp.broadcast_to(bfq_ref[...].astype(jnp.float32),
                                           feat_q_ref.shape)
        feat_k_ref[...] = jnp.broadcast_to(new_bfk, feat_k_ref.shape)

    xq = xq_ref[...].astype(compute_dtype)
    xk = xk_ref[...].astype(compute_dtype)
    pred_q_ref[...] += jnp.dot(xq, wpq.astype(compute_dtype),
                               preferred_element_type=jnp.float32)
    feat_q_ref[...] += jnp.dot(xq, wfq.astype(compute_dtype),
                               preferred_element_type=jnp.float32)
    feat_k_ref[...] += jnp.dot(xk, new_wfk.astype(compute_dtype),
                               preferred_element_type=jnp.float32)
    # NOTE: the reference computes pred_k = pred-head(im_k) and discards it,
    # so that matmul is skipped entirely here.

    @pl.when(r == pl.num_programs(0) - 1)
    def _finalize():
        # l_pos = einsum('nc,nc->n', feat_q, feat_k) / T, lane-dense output.
        l_pos = jnp.sum(feat_q_ref[...] * feat_k_ref[...], axis=-1,
                        keepdims=True) * inv_T
        l_pos_ref[...] = jnp.broadcast_to(l_pos, l_pos_ref.shape)


# ---------------------------------------------------------------------------
# Kernel 2: l_neg = feat_q @ queue / T, streamed over K tiles (parallel-safe).
# ---------------------------------------------------------------------------
def _lneg_kernel(feat_q_ref, queue_ref, l_neg_ref, *, inv_T, compute_dtype):
    l_neg_ref[...] = jnp.dot(feat_q_ref[...].astype(compute_dtype),
                             queue_ref[...].astype(compute_dtype),
                             preferred_element_type=jnp.float32) * inv_T


# ---------------------------------------------------------------------------
# Kernel 3: narrow in-place enqueue of feat_k into one lane-aligned queue slab.
# ---------------------------------------------------------------------------
def _enqueue_kernel(ptr_ref, lneg_dep_ref, feat_k_ref, qslab_ref, new_qslab_ref,
                    *, slab):
    del lneg_dep_ref        # data-dependency only: enqueue must follow l_neg
    ptr = ptr_ref[0]
    n = feat_k_ref.shape[0]
    off = ptr % slab                                    # window offset in slab

    fkT = feat_k_ref[...].astype(jnp.float32).T         # (dim, N)
    row = lax.broadcasted_iota(jnp.int32, (n, slab), 0)
    col = lax.broadcasted_iota(jnp.int32, (n, slab), 1)
    sel = (col == off + row).astype(jnp.float32)        # (N, slab) one-hot
    scattered = jnp.dot(fkT, sel, preferred_element_type=jnp.float32)

    colq = lax.broadcasted_iota(jnp.int32, new_qslab_ref.shape, 1)
    inside = (colq >= off) & (colq < off + n)
    # Untouched columns are copied exactly from the old slab (no matmul path).
    new_qslab_ref[...] = jnp.where(
        inside, scattered, qslab_ref[...].astype(jnp.float32)
    ).astype(new_qslab_ref.dtype)


# ---------------------------------------------------------------------------
# Wrapper
# ---------------------------------------------------------------------------
def moco2_forward(params, buffers, im_q, im_k, *, m=0.8, T=0.07,
                  tile_d=None, tile_k=None,
                  compute_dtype=jnp.float32,
                  vmem_limit_bytes=None):
    """MoCo2 training forward. Returns ((pred_q, feat_q, logits, labels),
    new_params, new_buffers).

    Arrays are streamed in their stored dtype (store weights / images / queue
    in bf16 and set compute_dtype=jnp.bfloat16 to halve the HBM streams on
    v6e / v7x; accumulation stays in f32 either way)."""
    # TODO(synk): eval-mode branch (return encoder_q(inputs)) not implemented.
    N = im_q.shape[0]
    Din = math.prod(im_q.shape[1:])
    xq = im_q.reshape(N, Din)           # stored dtype; cast happens in-kernel
    xk = im_k.reshape(N, Din)

    queue = buffers["queue"]
    dim, K = queue.shape
    n_cls = params["w_pred_q"].shape[1]

    assert K % N == 0, "K must be divisible by the batch size (as in PyTorch)"
    assert (128 % N == 0) or (N % 128 == 0), \
        "batch size must divide 128 (or be a multiple of 128) for the enqueue"
    slab = max(128, N)                  # lane-aligned enqueue slab width
    assert K % slab == 0
    # Best-effort check of the PyTorch invariant ptr % N == 0 (concrete only).
    try:
        assert int(jnp.asarray(buffers["queue_ptr"]).reshape(-1)[0]) % N == 0
    except Exception:
        pass

    isz = lambda a: jnp.dtype(a.dtype).itemsize
    isz_x = isz(xq)
    isz_wpq, isz_wfq = isz(params["w_pred_q"]), isz(params["w_feat_q"])
    isz_wpk, isz_wfk = isz(params["w_pred_k"]), isz(params["w_feat_k"])
    isz_q = isz(queue)

    # Per-generation VMEM budget (128 MiB v5e/v6e -> ~100 MiB scoped limit,
    # 64 MiB v7x -> ~56 MiB) drives both the scoped limit and the tile picks.
    cap = _vmem_capacity_bytes()
    if vmem_limit_bytes is None:
        vmem_limit_bytes = max(32 * _MiB, min(cap - 8 * _MiB, 100 * _MiB))
    vmem_limit_bytes = int(vmem_limit_bytes)
    budget = int(0.70 * vmem_limit_bytes)

    # Kernel 1: bytes of (double-buffered) traffic per unit of tile_d.
    bpd = (2 * 2 * N * isz_x                                            # xq,xk
           + 2 * (n_cls * (isz_wpq + isz_wpk) + dim * (isz_wfq + isz_wfk))
           + 2 * (n_cls * isz_wpk + dim * isz_wfk))                     # w out
    fixed1 = 4 * N * (n_cls + 2 * dim + 128) + 8 * (n_cls + dim)
    if tile_d is None:
        tile_d = _pick_tile(Din, 128, budget - fixed1, bpd)
    assert Din % tile_d == 0
    grid_d = Din // tile_d

    # Kernel 2: bytes per unit of tile_k.
    bpk = 2 * dim * isz_q + 2 * N * 4
    fixed2 = 2 * N * dim * 4
    if tile_k is None:
        tile_k = _pick_tile(K, slab, budget - fixed2, bpk)
    assert K % tile_k == 0 and tile_k % slab == 0
    grid_k = K // tile_k

    ptr = jnp.asarray(buffers["queue_ptr"], jnp.int32).reshape((1,))
    inv_T = 1.0 / T

    cparams_seq = pltpu.CompilerParams(
        dimension_semantics=("arbitrary",), vmem_limit_bytes=vmem_limit_bytes)
    cparams_par = pltpu.CompilerParams(
        dimension_semantics=("parallel",), vmem_limit_bytes=vmem_limit_bytes)

    # ------------------------- call 1: encoders ---------------------------
    ce1 = pl.CostEstimate(
        flops=int(2 * N * Din * (n_cls + 2 * dim) + 4 * Din * (n_cls + dim)),
        transcendentals=0,
        bytes_accessed=int(2 * N * Din * isz_x
                           + Din * n_cls * (isz_wpq + 2 * isz_wpk)
                           + Din * dim * (isz_wfq + 2 * isz_wfk)
                           + 4 * N * (n_cls + 2 * dim + 128)))
    enc_kernel = functools.partial(_encoder_kernel, m=m, inv_T=inv_T,
                                   compute_dtype=compute_dtype)
    enc_out_shapes = (
        jax.ShapeDtypeStruct((N, n_cls), jnp.float32),                 # pred_q
        jax.ShapeDtypeStruct((N, dim), jnp.float32),                   # feat_q
        jax.ShapeDtypeStruct((N, dim), jnp.float32),                   # feat_k
        jax.ShapeDtypeStruct((N, 128), jnp.float32),                   # l_pos
        jax.ShapeDtypeStruct(params["w_pred_k"].shape, params["w_pred_k"].dtype),
        jax.ShapeDtypeStruct(params["b_pred_k"].shape, params["b_pred_k"].dtype),
        jax.ShapeDtypeStruct(params["w_feat_k"].shape, params["w_feat_k"].dtype),
        jax.ShapeDtypeStruct(params["b_feat_k"].shape, params["b_feat_k"].dtype),
    )
    enc_grid_spec = pltpu.PrefetchScalarGridSpec(
        num_scalar_prefetch=0,
        grid=(grid_d,),
        in_specs=[
            pl.BlockSpec((N, tile_d), lambda r: (0, r)),       # xq
            pl.BlockSpec((N, tile_d), lambda r: (0, r)),       # xk
            pl.BlockSpec((tile_d, n_cls), lambda r: (r, 0)),   # w_pred_q
            pl.BlockSpec((1, n_cls), lambda r: (0, 0)),        # b_pred_q
            pl.BlockSpec((tile_d, dim), lambda r: (r, 0)),     # w_feat_q
            pl.BlockSpec((1, dim), lambda r: (0, 0)),          # b_feat_q
            pl.BlockSpec((tile_d, n_cls), lambda r: (r, 0)),   # w_pred_k
            pl.BlockSpec((1, n_cls), lambda r: (0, 0)),        # b_pred_k
            pl.BlockSpec((tile_d, dim), lambda r: (r, 0)),     # w_feat_k
            pl.BlockSpec((1, dim), lambda r: (0, 0)),          # b_feat_k
        ],
        out_specs=[
            pl.BlockSpec((N, n_cls), lambda r: (0, 0)),        # pred_q
            pl.BlockSpec((N, dim), lambda r: (0, 0)),          # feat_q
            pl.BlockSpec((N, dim), lambda r: (0, 0)),          # feat_k
            pl.BlockSpec((N, 128), lambda r: (0, 0)),          # l_pos
            pl.BlockSpec((tile_d, n_cls), lambda r: (r, 0)),   # new w_pred_k
            pl.BlockSpec((1, n_cls), lambda r: (0, 0)),        # new b_pred_k
            pl.BlockSpec((tile_d, dim), lambda r: (r, 0)),     # new w_feat_k
            pl.BlockSpec((1, dim), lambda r: (0, 0)),          # new b_feat_k
        ],
    )
    (pred_q, feat_q, feat_k, l_pos_pad,
     new_wpk, new_bpk, new_wfk, new_bfk) = pl.pallas_call(
        enc_kernel,
        out_shape=enc_out_shapes,
        grid_spec=enc_grid_spec,
        # key-encoder params are momentum-updated in place:
        input_output_aliases={6: 4, 7: 5, 8: 6, 9: 7},
        compiler_params=cparams_seq,
        cost_estimate=ce1,
    )(xq, xk,
      params["w_pred_q"], params["b_pred_q"],
      params["w_feat_q"], params["b_feat_q"],
      params["w_pred_k"], params["b_pred_k"],
      params["w_feat_k"], params["b_feat_k"])

    # ------------------------ call 2: l_neg over K -------------------------
    ce2 = pl.CostEstimate(
        flops=int(2 * N * dim * K), transcendentals=0,
        bytes_accessed=int(dim * K * isz_q + N * K * 4 + N * dim * 4))
    lneg_kernel = functools.partial(_lneg_kernel, inv_T=inv_T,
                                    compute_dtype=compute_dtype)
    l_neg = pl.pallas_call(
        lneg_kernel,
        out_shape=jax.ShapeDtypeStruct((N, K), jnp.float32),
        grid_spec=pltpu.PrefetchScalarGridSpec(
            num_scalar_prefetch=0,
            grid=(grid_k,),
            in_specs=[pl.BlockSpec((N, dim), lambda j: (0, 0)),      # feat_q
                      pl.BlockSpec((dim, tile_k), lambda j: (0, j))],  # queue
            out_specs=pl.BlockSpec((N, tile_k), lambda j: (0, j))),
        compiler_params=cparams_par,        # K tiles are independent (v7x 2-TC)
        cost_estimate=ce2,
    )(feat_q, queue)

    # --------------- call 3: narrow in-place enqueue of feat_k -------------
    ce3 = pl.CostEstimate(
        flops=int(2 * dim * N * slab), transcendentals=0,
        bytes_accessed=int(2 * dim * slab * isz_q + N * dim * 4 + N * 128 * 4))
    enq_kernel = functools.partial(_enqueue_kernel, slab=slab)
    new_queue = pl.pallas_call(
        enq_kernel,
        out_shape=jax.ShapeDtypeStruct((dim, K), queue.dtype),
        grid_spec=pltpu.PrefetchScalarGridSpec(
            num_scalar_prefetch=1,                              # queue_ptr
            grid=(1,),
            in_specs=[
                pl.BlockSpec((N, 128), lambda i, p: (0, 0)),    # l_neg (dep)
                pl.BlockSpec((N, dim), lambda i, p: (0, 0)),    # feat_k
                pl.BlockSpec((dim, slab),
                             lambda i, p: (0, p[0] // slab)),   # old queue slab
            ],
            out_specs=pl.BlockSpec((dim, slab),
                                   lambda i, p: (0, p[0] // slab))),
        input_output_aliases={3: 0},        # queue updated in place
        compiler_params=pltpu.CompilerParams(
            dimension_semantics=("arbitrary",),
            vmem_limit_bytes=vmem_limit_bytes),
        cost_estimate=ce3,
    )(ptr, l_neg, feat_k, queue)

    # Glue kept in XLA: [l_pos | l_neg] concat, labels, queue-pointer bump.
    logits = jnp.concatenate([l_pos_pad[:, :1], l_neg], axis=1)
    labels = jnp.zeros((N,), dtype=jnp.int32)

    new_ptr = ((ptr + N) % K).astype(buffers["queue_ptr"].dtype)
    new_params = dict(params, w_pred_k=new_wpk, b_pred_k=new_bpk,
                      w_feat_k=new_wfk, b_feat_k=new_bfk)
    new_buffers = dict(buffers, queue=new_queue, queue_ptr=new_ptr)
    # TODO(synk): gt_queue is left untouched — the reference forward() calls
    # _dequeue_and_enqueue(feat_k) without labels, so there is nothing to write.
    return (pred_q, feat_q, logits, labels), new_params, new_buffers


if __name__ == "__main__":
    key = jax.random.PRNGKey(0)
    ks = jax.random.split(key, 10)

    # Small MoCo2-consistent shapes (dim/K scaled down from 2048/4096).
    N, C, H, W = 8, 16, 8, 8          # Din = 1024
    Din = C * H * W
    dim, K, n_cls = 128, 1024, 128
    m, T = 0.8, 0.07

    w_pred_q = 0.02 * jax.random.normal(ks[0], (Din, n_cls), jnp.float32)
    b_pred_q = 0.1 * jax.random.normal(ks[1], (1, n_cls), jnp.float32)
    w_feat_q = 0.02 * jax.random.normal(ks[2], (Din, dim), jnp.float32)
    b_feat_q = 0.1 * jax.random.normal(ks[3], (1, dim), jnp.float32)
    # At __init__ the key encoder is a copy of the query encoder; perturb it a
    # little to emulate a later training step so the momentum update is exercised.
    w_pred_k = w_pred_q + 0.01 * jax.random.normal(ks[4], (Din, n_cls), jnp.float32)
    b_pred_k = b_pred_q + 0.01 * jax.random.normal(ks[5], (1, n_cls), jnp.float32)
    w_feat_k = w_feat_q + 0.01 * jax.random.normal(ks[6], (Din, dim), jnp.float32)
    b_feat_k = b_feat_q + 0.01 * jax.random.normal(ks[7], (1, dim), jnp.float32)

    params = dict(w_pred_q=w_pred_q, b_pred_q=b_pred_q,
                  w_feat_q=w_feat_q, b_feat_q=b_feat_q,
                  w_pred_k=w_pred_k, b_pred_k=b_pred_k,
                  w_feat_k=w_feat_k, b_feat_k=b_feat_k)

    ptr0 = 520                                   # multiple of N, off-slab-start
    buffers = dict(queue=jax.random.normal(ks[8], (dim, K), jnp.float32),
                   gt_queue=jax.random.normal(ks[9], (K,), jnp.float32),
                   queue_ptr=jnp.array([ptr0], jnp.int32))

    kq, kk = jax.random.split(jax.random.PRNGKey(1))
    im_q = jax.random.normal(kq, (N, C, H, W), jnp.float32)
    im_k = jax.random.normal(kk, (N, C, H, W), jnp.float32)

    out = moco2_forward(params, buffers, im_q, im_k, m=m, T=T)
    out = jax.block_until_ready(out)
    (pred_q, feat_q, logits, labels), new_params, new_buffers = out

    # ---- pure-JAX reference of the PyTorch forward ----
    hi = jax.lax.Precision.HIGHEST
    xq = im_q.reshape(N, Din)
    xk = im_k.reshape(N, Din)
    r_wfk = w_feat_k * (1 - m) + w_feat_q * m
    r_bfk = b_feat_k * (1 - m) + b_feat_q * m
    r_wpk = w_pred_k * (1 - m) + w_pred_q * m
    r_bpk = b_pred_k * (1 - m) + b_pred_q * m
    r_pred_q = jnp.dot(xq, w_pred_q, precision=hi) + b_pred_q
    r_feat_q = jnp.dot(xq, w_feat_q, precision=hi) + b_feat_q
    r_feat_k = jnp.dot(xk, r_wfk, precision=hi) + r_bfk
    r_l_pos = jnp.sum(r_feat_q * r_feat_k, axis=-1, keepdims=True) / T
    r_l_neg = jnp.dot(r_feat_q, buffers["queue"], precision=hi) / T
    r_logits = jnp.concatenate([r_l_pos, r_l_neg], axis=1)
    r_queue = buffers["queue"].at[:, ptr0:ptr0 + N].set(r_feat_k.T)

    def check(name, got, want, atol=2e-2, rtol=2e-2):
        ok = bool(jnp.allclose(got, want, atol=atol, rtol=rtol))
        assert ok, f"{name} mismatch, max abs err " \
                   f"{float(jnp.max(jnp.abs(got - want)))}"

    assert pred_q.shape == (N, n_cls) and feat_q.shape == (N, dim)
    assert logits.shape == (N, 1 + K) and labels.shape == (N,)
    check("pred_q", pred_q, r_pred_q)
    check("feat_q", feat_q, r_feat_q)
    check("logits", logits, r_logits)
    check("queue", new_buffers["queue"], r_queue)
    check("w_feat_k", new_params["w_feat_k"], r_wfk, atol=1e-5, rtol=1e-5)
    check("b_feat_k", new_params["b_feat_k"], r_bfk, atol=1e-5, rtol=1e-5)
    check("w_pred_k", new_params["w_pred_k"], r_wpk, atol=1e-5, rtol=1e-5)
    check("b_pred_k", new_params["b_pred_k"], r_bpk, atol=1e-5, rtol=1e-5)
    assert int(new_buffers["queue_ptr"][0]) == (ptr0 + N) % K
    assert bool(jnp.all(labels == 0))
    print("KERNEL_OK")
</pallas_src>

<mosaic_0001>
module attributes {stable_mosaic.version = 11 : i64} {
  func.func @_encoder_kernel(%arg0: i32, %arg1: memref<8x1024xf32, #tpu.memory_space<vmem>>, %arg2: memref<8x1024xf32, #tpu.memory_space<vmem>>, %arg3: memref<1024x128xf32, #tpu.memory_space<vmem>>, %arg4: memref<1x128xf32, #tpu.memory_space<vmem>>, %arg5: memref<1024x128xf32, #tpu.memory_space<vmem>>, %arg6: memref<1x128xf32, #tpu.memory_space<vmem>>, %arg7: memref<1024x128xf32, #tpu.memory_space<vmem>>, %arg8: memref<1x128xf32, #tpu.memory_space<vmem>>, %arg9: memref<1024x128xf32, #tpu.memory_space<vmem>>, %arg10: memref<1x128xf32, #tpu.memory_space<vmem>>, %arg11: memref<8x128xf32, #tpu.memory_space<vmem>>, %arg12: memref<8x128xf32, #tpu.memory_space<vmem>>, %arg13: memref<8x128xf32, #tpu.memory_space<vmem>>, %arg14: memref<8x128xf32, #tpu.memory_space<vmem>>, %arg15: memref<1024x128xf32, #tpu.memory_space<vmem>>, %arg16: memref<1x128xf32, #tpu.memory_space<vmem>>, %arg17: memref<1024x128xf32, #tpu.memory_space<vmem>>, %arg18: memref<1x128xf32, #tpu.memory_space<vmem>>) attributes {dimension_semantics = [#tpu.dimension_semantics<arbitrary>], iteration_bounds = array<i64: 1>, scalar_prefetch = 0 : i64, scratch_operands = 0 : i64, tpu.core_type = #tpu.core_type<tc>, window_params = [{transform_indices = @transform_0, window_bounds = array<i64: 8, 1024>}, {transform_indices = @transform_1, window_bounds = array<i64: 8, 1024>}, {transform_indices = @transform_2, window_bounds = array<i64: 1024, 128>}, {pipeline_mode = #tpu.pipeline_mode<synchronous>, transform_indices = @transform_3, window_bounds = array<i64: 1, 128>}, {transform_indices = @transform_4, window_bounds = array<i64: 1024, 128>}, {pipeline_mode = #tpu.pipeline_mode<synchronous>, transform_indices = @transform_5, window_bounds = array<i64: 1, 128>}, {transform_indices = @transform_6, window_bounds = array<i64: 1024, 128>}, {pipeline_mode = #tpu.pipeline_mode<synchronous>, transform_indices = @transform_7, window_bounds = array<i64: 1, 128>}, {transform_indices = @transform_8, window_bounds = array<i64: 1024, 128>}, {pipeline_mode = #tpu.pipeline_mode<synchronous>, transform_indices = @transform_9, window_bounds = array<i64: 1, 128>}, {pipeline_mode = #tpu.pipeline_mode<synchronous>, transform_indices = @transform_10, window_bounds = array<i64: 8, 128>}, {pipeline_mode = #tpu.pipeline_mode<synchronous>, transform_indices = @transform_11, window_bounds = array<i64: 8, 128>}, {pipeline_mode = #tpu.pipeline_mode<synchronous>, transform_indices = @transform_12, window_bounds = array<i64: 8, 128>}, {pipeline_mode = #tpu.pipeline_mode<synchronous>, transform_indices = @transform_13, window_bounds = array<i64: 8, 128>}, {transform_indices = @transform_14, window_bounds = array<i64: 1024, 128>}, {pipeline_mode = #tpu.pipeline_mode<synchronous>, transform_indices = @transform_15, window_bounds = array<i64: 1, 128>}, {transform_indices = @transform_16, window_bounds = array<i64: 1024, 128>}, {pipeline_mode = #tpu.pipeline_mode<synchronous>, transform_indices = @transform_17, window_bounds = array<i64: 1, 128>}]} {
    %c0 = arith.constant 0 : index
    %c0_0 = arith.constant 0 : index
    %0 = vector.load %arg3[%c0, %c0_0] : memref<1024x128xf32, #tpu.memory_space<vmem>>, vector<1024x128xf32>
    %c0_1 = arith.constant 0 : index
    %c0_2 = arith.constant 0 : index
    %1 = vector.load %arg5[%c0_1, %c0_2] : memref<1024x128xf32, #tpu.memory_space<vmem>>, vector<1024x128xf32>
    %c0_3 = arith.constant 0 : index
    %c0_4 = arith.constant 0 : index
    %2 = vector.load %arg9[%c0_3, %c0_4] : memref<1024x128xf32, #tpu.memory_space<vmem>>, vector<1024x128xf32>
    %cst = arith.constant 2.000000e-01 : f32
    %3 = vector.broadcast %cst : f32 to vector<1024x128xf32>
    %4 = arith.mulf %2, %3 : vector<1024x128xf32>
    %cst_5 = arith.constant 8.000000e-01 : f32
    %5 = vector.broadcast %cst_5 : f32 to vector<1024x128xf32>
    %6 = arith.mulf %1, %5 : vector<1024x128xf32>
    %7 = arith.addf %4, %6 : vector<1024x128xf32>
    %c0_6 = arith.constant 0 : index
    %c0_7 = arith.constant 0 : index
    %8 = vector.load %arg17[%c0_6, %c0_7] : memref<1024x128xf32, #tpu.memory_space<vmem>>, vector<1024x128xf32>
    tpu.vector_store %arg17[%c0_6, %c0_7], %7 {strides = array<i32>} : memref<1024x128xf32, #tpu.memory_space<vmem>>, vector<1024x128xf32>,
    %c0_8 = arith.constant 0 : index
    %c0_9 = arith.constant 0 : index
    %9 = vector.load %arg7[%c0_8, %c0_9] : memref<1024x128xf32, #tpu.memory_space<vmem>>, vector<1024x128xf32>
    %cst_10 = arith.constant 2.000000e-01 : f32
    %10 = vector.broadcast %cst_10 : f32 to vector<1024x128xf32>
    %11 = arith.mulf %9, %10 : vector<1024x128xf32>
    %cst_11 = arith.constant 8.000000e-01 : f32
    %12 = vector.broadcast %cst_11 : f32 to vector<1024x128xf32>
    %13 = arith.mulf %0, %12 : vector<1024x128xf32>
    %14 = arith.addf %11, %13 : vector<1024x128xf32>
    %c0_12 = arith.constant 0 : index
    %c0_13 = arith.constant 0 : index
    %15 = vector.load %arg15[%c0_12, %c0_13] : memref<1024x128xf32, #tpu.memory_space<vmem>>, vector<1024x128xf32>
    tpu.vector_store %arg15[%c0_12, %c0_13], %14 {strides = array<i32>} : memref<1024x128xf32, #tpu.memory_space<vmem>>, vector<1024x128xf32>,
    %c0_i32 = arith.constant 0 : i32
    %16 = arith.cmpi eq, %arg0, %c0_i32 : i32
    %17 = arith.extui %16 : i1 to i32
    %c0_i32_14 = arith.constant 0 : i32
    %18 = arith.cmpi ne, %17, %c0_i32_14 : i32
    scf.if %18 {
      %c0_36 = arith.constant 0 : index
      %c0_37 = arith.constant 0 : index
      %36 = vector.load %arg10[%c0_36, %c0_37] : memref<1x128xf32, #tpu.memory_space<vmem>>, vector<1x128xf32>
      %cst_38 = arith.constant 2.000000e-01 : f32
      %37 = vector.broadcast %cst_38 : f32 to vector<1x128xf32>
      %38 = arith.mulf %36, %37 : vector<1x128xf32>
      %c0_39 = arith.constant 0 : index
      %c0_40 = arith.constant 0 : index
      %39 = vector.load %arg6[%c0_39, %c0_40] : memref<1x128xf32, #tpu.memory_space<vmem>>, vector<1x128xf32>
      %cst_41 = arith.constant 8.000000e-01 : f32
      %40 = vector.broadcast %cst_41 : f32 to vector<1x128xf32>
      %41 = arith.mulf %39, %40 : vector<1x128xf32>
      %42 = arith.addf %38, %41 : vector<1x128xf32>
      %c0_42 = arith.constant 0 : index
      %c0_43 = arith.constant 0 : index
      %43 = vector.load %arg18[%c0_42, %c0_43] : memref<1x128xf32, #tpu.memory_space<vmem>>, vector<1x128xf32>
      tpu.vector_store %arg18[%c0_42, %c0_43], %42 {strides = array<i32>} : memref<1x128xf32, #tpu.memory_space<vmem>>, vector<1x128xf32>,
      %c0_44 = arith.constant 0 : index
      %c0_45 = arith.constant 0 : index
      %44 = vector.load %arg8[%c0_44, %c0_45] : memref<1x128xf32, #tpu.memory_space<vmem>>, vector<1x128xf32>
      %cst_46 = arith.constant 2.000000e-01 : f32
      %45 = vector.broadcast %cst_46 : f32 to vector<1x128xf32>
      %46 = arith.mulf %44, %45 : vector<1x128xf32>
      %c0_47 = arith.constant 0 : index
      %c0_48 = arith.constant 0 : index
      %47 = vector.load %arg4[%c0_47, %c0_48] : memref<1x128xf32, #tpu.memory_space<vmem>>, vector<1x128xf32>
      %cst_49 = arith.constant 8.000000e-01 : f32
      %48 = vector.broadcast %cst_49 : f32 to vector<1x128xf32>
      %49 = arith.mulf %47, %48 : vector<1x128xf32>
      %50 = arith.addf %46, %49 : vector<1x128xf32>
      %c0_50 = arith.constant 0 : index
      %c0_51 = arith.constant 0 : index
      %51 = vector.load %arg16[%c0_50, %c0_51] : memref<1x128xf32, #tpu.memory_space<vmem>>, vector<1x128xf32>
      tpu.vector_store %arg16[%c0_50, %c0_51], %50 {strides = array<i32>} : memref<1x128xf32, #tpu.memory_space<vmem>>, vector<1x128xf32>,
      %c0_52 = arith.constant 0 : index
      %c0_53 = arith.constant 0 : index
      %52 = vector.load %arg4[%c0_52, %c0_53] : memref<1x128xf32, #tpu.memory_space<vmem>>, vector<1x128xf32>
      %53 = vector.shape_cast %52 : vector<1x128xf32> to vector<1x128xf32>
      %54 = vector.broadcast %53 : vector<1x128xf32> to vector<8x128xf32>
      %c0_54 = arith.constant 0 : index
      %c0_55 = arith.constant 0 : index
      %55 = vector.load %arg11[%c0_54, %c0_55] : memref<8x128xf32, #tpu.memory_space<vmem>>, vector<8x128xf32>
      tpu.vector_store %arg11[%c0_54, %c0_55], %54 {strides = array<i32>} : memref<8x128xf32, #tpu.memory_space<vmem>>, vector<8x128xf32>,
      %c0_56 = arith.constant 0 : index
      %c0_57 = arith.constant 0 : index
      %56 = vector.load %arg6[%c0_56, %c0_57] : memref<1x128xf32, #tpu.memory_space<vmem>>, vector<1x128xf32>
      %57 = vector.shape_cast %56 : vector<1x128xf32> to vector<1x128xf32>
      %58 = vector.broadcast %57 : vector<1x128xf32> to vector<8x128xf32>
      %c0_58 = arith.constant 0 : index
      %c0_59 = arith.constant 0 : index
      %59 = vector.load %arg12[%c0_58, %c0_59] : memref<8x128xf32, #tpu.memory_space<vmem>>, vector<8x128xf32>
      tpu.vector_store %arg12[%c0_58, %c0_59], %58 {strides = array<i32>} : memref<8x128xf32, #tpu.memory_space<vmem>>, vector<8x128xf32>,
      %60 = vector.shape_cast %42 : vector<1x128xf32> to vector<1x128xf32>
      %61 = vector.broadcast %60 : vector<1x128xf32> to vector<8x128xf32>
      %c0_60 = arith.constant 0 : index
      %c0_61 = arith.constant 0 : index
      %62 = vector.load %arg13[%c0_60, %c0_61] : memref<8x128xf32, #tpu.memory_space<vmem>>, vector<8x128xf32>
      tpu.vector_store %arg13[%c0_60, %c0_61], %61 {strides = array<i32>} : memref<8x128xf32, #tpu.memory_space<vmem>>, vector<8x128xf32>,
    } else {
    }
    %c0_15 = arith.constant 0 : index
    %c0_16 = arith.constant 0 : index
    %19 = vector.load %arg1[%c0_15, %c0_16] : memref<8x1024xf32, #tpu.memory_space<vmem>>, vector<8x1024xf32>
    %c0_17 = arith.constant 0 : index
    %c0_18 = arith.constant 0 : index
    %20 = vector.load %arg2[%c0_17, %c0_18] : memref<8x1024xf32, #tpu.memory_space<vmem>>, vector<8x1024xf32>
    %c0_19 = arith.constant 0 : index
    %c0_20 = arith.constant 0 : index
    %21 = vector.load %arg11[%c0_19, %c0_20] : memref<8x128xf32, #tpu.memory_space<vmem>>, vector<8x128xf32>
    %cst_21 = arith.constant dense<0.000000e+00> : vector<8x128xf32>
    %22 = tpu.matmul %19, %0, %cst_21 {dimension_numbers = #tpu.dot_dimension_numbers<[1], [0], [0], [1], [0, 0, 1, 1], [], []>} : vector<8x1024xf32>, vector<1024x128xf32>, vector<8x128xf32> -> vector<8x128xf32>
    %23 = arith.addf %21, %22 : vector<8x128xf32>
    %c0_22 = arith.constant 0 : index
    %c0_23 = arith.constant 0 : index
    %24 = vector.load %arg11[%c0_22, %c0_23] : memref<8x128xf32, #tpu.memory_space<vmem>>, vector<8x128xf32>
    tpu.vector_store %arg11[%c0_22, %c0_23], %23 {strides = array<i32>} : memref<8x128xf32, #tpu.memory_space<vmem>>, vector<8x128xf32>,
    %c0_24 = arith.constant 0 : index
    %c0_25 = arith.constant 0 : index
    %25 = vector.load %arg12[%c0_24, %c0_25] : memref<8x128xf32, #tpu.memory_space<vmem>>, vector<8x128xf32>
    %cst_26 = arith.constant dense<0.000000e+00> : vector<8x128xf32>
    %26 = tpu.matmul %19, %1, %cst_26 {dimension_numbers = #tpu.dot_dimension_numbers<[1], [0], [0], [1], [0, 0, 1, 1], [], []>} : vector<8x1024xf32>, vector<1024x128xf32>, vector<8x128xf32> -> vector<8x128xf32>
    %27 = arith.addf %25, %26 : vector<8x128xf32>
    %c0_27 = arith.constant 0 : index
    %c0_28 = arith.constant 0 : index
    %28 = vector.load %arg12[%c0_27, %c0_28] : memref<8x128xf32, #tpu.memory_space<vmem>>, vector<8x128xf32>
    tpu.vector_store %arg12[%c0_27, %c0_28], %27 {strides = array<i32>} : memref<8x128xf32, #tpu.memory_space<vmem>>, vector<8x128xf32>,
    %c0_29 = arith.constant 0 : index
    %c0_30 = arith.constant 0 : index
    %29 = vector.load %arg13[%c0_29, %c0_30] : memref<8x128xf32, #tpu.memory_space<vmem>>, vector<8x128xf32>
    %cst_31 = arith.constant dense<0.000000e+00> : vector<8x128xf32>
    %30 = tpu.matmul %20, %7, %cst_31 {dimension_numbers = #tpu.dot_dimension_numbers<[1], [0], [0], [1], [0, 0, 1, 1], [], []>} : vector<8x1024xf32>, vector<1024x128xf32>, vector<8x128xf32> -> vector<8x128xf32>
    %31 = arith.addf %29, %30 : vector<8x128xf32>
    %c0_32 = arith.constant 0 : index
    %c0_33 = arith.constant 0 : index
    %32 = vector.load %arg13[%c0_32, %c0_33] : memref<8x128xf32, #tpu.memory_space<vmem>>, vector<8x128xf32>
    tpu.vector_store %arg13[%c0_32, %c0_33], %31 {strides = array<i32>} : memref<8x128xf32, #tpu.memory_space<vmem>>, vector<8x128xf32>,
    %c0_i32_34 = arith.constant 0 : i32
    %33 = arith.cmpi eq, %arg0, %c0_i32_34 : i32
    %34 = arith.extui %33 : i1 to i32
    %c0_i32_35 = arith.constant 0 : i32
    %35 = arith.cmpi ne, %34, %c0_i32_35 : i32
    scf.if %35 {
      %c0_36 = arith.constant 0 : index
      %c0_37 = arith.constant 0 : index
      %36 = vector.load %arg12[%c0_36, %c0_37] : memref<8x128xf32, #tpu.memory_space<vmem>>, vector<8x128xf32>
      %c0_38 = arith.constant 0 : index
      %c0_39 = arith.constant 0 : index
      %37 = vector.load %arg13[%c0_38, %c0_39] : memref<8x128xf32, #tpu.memory_space<vmem>>, vector<8x128xf32>
      %38 = arith.mulf %36, %37 : vector<8x128xf32>
      %cst_40 = arith.constant dense<0.000000e+00> : vector<8xf32>
      %39 = vector.multi_reduction <add>, %38, %cst_40 [1] : vector<8x128xf32> to vector<8xf32>
      %40 = vector.shape_cast %39 : vector<8xf32> to vector<8x1xf32>
      %cst_41 = arith.constant 14.2857141 : f32
      %41 = vector.broadcast %cst_41 : f32 to vector<8x1xf32>
      %42 = arith.mulf %40, %41 : vector<8x1xf32>
      %43 = vector.shape_cast %42 : vector<8x1xf32> to vector<8x1xf32>
      %44 = vector.broadcast %43 : vector<8x1xf32> to vector<8x128xf32>
      %c0_42 = arith.constant 0 : index
      %c0_43 = arith.constant 0 : index
      %45 = vector.load %arg14[%c0_42, %c0_43] : memref<8x128xf32, #tpu.memory_space<vmem>>, vector<8x128xf32>
      tpu.vector_store %arg14[%c0_42, %c0_43], %44 {strides = array<i32>} : memref<8x128xf32, #tpu.memory_space<vmem>>, vector<8x128xf32>,
    } else {
    }
    return
  }
  func.func @transform_0(%arg0: i32) -> (i32, i32) {
    %c0_i32 = arith.constant 0 : i32
    %c0_i32_0 = arith.constant 0 : i32
    return %c0_i32, %arg0 : i32, i32
  }
  func.func @transform_1(%arg0: i32) -> (i32, i32) {
    %c0_i32 = arith.constant 0 : i32
    %c0_i32_0 = arith.constant 0 : i32
    return %c0_i32, %arg0 : i32, i32
  }
  func.func @transform_2(%arg0: i32) -> (i32, i32) {
    %c0_i32 = arith.constant 0 : i32
    %c0_i32_0 = arith.constant 0 : i32
    return %arg0, %c0_i32 : i32, i32
  }
  func.func @transform_3(%arg0: i32) -> (i32, i32) {
    %c0_i32 = arith.constant 0 : i32
    %c0_i32_0 = arith.constant 0 : i32
    %c0_i32_1 = arith.constant 0 : i32
    return %c0_i32, %c0_i32_0 : i32, i32
  }
  func.func @transform_4(%arg0: i32) -> (i32, i32) {
    %c0_i32 = arith.constant 0 : i32
    %c0_i32_0 = arith.constant 0 : i32
    return %arg0, %c0_i32 : i32, i32
  }
  func.func @transform_5(%arg0: i32) -> (i32, i32) {
    %c0_i32 = arith.constant 0 : i32
    %c0_i32_0 = arith.constant 0 : i32
    %c0_i32_1 = arith.constant 0 : i32
    return %c0_i32, %c0_i32_0 : i32, i32
  }
  func.func @transform_6(%arg0: i32) -> (i32, i32) {
    %c0_i32 = arith.constant 0 : i32
    %c0_i32_0 = arith.constant 0 : i32
    return %arg0, %c0_i32 : i32, i32
  }
  func.func @transform_7(%arg0: i32) -> (i32, i32) {
    %c0_i32 = arith.constant 0 : i32
    %c0_i32_0 = arith.constant 0 : i32
    %c0_i32_1 = arith.constant 0 : i32
    return %c0_i32, %c0_i32_0 : i32, i32
  }
  func.func @transform_8(%arg0: i32) -> (i32, i32) {
    %c0_i32 = arith.constant 0 : i32
    %c0_i32_0 = arith.constant 0 : i32
    return %arg0, %c0_i32 : i32, i32
  }
  func.func @transform_9(%arg0: i32) -> (i32, i32) {
    %c0_i32 = arith.constant 0 : i32
    %c0_i32_0 = arith.constant 0 : i32
    %c0_i32_1 = arith.constant 0 : i32
    return %c0_i32, %c0_i32_0 : i32, i32
  }
  func.func @transform_10(%arg0: i32) -> (i32, i32) {
    %c0_i32 = arith.constant 0 : i32
    %c0_i32_0 = arith.constant 0 : i32
    %c0_i32_1 = arith.constant 0 : i32
    return %c0_i32, %c0_i32_0 : i32, i32
  }
  func.func @transform_11(%arg0: i32) -> (i32, i32) {
    %c0_i32 = arith.constant 0 : i32
    %c0_i32_0 = arith.constant 0 : i32
    %c0_i32_1 = arith.constant 0 : i32
    return %c0_i32, %c0_i32_0 : i32, i32
  }
  func.func @transform_12(%arg0: i32) -> (i32, i32) {
    %c0_i32 = arith.constant 0 : i32
    %c0_i32_0 = arith.constant 0 : i32
    %c0_i32_1 = arith.constant 0 : i32
    return %c0_i32, %c0_i32_0 : i32, i32
  }
  func.func @transform_13(%arg0: i32) -> (i32, i32) {
    %c0_i32 = arith.constant 0 : i32
    %c0_i32_0 = arith.constant 0 : i32
    %c0_i32_1 = arith.constant 0 : i32
    return %c0_i32, %c0_i32_0 : i32, i32
  }
  func.func @transform_14(%arg0: i32) -> (i32, i32) {
    %c0_i32 = arith.constant 0 : i32
    %c0_i32_0 = arith.constant 0 : i32
    return %arg0, %c0_i32 : i32, i32
  }
  func.func @transform_15(%arg0: i32) -> (i32, i32) {
    %c0_i32 = arith.constant 0 : i32
    %c0_i32_0 = arith.constant 0 : i32
    %c0_i32_1 = arith.constant 0 : i32
    return %c0_i32, %c0_i32_0 : i32, i32
  }
  func.func @transform_16(%arg0: i32) -> (i32, i32) {
    %c0_i32 = arith.constant 0 : i32
    %c0_i32_0 = arith.constant 0 : i32
    return %arg0, %c0_i32 : i32, i32
  }
  func.func @transform_17(%arg0: i32) -> (i32, i32) {
    %c0_i32 = arith.constant 0 : i32
    %c0_i32_0 = arith.constant 0 : i32
    %c0_i32_1 = arith.constant 0 : i32
    return %c0_i32, %c0_i32_0 : i32, i32
  }
}

</mosaic_0001>

<bundles_post_ra>
// kernel: tpu_custom_call.1
= control target key start
LH: loop header
LB: loop body
LE: loop exit
PB: predicated region body
PF: predicated region fallthrough
CT: control target
= control target key end

     0   :  { %s4904_s0 = inlined_call_operand.vmem [shape: f32[8,1024], index: 0, kind: input, shape index: {}]   ;;  %s4905_s1 = inlined_call_operand.vmem [shape: f32[8,1024], index: 1, kind: input, shape index: {}]   ;;  %s4906_s2 = inlined_call_operand.vmem [shape: f32[1024,128], index: 2, kind: input, shape index: {}]   ;;  %s4907_s3 = inlined_call_operand.vmem [shape: f32[1,128], index: 3, kind: input, shape index: {}]   ;;  %s4908_s4 = inlined_call_operand.vmem [shape: f32[1024,128], index: 4, kind: input, shape index: {}]   ;;  %s4909_s5 = inlined_call_operand.vmem [shape: f32[1,128], index: 5, kind: input, shape index: {}]   ;;  %s4910_s6 = inlined_call_operand.hbm [shape: f32[1024,128], index: 6, kind: input, shape index: {}, may-alias: {6,14}]   ;;  %s4911_s7 = inlined_call_operand.hbm [shape: f32[1,128], index: 7, kind: input, shape index: {}, may-alias: {7,15}]   ;;  %s4912_s8 = inlined_call_operand.hbm [shape: f32[1024,128], index: 8, kind: input, shape index: {}, may-alias: {8,16}]   ;;  %s4913_s9 = inlined_call_operand.hbm [shape: f32[1,128], index: 9, kind: input, shape index: {}, may-alias: {9,17}]   ;;  %s4914_s10 = inlined_call_operand.hbm [shape: f32[8,128], index: 10, kind: output, shape index: {0}]   ;;  %s4915_s11 = inlined_call_operand.hbm [shape: f32[8,128], index: 11, kind: output, shape index: {1}]   ;;  %s4916_s12 = inlined_call_operand.hbm [shape: f32[8,128], index: 12, kind: output, shape index: {2}]   ;;  %s4917_s13 = inlined_call_operand.hbm [shape: f32[8,128], index: 13, kind: output, shape index: {3}]   ;;  %s4918_s14 = inlined_call_operand.hbm [shape: f32[1024,128], index: 14, kind: output, shape index: {4}, may-alias: {6,14}]   ;;  %s4919_s15 = inlined_call_operand.hbm [shape: f32[1,128], index: 15, kind: output, shape index: {5}, may-alias: {7,15}]   ;;  %s4920_s16 = inlined_call_operand.hbm [shape: f32[1024,128], index: 16, kind: output, shape index: {6}, may-alias: {8,16}]   ;;  %s4921_s17 = inlined_call_operand.hbm [shape: f32[1,128], index: 17, kind: output, shape index: {7}, may-alias: {9,17}]  }
   0x1   :  { %4940 = sst [smem:[#allocation66_spill]] %s4904_s0 }
   0x2   :  { %4941 = sst [smem:[#allocation67_spill]] %s4905_s1 }
   0x3   :  { %23 = vsyncpa [#allocation3], 0 }
   0x4   :  { %24 = vsyncpa [#allocation6], 0 }
   0x5   :  { %25 = vsyncpa [#allocation9], 0 }
   0x6   :  { %26 = vsyncpa [#allocation4], 0 }
   0x7   :  { %27 = vsyncpa [#allocation12], 0 }
   0x8   :  { %28 = vsyncpa [#allocation15], 0 }
   0x9   :  { %29 = vsyncpa [#allocation18], 0 }
   0xa   :  { %30 = vsyncpa [#allocation21], 0  ;;  %s3408_s24 = smov [#allocation5]   ;;  %s3409_s26 = smov [#allocation2]  }
   0xb   :  { %s61_s25 = sshll.u32 %s3408_s24, 4  ;;  %s48_s27 = sshll.u32 %s3409_s26, 4  ;;  %s62_s25 = int_to_ptr.vmem [resolvable:$true] %s61_s25  ;;  %s49_s27 = int_to_ptr.vmem [resolvable:$true] %s48_s27 }
   0xc   :  { %s3160_s28 = scalar_lea.vmem %s62_s25, 16  ;;  %s3164_s29 = scalar_lea.vmem %s62_s25, 32 }
   0xd   :  { %p3161_p0 = scmp.ne.s32.totalorder %s62_s25, %s3160_s28  ;;  %p3165_p1 = scmp.lt.s32.totalorder %s62_s25, %s62_s25 }
   0xe   :  { %p3166_p2 = scmp.lt.s32.totalorder %s3164_s29, %s3160_s28 }
  0x10   :  { %p3167_p3 = por %p3166_p2, %p3165_p1 }
  0x12   :  { %p3168_p4 = pnand %p3167_p3, %p3161_p0 }
  0x14   :  { %3171 = shalt.err (!%p3168_p4)
}
  0x15   :  { %64 = dma.hbm_to_vmem [thread:$0]  %s4911_s7, 16, %s62_s25, [#allocation6]  }
  0x16   :  { %s3180_s18 = scalar_lea.vmem %s49_s27, 16384  ;;  %p3185_p6 = scmp.lt.s32.totalorder %s49_s27, %s49_s27 }
  0x17   :  { %p3181_p5 = scmp.ne.s32.totalorder %s49_s27, %s3180_s18  ;;  %p3186_p7 = scmp.lt.s32.totalorder %s3180_s18, %s3180_s18 }
  0x19   :  { %p3187_p8 = por %p3186_p7, %p3185_p6 }
  0x1b   :  { %p3188_p9 = pnand %p3187_p8, %p3181_p5 }
  0x1d   :  { %3191 = shalt.err (!%p3188_p9)
}
  0x1e   :  { %s3410_s19 = smov 128   ;;  %s3411_s1 = smov 8  }
  0x1f   :  { %54 = dma.hbm_to_vmem [thread:$0]  %s4910_s6, 16384, %s49_s27, [#allocation3], %s3410_s19, %s3410_s19, %s3411_s1  }
  0x20   :  { %s3412_s22 = smov [#allocation7]   ;;  %s3413_s24 = smov [#allocation8]  }
  0x21   :  { %s70_s23 = sshll.u32 %s3412_s22, 4  ;;  %s83_s7 = sshll.u32 %s3413_s24, 4  ;;  %s71_s23 = int_to_ptr.vmem [resolvable:$true] %s70_s23  ;;  %s84_s7 = int_to_ptr.vmem [resolvable:$true] %s83_s7 }
  0x22   :  { %s3200_s25 = scalar_lea.vmem %s71_s23, 16384  ;;  %p3205_p11 = scmp.lt.s32.totalorder %s71_s23, %s71_s23 }
  0x23   :  { %p3201_p10 = scmp.ne.s32.totalorder %s71_s23, %s3200_s25  ;;  %p3206_p12 = scmp.lt.s32.totalorder %s3200_s25, %s3200_s25 }
  0x25   :  { %p3207_p13 = por %p3206_p12, %p3205_p11 }
  0x27   :  { %p3208_p0 = pnand %p3207_p13, %p3201_p10 }
  0x29   :  { %3211 = shalt.err (!%p3208_p0)
}
  0x2a   :  { %76 = dma.hbm_to_vmem [thread:$0]  %s4912_s8, 16384, %s71_s23, [#allocation6], %s3410_s19, %s3410_s19, %s3411_s1  }
  0x2b   :  { %s3220_s6 = scalar_lea.vmem %s84_s7, 16  ;;  %s3224_s27 = scalar_lea.vmem %s84_s7, 32 }
  0x2c   :  { %p3221_p1 = scmp.ne.s32.totalorder %s84_s7, %s3220_s6  ;;  %p3225_p2 = scmp.lt.s32.totalorder %s84_s7, %s84_s7 }
  0x2d   :  { %p3226_p3 = scmp.lt.s32.totalorder %s3224_s27, %s3220_s6 }
  0x2f   :  { %p3227_p4 = por %p3226_p3, %p3225_p2 }
  0x31   :  { %p3228_p5 = pnand %p3227_p4, %p3221_p1 }
  0x33   :  { %3231 = shalt.err (!%p3228_p5)
}
  0x34   :  { %86 = dma.hbm_to_vmem [thread:$0]  %s4913_s9, 16, %s84_s7, [#allocation9]  }
  0x35   :  { %3392 = dma.done.wait [#allocation3], 16384  }
  0x36   :  { %3393 = vsyncadd [#allocation3], 4294950912 }
  0x37   :  { %3394 = dma.done.wait [#allocation6], 16400  }
  0x38   :  { %3395 = vsyncadd [#allocation6], 4294950896 }
  0x39   :  { %3396 = dma.done.wait [#allocation9], 16  }
  0x3a   :  { %3397 = vsyncadd [#allocation9], 4294967280  ;;  %v130_v0 = vld [vmem:[%s4906_s2 + $0xf8] sm:$0xff]  ;;  %v129_v15 = vld [vmem:[%s4906_s2 + $0xf0] sm:$0xff]  ;;  %s4942_s7 = sld [smem:[#allocation66_spill]]  ;;  %s3414_s9 = smov [#allocation11]  }
  0x3b   :  { %v1026_v1 = vld [vmem:[#allocation2 + $0xf8] sm:$0xff]  ;;  %v1282_v4 = vmul.f32 0.8, %v130_v0  ;;  %2667 = vmatprep.subr.mxu0 %v130_v0  ;;  %v1025_v19 = vld [vmem:[#allocation2 + $0xf0] sm:$0xff]  ;;  %v1281_v23 = vmul.f32 0.8, %v129_v15 }
  0x3c   :  { %v162_v2 = vld [vmem:[%s4906_s2 + $0x1f8] sm:$0xff]  ;;  %v1154_v3 = vmul.f32 0.2, %v1026_v1  ;;  %v161_v20 = vld [vmem:[%s4906_s2 + $0x1f0] sm:$0xff]  ;;  %v1153_v22 = vmul.f32 0.2, %v1025_v19 }
  0x3d   :  { %v1058_v5 = vld [vmem:[#allocation2 + $0x1f8] sm:$0xff]  ;;  %2702 = vmatprep.subr.mxu1 %v162_v2  ;;  %v1314_v8 = vmul.f32 0.8, %v162_v2  ;;  %v1057_v24 = vld [vmem:[#allocation2 + $0x1f0] sm:$0xff]  ;;  %v1313_v28 = vmul.f32 0.8, %v161_v20 }
  0x3e   :  { %v114_v6 = vld [vmem:[%s4906_s2 + $0x78] sm:$0xff]  ;;  %v1186_v7 = vmul.f32 0.2, %v1058_v5  ;;  %v1410_v11 = vadd.f32 %v1282_v4, %v1154_v3  ;;  %v113_v25 = vld [vmem:[%s4906_s2 + $0x70] sm:$0xff]  ;;  %v1185_v27 = vmul.f32 0.2, %v1057_v24  ;;  %v1409_v31 = vadd.f32 %v1281_v23, %v1153_v22 }
  0x3f   :  { %v1010_v9 = vld [vmem:[#allocation2 + $0x78] sm:$0xff]  ;;  %2668 = vmatpush3.msra.mxu0 %v114_v6  ;;  %v1266_v13 = vmul.f32 0.8, %v114_v6  ;;  %v1009_v29 = vld [vmem:[#allocation2 + $0x70] sm:$0xff]  ;;  %v1265_v33 = vmul.f32 0.8, %v113_v25 }
  0x40   :  { %v146_v10 = vld [vmem:[%s4906_s2 + $0x178] sm:$0xff]  ;;  %v1138_v12 = vmul.f32 0.2, %v1010_v9  ;;  %v1442_v16 = vadd.f32 %v1314_v8, %v1186_v7  ;;  %2669 = vmatprep.subr.mxu0 %v129_v15  ;;  %1538 = vst [vmem:[#allocation16 + $0xf8] sm:$0xff] %v1410_v11  ;;  %v145_v30 = vld [vmem:[%s4906_s2 + $0x170] sm:$0xff]  ;;  %v128_v35 = vld [vmem:[%s4906_s2 + $0xe8] sm:$0xff]  ;;  %v1441_v36 = vadd.f32 %v1313_v28, %v1185_v27 }
  0x41   :  { %v1042_v14 = vld [vmem:[#allocation2 + $0x178] sm:$0xff]  ;;  %2703 = vmatpush3.msra.mxu1 %v146_v10  ;;  %v1298_v18 = vmul.f32 0.8, %v146_v10  ;;  %2670 = vmatpush3.msra.mxu0 %v113_v25  ;;  %v1137_v32 = vmul.f32 0.2, %v1009_v29  ;;  %v1041_v34 = vld [vmem:[#allocation2 + $0x170] sm:$0xff] }
  0x42   :  { %v1170_v17 = vmul.f32 0.2, %v1042_v14  ;;  %v1394_v21 = vadd.f32 %v1266_v13, %v1138_v12  ;;  %2704 = vmatprep.subr.mxu1 %v161_v20  ;;  %1570 = vst [vmem:[#allocation16 + $0x1f8] sm:$0xff] %v1442_v16  ;;  %v1169_v37 = vmul.f32 0.2, %v1041_v34  ;;  %v1024_v39 = vld [vmem:[#allocation2 + $0xe8] sm:$0xff]  ;;  %2671 = vmatprep.subr.mxu0 %v128_v35 }
  0x43   :  { %2705 = vmatpush3.msra.mxu1 %v145_v30  ;;  %v1297_v38 = vmul.f32 0.8, %v145_v30  ;;  %v160_v40 = vld [vmem:[%s4906_s2 + $0x1e8] sm:$0xff]  ;;  %1537 = vst [vmem:[#allocation16 + $0xf0] sm:$0xff] %v1409_v31  ;;  %v1393_v41 = vadd.f32 %v1265_v33, %v1137_v32  ;;  %v1152_v42 = vmul.f32 0.2, %v1024_v39 }
  0x44   :  { %v1426_v26 = vadd.f32 %v1298_v18, %v1170_v17  ;;  %1522 = vst [vmem:[#allocation16 + $0x78] sm:$0xff] %v1394_v21  ;;  %v1280_v43 = vmul.f32 0.8, %v128_v35  ;;  %v1056_v44 = vld [vmem:[#allocation2 + $0x1e8] sm:$0xff]  ;;  %2706 = vmatprep.subr.mxu1 %v160_v40  ;;  %1569 = vst [vmem:[#allocation16 + $0x1f0] sm:$0xff] %v1441_v36  ;;  %v127_v55 = vld [vmem:[%s4906_s2 + $0xe0] sm:$0xff] }
  0x45   :  { %v112_v45 = vld [vmem:[%s4906_s2 + $0x68] sm:$0xff]  ;;  %v1425_v46 = vadd.f32 %v1297_v38, %v1169_v37  ;;  %v1184_v47 = vmul.f32 0.2, %v1056_v44  ;;  %v1312_v48 = vmul.f32 0.8, %v160_v40  ;;  %1521 = vst [vmem:[#allocation16 + $0x70] sm:$0xff] %v1393_v41 }
  0x46   :  { %1554 = vst [vmem:[#allocation16 + $0x178] sm:$0xff] %v1426_v26  ;;  %v1008_v49 = vld [vmem:[#allocation2 + $0x68] sm:$0xff]  ;;  %2672 = vmatpush3.msra.mxu0 %v112_v45  ;;  %v1408_v51 = vadd.f32 %v1280_v43, %v1152_v42  ;;  %v1264_v53 = vmul.f32 0.8, %v112_v45  ;;  %v1023_v59 = vld [vmem:[#allocation2 + $0xe0] sm:$0xff]  ;;  %v126_v11 = vld [vmem:[%s4906_s2 + $0xd8] sm:$0xff] }
  0x47   :  { %v144_v50 = vld [vmem:[%s4906_s2 + $0x168] sm:$0xff]  ;;  %v1136_v52 = vmul.f32 0.2, %v1008_v49  ;;  %1553 = vst [vmem:[#allocation16 + $0x170] sm:$0xff] %v1425_v46  ;;  %v1440_v56 = vadd.f32 %v1312_v48, %v1184_v47  ;;  %2673 = vmatprep.subr.mxu0 %v127_v55  ;;  %v159_v60 = vld [vmem:[%s4906_s2 + $0x1e0] sm:$0xff]  ;;  %v1022_v15 = vld [vmem:[#allocation2 + $0xd8] sm:$0xff] }
  0x48   :  { %v1040_v54 = vld [vmem:[#allocation2 + $0x168] sm:$0xff]  ;;  %2707 = vmatpush3.msra.mxu1 %v144_v50  ;;  %v1296_v58 = vmul.f32 0.8, %v144_v50  ;;  %1536 = vst [vmem:[#allocation16 + $0xe8] sm:$0xff] %v1408_v51  ;;  %v1151_v62 = vmul.f32 0.2, %v1023_v59 }
  0x49   :  { %v1168_v57 = vmul.f32 0.2, %v1040_v54  ;;  %v1392_v61 = vadd.f32 %v1264_v53, %v1136_v52  ;;  %v1279_v63 = vmul.f32 0.8, %v127_v55  ;;  %v1055_v0 = vld [vmem:[#allocation2 + $0x1e0] sm:$0xff]  ;;  %2708 = vmatprep.subr.mxu1 %v159_v60  ;;  %1568 = vst [vmem:[#allocation16 + $0x1e8] sm:$0xff] %v1440_v56 }
  0x4a   :  { %v111_v1 = vld [vmem:[%s4906_s2 + $0x60] sm:$0xff]  ;;  %v1183_v3 = vmul.f32 0.2, %v1055_v0  ;;  %v1311_v4 = vmul.f32 0.8, %v159_v60  ;;  %v158_v16 = vld [vmem:[%s4906_s2 + $0x1d8] sm:$0xff] }
  0x4b   :  { %v1424_v2 = vadd.f32 %v1296_v58, %v1168_v57  ;;  %v1007_v5 = vld [vmem:[#allocation2 + $0x60] sm:$0xff]  ;;  %2674 = vmatpush3.msra.mxu0 %v111_v1  ;;  %1520 = vst [vmem:[#allocation16 + $0x68] sm:$0xff] %v1392_v61  ;;  %v1407_v7 = vadd.f32 %v1279_v63, %v1151_v62  ;;  %v1263_v9 = vmul.f32 0.8, %v111_v1  ;;  %v1150_v18 = vmul.f32 0.2, %v1022_v15 }
  0x4c   :  { %v143_v6 = vld [vmem:[%s4906_s2 + $0x160] sm:$0xff]  ;;  %v1135_v8 = vmul.f32 0.2, %v1007_v5  ;;  %v1439_v12 = vadd.f32 %v1311_v4, %v1183_v3  ;;  %2675 = vmatprep.subr.mxu0 %v126_v11  ;;  %v1278_v19 = vmul.f32 0.8, %v126_v11  ;;  %v1054_v20 = vld [vmem:[#allocation2 + $0x1d8] sm:$0xff] }
  0x4d   :  { %v1039_v10 = vld [vmem:[#allocation2 + $0x160] sm:$0xff]  ;;  %2709 = vmatpush3.msra.mxu1 %v143_v6  ;;  %1552 = vst [vmem:[#allocation16 + $0x168] sm:$0xff] %v1424_v2  ;;  %v1295_v14 = vmul.f32 0.8, %v143_v6  ;;  %1535 = vst [vmem:[#allocation16 + $0xe0] sm:$0xff] %v1407_v7  ;;  %v110_v21 = vld [vmem:[%s4906_s2 + $0x58] sm:$0xff] }
  0x4e   :  { %v1167_v13 = vmul.f32 0.2, %v1039_v10  ;;  %v1391_v17 = vadd.f32 %v1263_v9, %v1135_v8  ;;  %2710 = vmatprep.subr.mxu1 %v158_v16  ;;  %1567 = vst [vmem:[#allocation16 + $0x1e0] sm:$0xff] %v1439_v12  ;;  %v1182_v23 = vmul.f32 0.2, %v1054_v20  ;;  %v1006_v25 = vld [vmem:[#allocation2 + $0x58] sm:$0xff]  ;;  %2676 = vmatpush3.msra.mxu0 %v110_v21  ;;  %v1406_v27 = vadd.f32 %v1278_v19, %v1150_v18 }
  0x4f   :  { %v1310_v24 = vmul.f32 0.8, %v158_v16  ;;  %v142_v26 = vld [vmem:[%s4906_s2 + $0x158] sm:$0xff]  ;;  %v1134_v28 = vmul.f32 0.2, %v1006_v25  ;;  %v125_v31 = vld [vmem:[%s4906_s2 + $0xd0] sm:$0xff] }
  0x50   :  { %v1423_v22 = vadd.f32 %v1295_v14, %v1167_v13  ;;  %1519 = vst [vmem:[#allocation16 + $0x60] sm:$0xff] %v1391_v17  ;;  %v1262_v29 = vmul.f32 0.8, %v110_v21  ;;  %v1038_v30 = vld [vmem:[#allocation2 + $0x158] sm:$0xff]  ;;  %2711 = vmatpush3.msra.mxu1 %v142_v26  ;;  %v1294_v34 = vmul.f32 0.8, %v142_v26  ;;  %2677 = vmatprep.subr.mxu0 %v125_v31 }
  0x51   :  { %v1438_v32 = vadd.f32 %v1310_v24, %v1182_v23  ;;  %v1166_v33 = vmul.f32 0.2, %v1038_v30  ;;  %v1021_v35 = vld [vmem:[#allocation2 + $0xd0] sm:$0xff]  ;;  %1534 = vst [vmem:[#allocation16 + $0xd8] sm:$0xff] %v1406_v27  ;;  %v1277_v39 = vmul.f32 0.8, %v125_v31 }
  0x52   :  { %1551 = vst [vmem:[#allocation16 + $0x160] sm:$0xff] %v1423_v22  ;;  %v157_v36 = vld [vmem:[%s4906_s2 + $0x1d0] sm:$0xff]  ;;  %v1390_v37 = vadd.f32 %v1262_v29, %v1134_v28  ;;  %v1149_v38 = vmul.f32 0.2, %v1021_v35  ;;  %v124_v51 = vld [vmem:[%s4906_s2 + $0xc8] sm:$0xff]  ;;  %v123_v7 = vld [vmem:[%s4906_s2 + $0xc0] sm:$0xff] }
  0x53   :  { %v1053_v40 = vld [vmem:[#allocation2 + $0x1d0] sm:$0xff]  ;;  %2712 = vmatprep.subr.mxu1 %v157_v36  ;;  %1566 = vst [vmem:[#allocation16 + $0x1d8] sm:$0xff] %v1438_v32  ;;  %v1422_v42 = vadd.f32 %v1294_v34, %v1166_v33  ;;  %v1309_v44 = vmul.f32 0.8, %v157_v36  ;;  %v1020_v55 = vld [vmem:[#allocation2 + $0xc8] sm:$0xff]  ;;  %v1019_v11 = vld [vmem:[#allocation2 + $0xc0] sm:$0xff] }
  0x54   :  { %v109_v41 = vld [vmem:[%s4906_s2 + $0x50] sm:$0xff]  ;;  %v1181_v43 = vmul.f32 0.2, %v1053_v40  ;;  %1518 = vst [vmem:[#allocation16 + $0x58] sm:$0xff] %v1390_v37  ;;  %v1405_v47 = vadd.f32 %v1277_v39, %v1149_v38  ;;  %v156_v56 = vld [vmem:[%s4906_s2 + $0x1c8] sm:$0xff]  ;;  %v155_v12 = vld [vmem:[%s4906_s2 + $0x1c0] sm:$0xff] }
  0x55   :  { %v1005_v45 = vld [vmem:[#allocation2 + $0x50] sm:$0xff]  ;;  %2678 = vmatpush3.msra.mxu0 %v109_v41  ;;  %v1261_v49 = vmul.f32 0.8, %v109_v41  ;;  %1550 = vst [vmem:[#allocation16 + $0x158] sm:$0xff] %v1422_v42  ;;  %v1148_v58 = vmul.f32 0.2, %v1020_v55 }
  0x56   :  { %v141_v46 = vld [vmem:[%s4906_s2 + $0x150] sm:$0xff]  ;;  %v1133_v48 = vmul.f32 0.2, %v1005_v45  ;;  %v1437_v52 = vadd.f32 %v1309_v44, %v1181_v43  ;;  %2679 = vmatprep.subr.mxu0 %v124_v51  ;;  %1533 = vst [vmem:[#allocation16 + $0xd0] sm:$0xff] %v1405_v47  ;;  %v1276_v59 = vmul.f32 0.8, %v124_v51 }
  0x57   :  { %v1037_v50 = vld [vmem:[#allocation2 + $0x150] sm:$0xff]  ;;  %2713 = vmatpush3.msra.mxu1 %v141_v46  ;;  %v1293_v54 = vmul.f32 0.8, %v141_v46  ;;  %v1052_v60 = vld [vmem:[#allocation2 + $0x1c8] sm:$0xff]  ;;  %v1308_v0 = vmul.f32 0.8, %v156_v56 }
  0x58   :  { %v1165_v53 = vmul.f32 0.2, %v1037_v50  ;;  %v1389_v57 = vadd.f32 %v1261_v49, %v1133_v48  ;;  %2714 = vmatprep.subr.mxu1 %v156_v56  ;;  %v108_v61 = vld [vmem:[%s4906_s2 + $0x48] sm:$0xff]  ;;  %1565 = vst [vmem:[#allocation16 + $0x1d0] sm:$0xff] %v1437_v52  ;;  %v1180_v63 = vmul.f32 0.2, %v1052_v60  ;;  %v1404_v3 = vadd.f32 %v1276_v59, %v1148_v58 }
  0x59   :  { %v1004_v1 = vld [vmem:[#allocation2 + $0x48] sm:$0xff]  ;;  %2680 = vmatpush3.msra.mxu0 %v108_v61  ;;  %v1260_v5 = vmul.f32 0.8, %v108_v61  ;;  %v1147_v14 = vmul.f32 0.2, %v1019_v11  ;;  %v1051_v16 = vld [vmem:[#allocation2 + $0x1c0] sm:$0xff] }
  0x5a   :  { %v1421_v62 = vadd.f32 %v1293_v54, %v1165_v53  ;;  %v140_v2 = vld [vmem:[%s4906_s2 + $0x148] sm:$0xff]  ;;  %1517 = vst [vmem:[#allocation16 + $0x50] sm:$0xff] %v1389_v57  ;;  %v1132_v4 = vmul.f32 0.2, %v1004_v1  ;;  %v1436_v8 = vadd.f32 %v1308_v0, %v1180_v63  ;;  %2681 = vmatprep.subr.mxu0 %v123_v7  ;;  %1532 = vst [vmem:[#allocation16 + $0xc8] sm:$0xff] %v1404_v3  ;;  %v107_v17 = vld [vmem:[%s4906_s2 + $0x40] sm:$0xff] }
  0x5b   :  { %v1036_v6 = vld [vmem:[#allocation2 + $0x148] sm:$0xff]  ;;  %2715 = vmatpush3.msra.mxu1 %v140_v2  ;;  %v1292_v10 = vmul.f32 0.8, %v140_v2  ;;  %v1275_v15 = vmul.f32 0.8, %v123_v7  ;;  %v1003_v21 = vld [vmem:[#allocation2 + $0x40] sm:$0xff]  ;;  %2682 = vmatpush3.msra.mxu0 %v107_v17 }
  0x5c   :  { %1549 = vst [vmem:[#allocation16 + $0x150] sm:$0xff] %v1421_v62  ;;  %v1164_v9 = vmul.f32 0.2, %v1036_v6  ;;  %v1388_v13 = vadd.f32 %v1260_v5, %v1132_v4  ;;  %2716 = vmatprep.subr.mxu1 %v155_v12  ;;  %1564 = vst [vmem:[#allocation16 + $0x1c8] sm:$0xff] %v1436_v8  ;;  %v1179_v19 = vmul.f32 0.2, %v1051_v16 }
  0x5d   :  { %v1307_v20 = vmul.f32 0.8, %v155_v12  ;;  %v139_v22 = vld [vmem:[%s4906_s2 + $0x140] sm:$0xff]  ;;  %v1403_v23 = vadd.f32 %v1275_v15, %v1147_v14  ;;  %v1131_v24 = vmul.f32 0.2, %v1003_v21  ;;  %v122_v27 = vld [vmem:[%s4906_s2 + $0xb8] sm:$0xff] }
  0x5e   :  { %v1420_v18 = vadd.f32 %v1292_v10, %v1164_v9  ;;  %1516 = vst [vmem:[#allocation16 + $0x48] sm:$0xff] %v1388_v13  ;;  %v1259_v25 = vmul.f32 0.8, %v107_v17  ;;  %v1035_v26 = vld [vmem:[#allocation2 + $0x140] sm:$0xff]  ;;  %2717 = vmatpush3.msra.mxu1 %v139_v22  ;;  %v1291_v30 = vmul.f32 0.8, %v139_v22  ;;  %2683 = vmatprep.subr.mxu0 %v122_v27 }
  0x5f   :  { %v1435_v28 = vadd.f32 %v1307_v20, %v1179_v19  ;;  %v1163_v29 = vmul.f32 0.2, %v1035_v26  ;;  %v1018_v31 = vld [vmem:[#allocation2 + $0xb8] sm:$0xff]  ;;  %1531 = vst [vmem:[#allocation16 + $0xc0] sm:$0xff] %v1403_v23  ;;  %v1274_v35 = vmul.f32 0.8, %v122_v27 }
  0x60   :  { %1548 = vst [vmem:[#allocation16 + $0x148] sm:$0xff] %v1420_v18  ;;  %v154_v32 = vld [vmem:[%s4906_s2 + $0x1b8] sm:$0xff]  ;;  %v1387_v33 = vadd.f32 %v1259_v25, %v1131_v24  ;;  %v1146_v34 = vmul.f32 0.2, %v1018_v31  ;;  %v121_v47 = vld [vmem:[%s4906_s2 + $0xb0] sm:$0xff]  ;;  %v120_v3 = vld [vmem:[%s4906_s2 + $0xa8] sm:$0xff] }
  0x61   :  { %v1050_v36 = vld [vmem:[#allocation2 + $0x1b8] sm:$0xff]  ;;  %2718 = vmatprep.subr.mxu1 %v154_v32  ;;  %1563 = vst [vmem:[#allocation16 + $0x1c0] sm:$0xff] %v1435_v28  ;;  %v1419_v38 = vadd.f32 %v1291_v30, %v1163_v29  ;;  %v1306_v40 = vmul.f32 0.8, %v154_v32  ;;  %v1017_v51 = vld [vmem:[#allocation2 + $0xb0] sm:$0xff]  ;;  %v1016_v7 = vld [vmem:[#allocation2 + $0xa8] sm:$0xff] }
  0x62   :  { %v106_v37 = vld [vmem:[%s4906_s2 + $0x38] sm:$0xff]  ;;  %v1178_v39 = vmul.f32 0.2, %v1050_v36  ;;  %1515 = vst [vmem:[#allocation16 + $0x40] sm:$0xff] %v1387_v33  ;;  %v1402_v43 = vadd.f32 %v1274_v35, %v1146_v34  ;;  %v153_v52 = vld [vmem:[%s4906_s2 + $0x1b0] sm:$0xff]  ;;  %v152_v8 = vld [vmem:[%s4906_s2 + $0x1a8] sm:$0xff] }
  0x63   :  { %v1002_v41 = vld [vmem:[#allocation2 + $0x38] sm:$0xff]  ;;  %2684 = vmatpush3.msra.mxu0 %v106_v37  ;;  %v1258_v45 = vmul.f32 0.8, %v106_v37  ;;  %1547 = vst [vmem:[#allocation16 + $0x140] sm:$0xff] %v1419_v38  ;;  %v1145_v54 = vmul.f32 0.2, %v1017_v51 }
  0x64   :  { %v138_v42 = vld [vmem:[%s4906_s2 + $0x138] sm:$0xff]  ;;  %v1130_v44 = vmul.f32 0.2, %v1002_v41  ;;  %v1434_v48 = vadd.f32 %v1306_v40, %v1178_v39  ;;  %2685 = vmatprep.subr.mxu0 %v121_v47  ;;  %1530 = vst [vmem:[#allocation16 + $0xb8] sm:$0xff] %v1402_v43  ;;  %v1273_v55 = vmul.f32 0.8, %v121_v47 }
  0x65   :  { %v1034_v46 = vld [vmem:[#allocation2 + $0x138] sm:$0xff]  ;;  %2719 = vmatpush3.msra.mxu1 %v138_v42  ;;  %v1290_v50 = vmul.f32 0.8, %v138_v42  ;;  %v1049_v56 = vld [vmem:[#allocation2 + $0x1b0] sm:$0xff]  ;;  %v1305_v60 = vmul.f32 0.8, %v153_v52 }
  0x66   :  { %v1162_v49 = vmul.f32 0.2, %v1034_v46  ;;  %v1386_v53 = vadd.f32 %v1258_v45, %v1130_v44  ;;  %2720 = vmatprep.subr.mxu1 %v153_v52  ;;  %v105_v57 = vld [vmem:[%s4906_s2 + $0x30] sm:$0xff]  ;;  %1562 = vst [vmem:[#allocation16 + $0x1b8] sm:$0xff] %v1434_v48  ;;  %v1177_v59 = vmul.f32 0.2, %v1049_v56  ;;  %v1401_v63 = vadd.f32 %v1273_v55, %v1145_v54 }
  0x67   :  { %v1001_v61 = vld [vmem:[#allocation2 + $0x30] sm:$0xff]  ;;  %2686 = vmatpush3.msra.mxu0 %v105_v57  ;;  %v1257_v1 = vmul.f32 0.8, %v105_v57  ;;  %v1144_v10 = vmul.f32 0.2, %v1016_v7  ;;  %v1048_v12 = vld [vmem:[#allocation2 + $0x1a8] sm:$0xff] }
  0x68   :  { %v1418_v58 = vadd.f32 %v1290_v50, %v1162_v49  ;;  %v137_v62 = vld [vmem:[%s4906_s2 + $0x130] sm:$0xff]  ;;  %1514 = vst [vmem:[#allocation16 + $0x38] sm:$0xff] %v1386_v53  ;;  %v1129_v0 = vmul.f32 0.2, %v1001_v61  ;;  %v1433_v4 = vadd.f32 %v1305_v60, %v1177_v59  ;;  %2687 = vmatprep.subr.mxu0 %v120_v3  ;;  %1529 = vst [vmem:[#allocation16 + $0xb0] sm:$0xff] %v1401_v63  ;;  %v104_v13 = vld [vmem:[%s4906_s2 + $0x28] sm:$0xff] }
  0x69   :  { %v1033_v2 = vld [vmem:[#allocation2 + $0x130] sm:$0xff]  ;;  %2721 = vmatpush3.msra.mxu1 %v137_v62  ;;  %v1289_v6 = vmul.f32 0.8, %v137_v62  ;;  %v1272_v11 = vmul.f32 0.8, %v120_v3  ;;  %v1000_v17 = vld [vmem:[#allocation2 + $0x28] sm:$0xff]  ;;  %2688 = vmatpush3.msra.mxu0 %v104_v13 }
  0x6a   :  { %1546 = vst [vmem:[#allocation16 + $0x138] sm:$0xff] %v1418_v58  ;;  %v1161_v5 = vmul.f32 0.2, %v1033_v2  ;;  %v1385_v9 = vadd.f32 %v1257_v1, %v1129_v0  ;;  %2722 = vmatprep.subr.mxu1 %v152_v8  ;;  %1561 = vst [vmem:[#allocation16 + $0x1b0] sm:$0xff] %v1433_v4  ;;  %v1176_v15 = vmul.f32 0.2, %v1048_v12 }
  0x6b   :  { %v1304_v16 = vmul.f32 0.8, %v152_v8  ;;  %v136_v18 = vld [vmem:[%s4906_s2 + $0x128] sm:$0xff]  ;;  %v1400_v19 = vadd.f32 %v1272_v11, %v1144_v10  ;;  %v1128_v20 = vmul.f32 0.2, %v1000_v17  ;;  %v119_v23 = vld [vmem:[%s4906_s2 + $0xa0] sm:$0xff] }
  0x6c   :  { %v1417_v14 = vadd.f32 %v1289_v6, %v1161_v5  ;;  %1513 = vst [vmem:[#allocation16 + $0x30] sm:$0xff] %v1385_v9  ;;  %v1256_v21 = vmul.f32 0.8, %v104_v13  ;;  %v1032_v22 = vld [vmem:[#allocation2 + $0x128] sm:$0xff]  ;;  %2723 = vmatpush3.msra.mxu1 %v136_v18  ;;  %v1288_v26 = vmul.f32 0.8, %v136_v18  ;;  %2689 = vmatprep.subr.mxu0 %v119_v23 }
  0x6d   :  { %v1432_v24 = vadd.f32 %v1304_v16, %v1176_v15  ;;  %v1160_v25 = vmul.f32 0.2, %v1032_v22  ;;  %v1015_v27 = vld [vmem:[#allocation2 + $0xa0] sm:$0xff]  ;;  %1528 = vst [vmem:[#allocation16 + $0xa8] sm:$0xff] %v1400_v19  ;;  %v1271_v31 = vmul.f32 0.8, %v119_v23 }
  0x6e   :  { %1545 = vst [vmem:[#allocation16 + $0x130] sm:$0xff] %v1417_v14  ;;  %v151_v28 = vld [vmem:[%s4906_s2 + $0x1a0] sm:$0xff]  ;;  %v1384_v29 = vadd.f32 %v1256_v21, %v1128_v20  ;;  %v1143_v30 = vmul.f32 0.2, %v1015_v27  ;;  %v118_v43 = vld [vmem:[%s4906_s2 + $0x98] sm:$0xff]  ;;  %v117_v63 = vld [vmem:[%s4906_s2 + $0x90] sm:$0xff] }
  0x6f   :  { %v1047_v32 = vld [vmem:[#allocation2 + $0x1a0] sm:$0xff]  ;;  %2724 = vmatprep.subr.mxu1 %v151_v28  ;;  %1560 = vst [vmem:[#allocation16 + $0x1a8] sm:$0xff] %v1432_v24  ;;  %v1416_v34 = vadd.f32 %v1288_v26, %v1160_v25  ;;  %v1303_v36 = vmul.f32 0.8, %v151_v28  ;;  %v1014_v47 = vld [vmem:[#allocation2 + $0x98] sm:$0xff]  ;;  %v1013_v3 = vld [vmem:[#allocation2 + $0x90] sm:$0xff] }
  0x70   :  { %v103_v33 = vld [vmem:[%s4906_s2 + $0x20] sm:$0xff]  ;;  %v1175_v35 = vmul.f32 0.2, %v1047_v32  ;;  %1512 = vst [vmem:[#allocation16 + $0x28] sm:$0xff] %v1384_v29  ;;  %v1399_v39 = vadd.f32 %v1271_v31, %v1143_v30  ;;  %v150_v48 = vld [vmem:[%s4906_s2 + $0x198] sm:$0xff]  ;;  %v149_v4 = vld [vmem:[%s4906_s2 + $0x190] sm:$0xff] }
  0x71   :  { %v999_v37 = vld [vmem:[#allocation2 + $0x20] sm:$0xff]  ;;  %2690 = vmatpush3.msra.mxu0 %v103_v33  ;;  %v1255_v41 = vmul.f32 0.8, %v103_v33  ;;  %1544 = vst [vmem:[#allocation16 + $0x128] sm:$0xff] %v1416_v34  ;;  %v1142_v50 = vmul.f32 0.2, %v1014_v47 }
  0x72   :  { %v135_v38 = vld [vmem:[%s4906_s2 + $0x120] sm:$0xff]  ;;  %v1127_v40 = vmul.f32 0.2, %v999_v37  ;;  %v1431_v44 = vadd.f32 %v1303_v36, %v1175_v35  ;;  %2691 = vmatprep.subr.mxu0 %v118_v43  ;;  %1527 = vst [vmem:[#allocation16 + $0xa0] sm:$0xff] %v1399_v39  ;;  %v1270_v51 = vmul.f32 0.8, %v118_v43 }
  0x73   :  { %v1031_v42 = vld [vmem:[#allocation2 + $0x120] sm:$0xff]  ;;  %2725 = vmatpush3.msra.mxu1 %v135_v38  ;;  %v1287_v46 = vmul.f32 0.8, %v135_v38  ;;  %v1046_v52 = vld [vmem:[#allocation2 + $0x198] sm:$0xff]  ;;  %v1302_v56 = vmul.f32 0.8, %v150_v48 }
  0x74   :  { %v1159_v45 = vmul.f32 0.2, %v1031_v42  ;;  %v1383_v49 = vadd.f32 %v1255_v41, %v1127_v40  ;;  %2726 = vmatprep.subr.mxu1 %v150_v48  ;;  %v102_v53 = vld [vmem:[%s4906_s2 + $0x18] sm:$0xff]  ;;  %1559 = vst [vmem:[#allocation16 + $0x1a0] sm:$0xff] %v1431_v44  ;;  %v1174_v55 = vmul.f32 0.2, %v1046_v52  ;;  %v1398_v59 = vadd.f32 %v1270_v51, %v1142_v50 }
  0x75   :  { %v998_v57 = vld [vmem:[#allocation2 + $0x18] sm:$0xff]  ;;  %2692 = vmatpush3.msra.mxu0 %v102_v53  ;;  %v1254_v61 = vmul.f32 0.8, %v102_v53  ;;  %v1141_v6 = vmul.f32 0.2, %v1013_v3  ;;  %v1045_v8 = vld [vmem:[#allocation2 + $0x190] sm:$0xff] }
  0x76   :  { %v1415_v54 = vadd.f32 %v1287_v46, %v1159_v45  ;;  %v134_v58 = vld [vmem:[%s4906_s2 + $0x118] sm:$0xff]  ;;  %1511 = vst [vmem:[#allocation16 + $0x20] sm:$0xff] %v1383_v49  ;;  %v1126_v60 = vmul.f32 0.2, %v998_v57  ;;  %v1430_v0 = vadd.f32 %v1302_v56, %v1174_v55  ;;  %2693 = vmatprep.subr.mxu0 %v117_v63  ;;  %1526 = vst [vmem:[#allocation16 + $0x98] sm:$0xff] %v1398_v59  ;;  %v101_v9 = vld [vmem:[%s4906_s2 + $0x10] sm:$0xff] }
  0x77   :  { %v1030_v62 = vld [vmem:[#allocation2 + $0x118] sm:$0xff]  ;;  %2727 = vmatpush3.msra.mxu1 %v134_v58  ;;  %v1286_v2 = vmul.f32 0.8, %v134_v58  ;;  %v1269_v7 = vmul.f32 0.8, %v117_v63  ;;  %v997_v13 = vld [vmem:[#allocation2 + $0x10] sm:$0xff]  ;;  %2694 = vmatpush3.msra.mxu0 %v101_v9 }
  0x78   :  { %1543 = vst [vmem:[#allocation16 + $0x120] sm:$0xff] %v1415_v54  ;;  %v1158_v1 = vmul.f32 0.2, %v1030_v62  ;;  %v1382_v5 = vadd.f32 %v1254_v61, %v1126_v60  ;;  %2728 = vmatprep.subr.mxu1 %v149_v4  ;;  %1558 = vst [vmem:[#allocation16 + $0x198] sm:$0xff] %v1430_v0  ;;  %v1173_v11 = vmul.f32 0.2, %v1045_v8 }
  0x79   :  { %v1301_v12 = vmul.f32 0.8, %v149_v4  ;;  %v133_v14 = vld [vmem:[%s4906_s2 + $0x110] sm:$0xff]  ;;  %v1397_v15 = vadd.f32 %v1269_v7, %v1141_v6  ;;  %v1125_v16 = vmul.f32 0.2, %v997_v13  ;;  %v116_v19 = vld [vmem:[%s4906_s2 + $0x88] sm:$0xff] }
  0x7a   :  { %v1414_v10 = vadd.f32 %v1286_v2, %v1158_v1  ;;  %1510 = vst [vmem:[#allocation16 + $0x18] sm:$0xff] %v1382_v5  ;;  %v1253_v17 = vmul.f32 0.8, %v101_v9  ;;  %v1029_v18 = vld [vmem:[#allocation2 + $0x110] sm:$0xff]  ;;  %2729 = vmatpush3.msra.mxu1 %v133_v14  ;;  %v1285_v22 = vmul.f32 0.8, %v133_v14  ;;  %2695 = vmatprep.subr.mxu0 %v116_v19 }
  0x7b   :  { %v1429_v20 = vadd.f32 %v1301_v12, %v1173_v11  ;;  %v1157_v21 = vmul.f32 0.2, %v1029_v18  ;;  %v1012_v23 = vld [vmem:[#allocation2 + $0x88] sm:$0xff]  ;;  %1525 = vst [vmem:[#allocation16 + $0x90] sm:$0xff] %v1397_v15  ;;  %v1268_v27 = vmul.f32 0.8, %v116_v19 }
  0x7c   :  { %1542 = vst [vmem:[#allocation16 + $0x118] sm:$0xff] %v1414_v10  ;;  %v148_v24 = vld [vmem:[%s4906_s2 + $0x188] sm:$0xff]  ;;  %v1381_v25 = vadd.f32 %v1253_v17, %v1125_v16  ;;  %v1140_v26 = vmul.f32 0.2, %v1012_v23  ;;  %v115_v39 = vld [vmem:[%s4906_s2 + $0x80] sm:$0xff]  ;;  %v3731_v63 = vld [vmem:[%s4942_s7 + $0x18] sm:$0xff] }
  0x7d   :  { %v1044_v28 = vld [vmem:[#allocation2 + $0x188] sm:$0xff]  ;;  %2730 = vmatprep.subr.mxu1 %v148_v24  ;;  %1557 = vst [vmem:[#allocation16 + $0x190] sm:$0xff] %v1429_v20  ;;  %v1413_v30 = vadd.f32 %v1285_v22, %v1157_v21  ;;  %v1300_v32 = vmul.f32 0.8, %v148_v24  ;;  %v1011_v43 = vld [vmem:[#allocation2 + $0x80] sm:$0xff]  ;;  %1825 = vmatprep.mubr.f32.mxu1 %v3731_v63  ;;  %v1676_v2 = vld [vmem:[%s4942_s7 + $0x10] sm:$0xff] }
  0x7e   :  { %v100_v29 = vld [vmem:[%s4906_s2 + $0x8] sm:$0xff]  ;;  %v1172_v31 = vmul.f32 0.2, %v1044_v28  ;;  %1509 = vst [vmem:[#allocation16 + $0x10] sm:$0xff] %v1381_v25  ;;  %v1396_v35 = vadd.f32 %v1268_v27, %v1140_v26  ;;  %v147_v44 = vld [vmem:[%s4906_s2 + $0x180] sm:$0xff]  ;;  %v194_v3 = vld [vmem:[%s4906_s2 + $0x2f8] sm:$0xff] }
  0x7f   :  { %v996_v33 = vld [vmem:[#allocation2 + $0x8] sm:$0xff]  ;;  %2696 = vmatpush3.msra.mxu0 %v100_v29  ;;  %v1252_v37 = vmul.f32 0.8, %v100_v29  ;;  %1541 = vst [vmem:[#allocation16 + $0x110] sm:$0xff] %v1413_v30  ;;  %v1139_v46 = vmul.f32 0.2, %v1011_v43 }
  0x80   :  { %v132_v34 = vld [vmem:[%s4906_s2 + $0x108] sm:$0xff]  ;;  %v1124_v36 = vmul.f32 0.2, %v996_v33  ;;  %v1428_v40 = vadd.f32 %v1300_v32, %v1172_v31  ;;  %2697 = vmatprep.subr.mxu0 %v115_v39  ;;  %1524 = vst [vmem:[#allocation16 + $0x88] sm:$0xff] %v1396_v35  ;;  %v1267_v47 = vmul.f32 0.8, %v115_v39 }
  0x81   :  { %v1028_v38 = vld [vmem:[#allocation2 + $0x108] sm:$0xff]  ;;  %2731 = vmatpush3.msra.mxu1 %v132_v34  ;;  %v1284_v42 = vmul.f32 0.8, %v132_v34  ;;  %v1043_v48 = vld [vmem:[#allocation2 + $0x180] sm:$0xff]  ;;  %v1299_v52 = vmul.f32 0.8, %v147_v44 }
  0x82   :  { %v1156_v41 = vmul.f32 0.2, %v1028_v38  ;;  %v1380_v45 = vadd.f32 %v1252_v37, %v1124_v36  ;;  %2732 = vmatprep.subr.mxu1 %v147_v44  ;;  %v99_v49 = vld [vmem:[%s4906_s2] sm:$0xff]  ;;  %1556 = vst [vmem:[#allocation16 + $0x188] sm:$0xff] %v1428_v40  ;;  %v1171_v51 = vmul.f32 0.2, %v1043_v48  ;;  %v1395_v55 = vadd.f32 %v1267_v47, %v1139_v46 }
  0x83   :  { %v995_v53 = vld [vmem:[#allocation2] sm:$0xff]  ;;  %2698 = vmatpush3.msra.mxu0 %v99_v49  ;;  %v3722_v54 = vld [vmem:[%s4942_s7 + $0x8] sm:$0xff]  ;;  %v1251_v57 = vmul.f32 0.8, %v99_v49  ;;  %v1090_v4 = vld [vmem:[#allocation2 + $0x2f8] sm:$0xff]  ;;  %s4988_s8 = sld [smem:[#allocation67_spill]] }
  0x84   :  { %v1412_v50 = vadd.f32 %v1284_v42, %v1156_v41  ;;  %1508 = vst [vmem:[#allocation16 + $0x8] sm:$0xff] %v1380_v45  ;;  %v1123_v56 = vmul.f32 0.2, %v995_v53  ;;  %1755 = vmatprep.mubr.f32.mxu0 %v3722_v54  ;;  %v131_v58 = vld [vmem:[%s4906_s2 + $0x100] sm:$0xff]  ;;  %v1427_v60 = vadd.f32 %v1299_v52, %v1171_v51  ;;  %1523 = vst [vmem:[#allocation16 + $0x80] sm:$0xff] %v1395_v55  ;;  %2737 = vmatprep.subr.mxu0 %v194_v3  ;;  %v226_v8 = vld [vmem:[%s4906_s2 + $0x3f8] sm:$0xff] }
  0x85   :  { %v1027_v59 = vld [vmem:[#allocation2 + $0x100] sm:$0xff]  ;;  %v1283_v62 = vmul.f32 0.8, %v131_v58  ;;  %2733 = vmatpush3.msra.mxu1 %v131_v58  ;;  %v1218_v6 = vmul.f32 0.2, %v1090_v4  ;;  %v1122_v9 = vld [vmem:[#allocation2 + $0x3f8] sm:$0xff] }
  0x86   :  { %1540 = vst [vmem:[#allocation16 + $0x108] sm:$0xff] %v1412_v50  ;;  %v1155_v61 = vmul.f32 0.2, %v1027_v59  ;;  %v1674_v0 = vld [vmem:[%s4942_s7] sm:$0xff]  ;;  %v1379_v1 = vadd.f32 %v1251_v57, %v1123_v56  ;;  %1555 = vst [vmem:[#allocation16 + $0x180] sm:$0xff] %v1427_v60  ;;  %1826 = vmatmul.mubr.f32.vlgmr.msra.gmra.mxu1 %v1676_v2  ;;  %2772 = vmatprep.subr.mxu1 %v226_v8  ;;  %v178_v12 = vld [vmem:[%s4906_s2 + $0x278] sm:$0xff] }
  0x87   :  { %1756 = vmatmul.mubr.f32.vlgmr.msra.gmra.mxu0 %v1674_v0  ;;  %v1346_v7 = vmul.f32 0.8, %v194_v3  ;;  %v1250_v10 = vmul.f32 0.2, %v1122_v9  ;;  %v1378_v11 = vmul.f32 0.8, %v226_v8 }
  0x88   :  { %v1411_v5 = vadd.f32 %v1283_v62, %v1155_v61  ;;  %1507 = vst [vmem:[#allocation16] sm:$0xff] %v1379_v1  ;;  %v1074_v13 = vld [vmem:[#allocation2 + $0x278] sm:$0xff]  ;;  %v1330_v16 = vmul.f32 0.8, %v178_v12  ;;  %2738 = vmatpush3.msra.mxu0 %v178_v12  ;;  %v193_v22 = vld [vmem:[%s4906_s2 + $0x2f0] sm:$0xff]  ;;  %v192_v42 = vld [vmem:[%s4906_s2 + $0x2e8] sm:$0xff] }
  0x89   :  { %v1474_v14 = vadd.f32 %v1346_v7, %v1218_v6  ;;  %v1202_v15 = vmul.f32 0.2, %v1074_v13  ;;  %v210_v17 = vld [vmem:[%s4906_s2 + $0x378] sm:$0xff]  ;;  %v1506_v19 = vadd.f32 %v1378_v11, %v1250_v10  ;;  %v1089_v23 = vld [vmem:[#allocation2 + $0x2f0] sm:$0xff]  ;;  %v1345_v26 = vmul.f32 0.8, %v193_v22  ;;  %2739 = vmatprep.subr.mxu0 %v193_v22 }
  0x8a   :  { %1539 = vst [vmem:[#allocation16 + $0x100] sm:$0xff] %v1411_v5  ;;  %v1106_v18 = vld [vmem:[#allocation2 + $0x378] sm:$0xff]  ;;  %v1362_v21 = vmul.f32 0.8, %v210_v17  ;;  %2773 = vmatpush3.msra.mxu1 %v210_v17  ;;  %v1217_v25 = vmul.f32 0.2, %v1089_v23 }
  0x8b   :  { %v1234_v20 = vmul.f32 0.2, %v1106_v18  ;;  %1602 = vst [vmem:[#allocation16 + $0x2f8] sm:$0xff] %v1474_v14  ;;  %v1458_v24 = vadd.f32 %v1330_v16, %v1202_v15  ;;  %v225_v27 = vld [vmem:[%s4906_s2 + $0x3f0] sm:$0xff]  ;;  %1634 = vst [vmem:[#allocation16 + $0x3f8] sm:$0xff] %v1506_v19  ;;  %v1088_v43 = vld [vmem:[#allocation2 + $0x2e8] sm:$0xff] }
  0x8c   :  { %v1121_v28 = vld [vmem:[#allocation2 + $0x3f0] sm:$0xff]  ;;  %v1377_v31 = vmul.f32 0.8, %v225_v27  ;;  %2774 = vmatprep.subr.mxu1 %v225_v27  ;;  %v1473_v34 = vadd.f32 %v1345_v26, %v1217_v25  ;;  %v1216_v45 = vmul.f32 0.2, %v1088_v43  ;;  %v224_v47 = vld [vmem:[%s4906_s2 + $0x3e8] sm:$0xff] }
  0x8d   :  { %v1490_v29 = vadd.f32 %v1362_v21, %v1234_v20  ;;  %v1249_v30 = vmul.f32 0.2, %v1121_v28  ;;  %v177_v32 = vld [vmem:[%s4906_s2 + $0x270] sm:$0xff]  ;;  %1586 = vst [vmem:[#allocation16 + $0x278] sm:$0xff] %v1458_v24  ;;  %v1344_v46 = vmul.f32 0.8, %v192_v42 }
  0x8e   :  { %v1073_v33 = vld [vmem:[#allocation2 + $0x270] sm:$0xff]  ;;  %v1329_v36 = vmul.f32 0.8, %v177_v32  ;;  %2740 = vmatpush3.msra.mxu0 %v177_v32  ;;  %1601 = vst [vmem:[#allocation16 + $0x2f0] sm:$0xff] %v1473_v34  ;;  %v1120_v48 = vld [vmem:[#allocation2 + $0x3e8] sm:$0xff]  ;;  %v191_v0 = vld [vmem:[%s4906_s2 + $0x2e0] sm:$0xff] }
  0x8f   :  { %v1201_v35 = vmul.f32 0.2, %v1073_v33  ;;  %v209_v37 = vld [vmem:[%s4906_s2 + $0x370] sm:$0xff]  ;;  %1618 = vst [vmem:[#allocation16 + $0x378] sm:$0xff] %v1490_v29  ;;  %v1505_v39 = vadd.f32 %v1377_v31, %v1249_v30  ;;  %2741 = vmatprep.subr.mxu0 %v192_v42  ;;  %v1248_v50 = vmul.f32 0.2, %v1120_v48  ;;  %v1472_v55 = vadd.f32 %v1344_v46, %v1216_v45 }
  0x90   :  { %v1105_v38 = vld [vmem:[#allocation2 + $0x370] sm:$0xff]  ;;  %v1361_v41 = vmul.f32 0.8, %v209_v37  ;;  %2775 = vmatpush3.msra.mxu1 %v209_v37  ;;  %v1376_v51 = vmul.f32 0.8, %v224_v47  ;;  %v176_v52 = vld [vmem:[%s4906_s2 + $0x268] sm:$0xff] }
  0x91   :  { %v1233_v40 = vmul.f32 0.2, %v1105_v38  ;;  %v1457_v44 = vadd.f32 %v1329_v36, %v1201_v35  ;;  %1633 = vst [vmem:[#allocation16 + $0x3f0] sm:$0xff] %v1505_v39  ;;  %2776 = vmatprep.subr.mxu1 %v224_v47  ;;  %v1072_v53 = vld [vmem:[#allocation2 + $0x268] sm:$0xff]  ;;  %v1328_v57 = vmul.f32 0.8, %v176_v52  ;;  %2742 = vmatpush3.msra.mxu0 %v176_v52 }
  0x92   :  { %v1200_v56 = vmul.f32 0.2, %v1072_v53  ;;  %v208_v58 = vld [vmem:[%s4906_s2 + $0x368] sm:$0xff]  ;;  %v1504_v60 = vadd.f32 %v1376_v51, %v1248_v50  ;;  %v1087_v1 = vld [vmem:[#allocation2 + $0x2e0] sm:$0xff]  ;;  %1600 = vst [vmem:[#allocation16 + $0x2e8] sm:$0xff] %v1472_v55  ;;  %2743 = vmatprep.subr.mxu0 %v191_v0  ;;  %v190_v20 = vld [vmem:[%s4906_s2 + $0x2d8] sm:$0xff] }
  0x93   :  { %v1489_v49 = vadd.f32 %v1361_v41, %v1233_v40  ;;  %1585 = vst [vmem:[#allocation16 + $0x270] sm:$0xff] %v1457_v44  ;;  %v1104_v59 = vld [vmem:[#allocation2 + $0x368] sm:$0xff]  ;;  %v1360_v62 = vmul.f32 0.8, %v208_v58  ;;  %2777 = vmatpush3.msra.mxu1 %v208_v58  ;;  %v1215_v3 = vmul.f32 0.2, %v1087_v1 }
  0x94   :  { %v1232_v61 = vmul.f32 0.2, %v1104_v59  ;;  %v1456_v2 = vadd.f32 %v1328_v57, %v1200_v56  ;;  %v1343_v4 = vmul.f32 0.8, %v191_v0  ;;  %v223_v5 = vld [vmem:[%s4906_s2 + $0x3e0] sm:$0xff]  ;;  %1632 = vst [vmem:[#allocation16 + $0x3e8] sm:$0xff] %v1504_v60 }
  0x95   :  { %1617 = vst [vmem:[#allocation16 + $0x370] sm:$0xff] %v1489_v49  ;;  %v1119_v6 = vld [vmem:[#allocation2 + $0x3e0] sm:$0xff]  ;;  %v1375_v9 = vmul.f32 0.8, %v223_v5  ;;  %2778 = vmatprep.subr.mxu1 %v223_v5  ;;  %v1086_v21 = vld [vmem:[#allocation2 + $0x2d8] sm:$0xff]  ;;  %v189_v40 = vld [vmem:[%s4906_s2 + $0x2d0] sm:$0xff] }
  0x96   :  { %v1488_v7 = vadd.f32 %v1360_v62, %v1232_v61  ;;  %v1247_v8 = vmul.f32 0.2, %v1119_v6  ;;  %v175_v10 = vld [vmem:[%s4906_s2 + $0x260] sm:$0xff]  ;;  %1584 = vst [vmem:[#allocation16 + $0x268] sm:$0xff] %v1456_v2  ;;  %v1471_v12 = vadd.f32 %v1343_v4, %v1215_v3  ;;  %v1214_v23 = vmul.f32 0.2, %v1086_v21 }
  0x97   :  { %v1071_v11 = vld [vmem:[#allocation2 + $0x260] sm:$0xff]  ;;  %v1327_v14 = vmul.f32 0.8, %v175_v10  ;;  %2744 = vmatpush3.msra.mxu0 %v175_v10  ;;  %v1342_v24 = vmul.f32 0.8, %v190_v20  ;;  %v222_v25 = vld [vmem:[%s4906_s2 + $0x3d8] sm:$0xff] }
  0x98   :  { %v1199_v13 = vmul.f32 0.2, %v1071_v11  ;;  %v207_v15 = vld [vmem:[%s4906_s2 + $0x360] sm:$0xff]  ;;  %1616 = vst [vmem:[#allocation16 + $0x368] sm:$0xff] %v1488_v7  ;;  %v1503_v17 = vadd.f32 %v1375_v9, %v1247_v8  ;;  %1599 = vst [vmem:[#allocation16 + $0x2e0] sm:$0xff] %v1471_v12  ;;  %2745 = vmatprep.subr.mxu0 %v190_v20  ;;  %v1118_v26 = vld [vmem:[#allocation2 + $0x3d8] sm:$0xff] }
  0x99   :  { %v1103_v16 = vld [vmem:[#allocation2 + $0x360] sm:$0xff]  ;;  %v1359_v19 = vmul.f32 0.8, %v207_v15  ;;  %2779 = vmatpush3.msra.mxu1 %v207_v15  ;;  %v1246_v28 = vmul.f32 0.2, %v1118_v26  ;;  %v174_v30 = vld [vmem:[%s4906_s2 + $0x258] sm:$0xff]  ;;  %v1470_v32 = vadd.f32 %v1342_v24, %v1214_v23 }
  0x9a   :  { %v1231_v18 = vmul.f32 0.2, %v1103_v16  ;;  %v1455_v22 = vadd.f32 %v1327_v14, %v1199_v13  ;;  %1631 = vst [vmem:[#allocation16 + $0x3e0] sm:$0xff] %v1503_v17  ;;  %v1374_v29 = vmul.f32 0.8, %v222_v25  ;;  %2780 = vmatprep.subr.mxu1 %v222_v25  ;;  %v1070_v31 = vld [vmem:[#allocation2 + $0x258] sm:$0xff]  ;;  %2746 = vmatpush3.msra.mxu0 %v174_v30 }
  0x9b   :  { %v1198_v33 = vmul.f32 0.2, %v1070_v31  ;;  %v1326_v34 = vmul.f32 0.8, %v174_v30  ;;  %v206_v35 = vld [vmem:[%s4906_s2 + $0x358] sm:$0xff]  ;;  %v1085_v41 = vld [vmem:[#allocation2 + $0x2d0] sm:$0xff]  ;;  %2747 = vmatprep.subr.mxu0 %v189_v40 }
  0x9c   :  { %v1487_v27 = vadd.f32 %v1359_v19, %v1231_v18  ;;  %1583 = vst [vmem:[#allocation16 + $0x260] sm:$0xff] %v1455_v22  ;;  %v1102_v36 = vld [vmem:[#allocation2 + $0x358] sm:$0xff]  ;;  %v1502_v37 = vadd.f32 %v1374_v29, %v1246_v28  ;;  %v1358_v39 = vmul.f32 0.8, %v206_v35  ;;  %2781 = vmatpush3.msra.mxu1 %v206_v35  ;;  %1598 = vst [vmem:[#allocation16 + $0x2d8] sm:$0xff] %v1470_v32  ;;  %v221_v45 = vld [vmem:[%s4906_s2 + $0x3d0] sm:$0xff] }
  0x9d   :  { %v1230_v38 = vmul.f32 0.2, %v1102_v36  ;;  %v1454_v42 = vadd.f32 %v1326_v34, %v1198_v33  ;;  %v1213_v43 = vmul.f32 0.2, %v1085_v41  ;;  %v1341_v44 = vmul.f32 0.8, %v189_v40  ;;  %2782 = vmatprep.subr.mxu1 %v221_v45 }
  0x9e   :  { %1615 = vst [vmem:[#allocation16 + $0x360] sm:$0xff] %v1487_v27  ;;  %v1117_v46 = vld [vmem:[#allocation2 + $0x3d0] sm:$0xff]  ;;  %1630 = vst [vmem:[#allocation16 + $0x3d8] sm:$0xff] %v1502_v37  ;;  %v1373_v49 = vmul.f32 0.8, %v221_v45  ;;  %v188_v61 = vld [vmem:[%s4906_s2 + $0x2c8] sm:$0xff] }
  0x9f   :  { %v1486_v47 = vadd.f32 %v1358_v39, %v1230_v38  ;;  %v1245_v48 = vmul.f32 0.2, %v1117_v46  ;;  %v173_v50 = vld [vmem:[%s4906_s2 + $0x250] sm:$0xff]  ;;  %1582 = vst [vmem:[#allocation16 + $0x258] sm:$0xff] %v1454_v42  ;;  %v1469_v52 = vadd.f32 %v1341_v44, %v1213_v43  ;;  %v1084_v62 = vld [vmem:[#allocation2 + $0x2c8] sm:$0xff]  ;;  %v187_v18 = vld [vmem:[%s4906_s2 + $0x2c0] sm:$0xff] }
  0xa0   :  { %v1069_v51 = vld [vmem:[#allocation2 + $0x250] sm:$0xff]  ;;  %v1325_v55 = vmul.f32 0.8, %v173_v50  ;;  %2748 = vmatpush3.msra.mxu0 %v173_v50  ;;  %v1212_v1 = vmul.f32 0.2, %v1084_v62  ;;  %v220_v3 = vld [vmem:[%s4906_s2 + $0x3c8] sm:$0xff] }
  0xa1   :  { %v1197_v53 = vmul.f32 0.2, %v1069_v51  ;;  %v205_v56 = vld [vmem:[%s4906_s2 + $0x350] sm:$0xff]  ;;  %1614 = vst [vmem:[#allocation16 + $0x358] sm:$0xff] %v1486_v47  ;;  %v1501_v58 = vadd.f32 %v1373_v49, %v1245_v48  ;;  %1597 = vst [vmem:[#allocation16 + $0x2d0] sm:$0xff] %v1469_v52  ;;  %2749 = vmatprep.subr.mxu0 %v188_v61  ;;  %v1116_v4 = vld [vmem:[#allocation2 + $0x3c8] sm:$0xff] }
  0xa2   :  { %v1101_v57 = vld [vmem:[#allocation2 + $0x350] sm:$0xff]  ;;  %v1357_v60 = vmul.f32 0.8, %v205_v56  ;;  %2783 = vmatpush3.msra.mxu1 %v205_v56  ;;  %v1340_v2 = vmul.f32 0.8, %v188_v61  ;;  %v172_v8 = vld [vmem:[%s4906_s2 + $0x248] sm:$0xff] }
  0xa3   :  { %v1229_v59 = vmul.f32 0.2, %v1101_v57  ;;  %v1453_v0 = vadd.f32 %v1325_v55, %v1197_v53  ;;  %1629 = vst [vmem:[#allocation16 + $0x3d0] sm:$0xff] %v1501_v58  ;;  %v1244_v6 = vmul.f32 0.2, %v1116_v4  ;;  %2784 = vmatprep.subr.mxu1 %v220_v3  ;;  %v1068_v9 = vld [vmem:[#allocation2 + $0x248] sm:$0xff]  ;;  %2750 = vmatpush3.msra.mxu0 %v172_v8 }
  0xa4   :  { %v1372_v7 = vmul.f32 0.8, %v220_v3  ;;  %v1468_v10 = vadd.f32 %v1340_v2, %v1212_v1  ;;  %v1196_v11 = vmul.f32 0.2, %v1068_v9  ;;  %v1324_v12 = vmul.f32 0.8, %v172_v8  ;;  %2751 = vmatprep.subr.mxu0 %v187_v18 }
  0xa5   :  { %v1485_v5 = vadd.f32 %v1357_v60, %v1229_v59  ;;  %1581 = vst [vmem:[#allocation16 + $0x250] sm:$0xff] %v1453_v0  ;;  %v204_v13 = vld [vmem:[%s4906_s2 + $0x348] sm:$0xff]  ;;  %v1083_v19 = vld [vmem:[#allocation2 + $0x2c0] sm:$0xff]  ;;  %v1339_v22 = vmul.f32 0.8, %v187_v18  ;;  %v186_v38 = vld [vmem:[%s4906_s2 + $0x2b8] sm:$0xff] }
  0xa6   :  { %v1100_v14 = vld [vmem:[#allocation2 + $0x348] sm:$0xff]  ;;  %v1500_v15 = vadd.f32 %v1372_v7, %v1244_v6  ;;  %v1356_v17 = vmul.f32 0.8, %v204_v13  ;;  %2785 = vmatpush3.msra.mxu1 %v204_v13  ;;  %1596 = vst [vmem:[#allocation16 + $0x2c8] sm:$0xff] %v1468_v10  ;;  %v1452_v20 = vadd.f32 %v1324_v12, %v1196_v11  ;;  %v1211_v21 = vmul.f32 0.2, %v1083_v19 }
  0xa7   :  { %1613 = vst [vmem:[#allocation16 + $0x350] sm:$0xff] %v1485_v5  ;;  %v1228_v16 = vmul.f32 0.2, %v1100_v14  ;;  %v219_v23 = vld [vmem:[%s4906_s2 + $0x3c0] sm:$0xff]  ;;  %v1082_v39 = vld [vmem:[#allocation2 + $0x2b8] sm:$0xff]  ;;  %v185_v59 = vld [vmem:[%s4906_s2 + $0x2b0] sm:$0xff] }
  0xa8   :  { %v1115_v24 = vld [vmem:[#allocation2 + $0x3c0] sm:$0xff]  ;;  %1628 = vst [vmem:[#allocation16 + $0x3c8] sm:$0xff] %v1500_v15  ;;  %v1371_v27 = vmul.f32 0.8, %v219_v23  ;;  %2786 = vmatprep.subr.mxu1 %v219_v23  ;;  %1580 = vst [vmem:[#allocation16 + $0x248] sm:$0xff] %v1452_v20  ;;  %v1467_v30 = vadd.f32 %v1339_v22, %v1211_v21  ;;  %v218_v43 = vld [vmem:[%s4906_s2 + $0x3b8] sm:$0xff] }
  0xa9   :  { %v1484_v25 = vadd.f32 %v1356_v17, %v1228_v16  ;;  %v1243_v26 = vmul.f32 0.2, %v1115_v24  ;;  %v171_v28 = vld [vmem:[%s4906_s2 + $0x240] sm:$0xff]  ;;  %v1210_v41 = vmul.f32 0.2, %v1082_v39  ;;  %v1114_v44 = vld [vmem:[#allocation2 + $0x3b8] sm:$0xff] }
  0xaa   :  { %v1067_v29 = vld [vmem:[#allocation2 + $0x240] sm:$0xff]  ;;  %v1323_v32 = vmul.f32 0.8, %v171_v28  ;;  %2752 = vmatpush3.msra.mxu0 %v171_v28  ;;  %1595 = vst [vmem:[#allocation16 + $0x2c0] sm:$0xff] %v1467_v30  ;;  %v1338_v42 = vmul.f32 0.8, %v186_v38 }
  0xab   :  { %v1195_v31 = vmul.f32 0.2, %v1067_v29  ;;  %v203_v33 = vld [vmem:[%s4906_s2 + $0x340] sm:$0xff]  ;;  %1612 = vst [vmem:[#allocation16 + $0x348] sm:$0xff] %v1484_v25  ;;  %v1499_v35 = vadd.f32 %v1371_v27, %v1243_v26  ;;  %2753 = vmatprep.subr.mxu0 %v186_v38  ;;  %v1242_v46 = vmul.f32 0.2, %v1114_v44 }
  0xac   :  { %v1099_v34 = vld [vmem:[#allocation2 + $0x340] sm:$0xff]  ;;  %v1355_v37 = vmul.f32 0.8, %v203_v33  ;;  %2787 = vmatpush3.msra.mxu1 %v203_v33  ;;  %v1370_v47 = vmul.f32 0.8, %v218_v43  ;;  %v170_v48 = vld [vmem:[%s4906_s2 + $0x238] sm:$0xff]  ;;  %v1466_v50 = vadd.f32 %v1338_v42, %v1210_v41 }
  0xad   :  { %v1227_v36 = vmul.f32 0.2, %v1099_v34  ;;  %v1451_v40 = vadd.f32 %v1323_v32, %v1195_v31  ;;  %1627 = vst [vmem:[#allocation16 + $0x3c0] sm:$0xff] %v1499_v35  ;;  %2788 = vmatprep.subr.mxu1 %v218_v43  ;;  %v1066_v49 = vld [vmem:[#allocation2 + $0x238] sm:$0xff]  ;;  %v1322_v52 = vmul.f32 0.8, %v170_v48  ;;  %2754 = vmatpush3.msra.mxu0 %v170_v48 }
  0xae   :  { %v1194_v51 = vmul.f32 0.2, %v1066_v49  ;;  %v202_v53 = vld [vmem:[%s4906_s2 + $0x338] sm:$0xff]  ;;  %v1498_v56 = vadd.f32 %v1370_v47, %v1242_v46  ;;  %v1081_v60 = vld [vmem:[#allocation2 + $0x2b0] sm:$0xff]  ;;  %1594 = vst [vmem:[#allocation16 + $0x2b8] sm:$0xff] %v1466_v50  ;;  %2755 = vmatprep.subr.mxu0 %v185_v59  ;;  %v184_v16 = vld [vmem:[%s4906_s2 + $0x2a8] sm:$0xff] }
  0xaf   :  { %v1483_v45 = vadd.f32 %v1355_v37, %v1227_v36  ;;  %1579 = vst [vmem:[#allocation16 + $0x240] sm:$0xff] %v1451_v40  ;;  %v1098_v55 = vld [vmem:[#allocation2 + $0x338] sm:$0xff]  ;;  %v1354_v58 = vmul.f32 0.8, %v202_v53  ;;  %2789 = vmatpush3.msra.mxu1 %v202_v53  ;;  %v1209_v62 = vmul.f32 0.2, %v1081_v60 }
  0xb0   :  { %v1226_v57 = vmul.f32 0.2, %v1098_v55  ;;  %v1450_v61 = vadd.f32 %v1322_v52, %v1194_v51  ;;  %v1337_v0 = vmul.f32 0.8, %v185_v59  ;;  %v217_v1 = vld [vmem:[%s4906_s2 + $0x3b0] sm:$0xff]  ;;  %1626 = vst [vmem:[#allocation16 + $0x3b8] sm:$0xff] %v1498_v56 }
  0xb1   :  { %1611 = vst [vmem:[#allocation16 + $0x340] sm:$0xff] %v1483_v45  ;;  %v1113_v2 = vld [vmem:[#allocation2 + $0x3b0] sm:$0xff]  ;;  %v1369_v5 = vmul.f32 0.8, %v217_v1  ;;  %2790 = vmatprep.subr.mxu1 %v217_v1  ;;  %v1080_v17 = vld [vmem:[#allocation2 + $0x2a8] sm:$0xff]  ;;  %v183_v36 = vld [vmem:[%s4906_s2 + $0x2a0] sm:$0xff] }
  0xb2   :  { %v1482_v3 = vadd.f32 %v1354_v58, %v1226_v57  ;;  %v1241_v4 = vmul.f32 0.2, %v1113_v2  ;;  %v169_v6 = vld [vmem:[%s4906_s2 + $0x230] sm:$0xff]  ;;  %1578 = vst [vmem:[#allocation16 + $0x238] sm:$0xff] %v1450_v61  ;;  %v1465_v8 = vadd.f32 %v1337_v0, %v1209_v62  ;;  %v1208_v19 = vmul.f32 0.2, %v1080_v17 }
  0xb3   :  { %v1065_v7 = vld [vmem:[#allocation2 + $0x230] sm:$0xff]  ;;  %v1321_v10 = vmul.f32 0.8, %v169_v6  ;;  %2756 = vmatpush3.msra.mxu0 %v169_v6  ;;  %v1336_v20 = vmul.f32 0.8, %v184_v16  ;;  %v216_v21 = vld [vmem:[%s4906_s2 + $0x3a8] sm:$0xff] }
  0xb4   :  { %v1193_v9 = vmul.f32 0.2, %v1065_v7  ;;  %v201_v11 = vld [vmem:[%s4906_s2 + $0x330] sm:$0xff]  ;;  %1610 = vst [vmem:[#allocation16 + $0x338] sm:$0xff] %v1482_v3  ;;  %v1497_v13 = vadd.f32 %v1369_v5, %v1241_v4  ;;  %1593 = vst [vmem:[#allocation16 + $0x2b0] sm:$0xff] %v1465_v8  ;;  %2757 = vmatprep.subr.mxu0 %v184_v16  ;;  %v1112_v22 = vld [vmem:[#allocation2 + $0x3a8] sm:$0xff] }
  0xb5   :  { %v1097_v12 = vld [vmem:[#allocation2 + $0x330] sm:$0xff]  ;;  %v1353_v15 = vmul.f32 0.8, %v201_v11  ;;  %2791 = vmatpush3.msra.mxu1 %v201_v11  ;;  %v1240_v24 = vmul.f32 0.2, %v1112_v22  ;;  %v168_v26 = vld [vmem:[%s4906_s2 + $0x228] sm:$0xff]  ;;  %v1464_v28 = vadd.f32 %v1336_v20, %v1208_v19 }
  0xb6   :  { %v1225_v14 = vmul.f32 0.2, %v1097_v12  ;;  %v1449_v18 = vadd.f32 %v1321_v10, %v1193_v9  ;;  %1625 = vst [vmem:[#allocation16 + $0x3b0] sm:$0xff] %v1497_v13  ;;  %v1368_v25 = vmul.f32 0.8, %v216_v21  ;;  %2792 = vmatprep.subr.mxu1 %v216_v21  ;;  %v1064_v27 = vld [vmem:[#allocation2 + $0x228] sm:$0xff]  ;;  %2758 = vmatpush3.msra.mxu0 %v168_v26 }
  0xb7   :  { %v1192_v29 = vmul.f32 0.2, %v1064_v27  ;;  %v1320_v30 = vmul.f32 0.8, %v168_v26  ;;  %v200_v31 = vld [vmem:[%s4906_s2 + $0x328] sm:$0xff]  ;;  %v1079_v37 = vld [vmem:[#allocation2 + $0x2a0] sm:$0xff]  ;;  %2759 = vmatprep.subr.mxu0 %v183_v36 }
  0xb8   :  { %v1481_v23 = vadd.f32 %v1353_v15, %v1225_v14  ;;  %1577 = vst [vmem:[#allocation16 + $0x230] sm:$0xff] %v1449_v18  ;;  %v1096_v32 = vld [vmem:[#allocation2 + $0x328] sm:$0xff]  ;;  %v1496_v33 = vadd.f32 %v1368_v25, %v1240_v24  ;;  %v1352_v35 = vmul.f32 0.8, %v200_v31  ;;  %2793 = vmatpush3.msra.mxu1 %v200_v31  ;;  %1592 = vst [vmem:[#allocation16 + $0x2a8] sm:$0xff] %v1464_v28  ;;  %v215_v41 = vld [vmem:[%s4906_s2 + $0x3a0] sm:$0xff] }
  0xb9   :  { %v1224_v34 = vmul.f32 0.2, %v1096_v32  ;;  %v1448_v38 = vadd.f32 %v1320_v30, %v1192_v29  ;;  %v1207_v39 = vmul.f32 0.2, %v1079_v37  ;;  %v1335_v40 = vmul.f32 0.8, %v183_v36  ;;  %2794 = vmatprep.subr.mxu1 %v215_v41 }
  0xba   :  { %1609 = vst [vmem:[#allocation16 + $0x330] sm:$0xff] %v1481_v23  ;;  %v1111_v42 = vld [vmem:[#allocation2 + $0x3a0] sm:$0xff]  ;;  %1624 = vst [vmem:[#allocation16 + $0x3a8] sm:$0xff] %v1496_v33  ;;  %v1367_v45 = vmul.f32 0.8, %v215_v41  ;;  %v182_v57 = vld [vmem:[%s4906_s2 + $0x298] sm:$0xff] }
  0xbb   :  { %v1480_v43 = vadd.f32 %v1352_v35, %v1224_v34  ;;  %v1239_v44 = vmul.f32 0.2, %v1111_v42  ;;  %v167_v46 = vld [vmem:[%s4906_s2 + $0x220] sm:$0xff]  ;;  %1576 = vst [vmem:[#allocation16 + $0x228] sm:$0xff] %v1448_v38  ;;  %v1463_v48 = vadd.f32 %v1335_v40, %v1207_v39  ;;  %v1078_v58 = vld [vmem:[#allocation2 + $0x298] sm:$0xff]  ;;  %v181_v14 = vld [vmem:[%s4906_s2 + $0x290] sm:$0xff] }
  0xbc   :  { %v1063_v47 = vld [vmem:[#allocation2 + $0x220] sm:$0xff]  ;;  %v1319_v50 = vmul.f32 0.8, %v167_v46  ;;  %2760 = vmatpush3.msra.mxu0 %v167_v46  ;;  %v1206_v60 = vmul.f32 0.2, %v1078_v58  ;;  %v214_v62 = vld [vmem:[%s4906_s2 + $0x398] sm:$0xff] }
  0xbd   :  { %v1191_v49 = vmul.f32 0.2, %v1063_v47  ;;  %v199_v51 = vld [vmem:[%s4906_s2 + $0x320] sm:$0xff]  ;;  %1608 = vst [vmem:[#allocation16 + $0x328] sm:$0xff] %v1480_v43  ;;  %v1495_v53 = vadd.f32 %v1367_v45, %v1239_v44  ;;  %1591 = vst [vmem:[#allocation16 + $0x2a0] sm:$0xff] %v1463_v48  ;;  %2761 = vmatprep.subr.mxu0 %v182_v57  ;;  %v1110_v0 = vld [vmem:[#allocation2 + $0x398] sm:$0xff] }
  0xbe   :  { %v1095_v52 = vld [vmem:[#allocation2 + $0x320] sm:$0xff]  ;;  %v1351_v56 = vmul.f32 0.8, %v199_v51  ;;  %2795 = vmatpush3.msra.mxu1 %v199_v51  ;;  %v1334_v61 = vmul.f32 0.8, %v182_v57  ;;  %v166_v4 = vld [vmem:[%s4906_s2 + $0x218] sm:$0xff] }
  0xbf   :  { %v1223_v55 = vmul.f32 0.2, %v1095_v52  ;;  %v1447_v59 = vadd.f32 %v1319_v50, %v1191_v49  ;;  %1623 = vst [vmem:[#allocation16 + $0x3a0] sm:$0xff] %v1495_v53  ;;  %v1238_v2 = vmul.f32 0.2, %v1110_v0  ;;  %2796 = vmatprep.subr.mxu1 %v214_v62  ;;  %v1062_v5 = vld [vmem:[#allocation2 + $0x218] sm:$0xff]  ;;  %2762 = vmatpush3.msra.mxu0 %v166_v4 }
  0xc0   :  { %v1366_v3 = vmul.f32 0.8, %v214_v62  ;;  %v1462_v6 = vadd.f32 %v1334_v61, %v1206_v60  ;;  %v1190_v7 = vmul.f32 0.2, %v1062_v5  ;;  %v1318_v8 = vmul.f32 0.8, %v166_v4  ;;  %2763 = vmatprep.subr.mxu0 %v181_v14 }
  0xc1   :  { %v1479_v1 = vadd.f32 %v1351_v56, %v1223_v55  ;;  %1575 = vst [vmem:[#allocation16 + $0x220] sm:$0xff] %v1447_v59  ;;  %v198_v9 = vld [vmem:[%s4906_s2 + $0x318] sm:$0xff]  ;;  %v1077_v15 = vld [vmem:[#allocation2 + $0x290] sm:$0xff]  ;;  %v1333_v18 = vmul.f32 0.8, %v181_v14  ;;  %v180_v34 = vld [vmem:[%s4906_s2 + $0x288] sm:$0xff] }
  0xc2   :  { %v1094_v10 = vld [vmem:[#allocation2 + $0x318] sm:$0xff]  ;;  %v1494_v11 = vadd.f32 %v1366_v3, %v1238_v2  ;;  %v1350_v13 = vmul.f32 0.8, %v198_v9  ;;  %2797 = vmatpush3.msra.mxu1 %v198_v9  ;;  %1590 = vst [vmem:[#allocation16 + $0x298] sm:$0xff] %v1462_v6  ;;  %v1446_v16 = vadd.f32 %v1318_v8, %v1190_v7  ;;  %v1205_v17 = vmul.f32 0.2, %v1077_v15 }
  0xc3   :  { %1607 = vst [vmem:[#allocation16 + $0x320] sm:$0xff] %v1479_v1  ;;  %v1222_v12 = vmul.f32 0.2, %v1094_v10  ;;  %v213_v19 = vld [vmem:[%s4906_s2 + $0x390] sm:$0xff]  ;;  %v1076_v35 = vld [vmem:[#allocation2 + $0x288] sm:$0xff]  ;;  %v179_v55 = vld [vmem:[%s4906_s2 + $0x280] sm:$0xff] }
  0xc4   :  { %v1109_v20 = vld [vmem:[#allocation2 + $0x390] sm:$0xff]  ;;  %1622 = vst [vmem:[#allocation16 + $0x398] sm:$0xff] %v1494_v11  ;;  %v1365_v23 = vmul.f32 0.8, %v213_v19  ;;  %2798 = vmatprep.subr.mxu1 %v213_v19  ;;  %1574 = vst [vmem:[#allocation16 + $0x218] sm:$0xff] %v1446_v16  ;;  %v1461_v26 = vadd.f32 %v1333_v18, %v1205_v17  ;;  %v212_v39 = vld [vmem:[%s4906_s2 + $0x388] sm:$0xff] }
  0xc5   :  { %v1478_v21 = vadd.f32 %v1350_v13, %v1222_v12  ;;  %v1237_v22 = vmul.f32 0.2, %v1109_v20  ;;  %v165_v24 = vld [vmem:[%s4906_s2 + $0x210] sm:$0xff]  ;;  %v1204_v37 = vmul.f32 0.2, %v1076_v35  ;;  %v1108_v40 = vld [vmem:[#allocation2 + $0x388] sm:$0xff] }
  0xc6   :  { %v1061_v25 = vld [vmem:[#allocation2 + $0x210] sm:$0xff]  ;;  %v1317_v28 = vmul.f32 0.8, %v165_v24  ;;  %2764 = vmatpush3.msra.mxu0 %v165_v24  ;;  %1589 = vst [vmem:[#allocation16 + $0x290] sm:$0xff] %v1461_v26  ;;  %v1332_v38 = vmul.f32 0.8, %v180_v34 }
  0xc7   :  { %v1189_v27 = vmul.f32 0.2, %v1061_v25  ;;  %v197_v29 = vld [vmem:[%s4906_s2 + $0x310] sm:$0xff]  ;;  %1606 = vst [vmem:[#allocation16 + $0x318] sm:$0xff] %v1478_v21  ;;  %v1493_v31 = vadd.f32 %v1365_v23, %v1237_v22  ;;  %2765 = vmatprep.subr.mxu0 %v180_v34  ;;  %v1236_v42 = vmul.f32 0.2, %v1108_v40 }
  0xc8   :  { %v1093_v30 = vld [vmem:[#allocation2 + $0x310] sm:$0xff]  ;;  %v1349_v33 = vmul.f32 0.8, %v197_v29  ;;  %2799 = vmatpush3.msra.mxu1 %v197_v29  ;;  %v1364_v43 = vmul.f32 0.8, %v212_v39  ;;  %v164_v44 = vld [vmem:[%s4906_s2 + $0x208] sm:$0xff]  ;;  %v1460_v46 = vadd.f32 %v1332_v38, %v1204_v37 }
  0xc9   :  { %v1221_v32 = vmul.f32 0.2, %v1093_v30  ;;  %v1445_v36 = vadd.f32 %v1317_v28, %v1189_v27  ;;  %1621 = vst [vmem:[#allocation16 + $0x390] sm:$0xff] %v1493_v31  ;;  %2800 = vmatprep.subr.mxu1 %v212_v39  ;;  %v1060_v45 = vld [vmem:[#allocation2 + $0x208] sm:$0xff]  ;;  %v1316_v48 = vmul.f32 0.8, %v164_v44  ;;  %2766 = vmatpush3.msra.mxu0 %v164_v44 }
  0xca   :  { %v1188_v47 = vmul.f32 0.2, %v1060_v45  ;;  %v196_v49 = vld [vmem:[%s4906_s2 + $0x308] sm:$0xff]  ;;  %v1492_v51 = vadd.f32 %v1364_v43, %v1236_v42  ;;  %v1075_v56 = vld [vmem:[#allocation2 + $0x280] sm:$0xff]  ;;  %1588 = vst [vmem:[#allocation16 + $0x288] sm:$0xff] %v1460_v46  ;;  %2767 = vmatprep.subr.mxu0 %v179_v55  ;;  %v3944_v13 = vld [vmem:[%s4942_s7 + $0x38] sm:$0xff] }
  0xcb   :  { %v1477_v41 = vadd.f32 %v1349_v33, %v1221_v32  ;;  %1573 = vst [vmem:[#allocation16 + $0x210] sm:$0xff] %v1445_v36  ;;  %v1092_v50 = vld [vmem:[#allocation2 + $0x308] sm:$0xff]  ;;  %v1348_v53 = vmul.f32 0.8, %v196_v49  ;;  %2801 = vmatpush3.msra.mxu1 %v196_v49  ;;  %v1203_v58 = vmul.f32 0.2, %v1075_v56  ;;  %1965 = vmatprep.mubr.f32.mxu1 %v3944_v13 }
  0xcc   :  { %v1220_v52 = vmul.f32 0.2, %v1092_v50  ;;  %v1444_v57 = vadd.f32 %v1316_v48, %v1188_v47  ;;  %v1331_v59 = vmul.f32 0.8, %v179_v55  ;;  %v211_v60 = vld [vmem:[%s4906_s2 + $0x380] sm:$0xff]  ;;  %1620 = vst [vmem:[#allocation16 + $0x388] sm:$0xff] %v1492_v51 }
  0xcd   :  { %1605 = vst [vmem:[#allocation16 + $0x310] sm:$0xff] %v1477_v41  ;;  %v1107_v61 = vld [vmem:[#allocation2 + $0x380] sm:$0xff]  ;;  %v1363_v1 = vmul.f32 0.8, %v211_v60  ;;  %2802 = vmatprep.subr.mxu1 %v211_v60  ;;  %v3932_v7 = vld [vmem:[%s4942_s7 + $0x28] sm:$0xff]  ;;  %v258_v16 = vld [vmem:[%s4908_s4 + $0xf8] sm:$0xff] }
  0xce   :  { %v1476_v62 = vadd.f32 %v1348_v53, %v1220_v52  ;;  %v1235_v0 = vmul.f32 0.2, %v1107_v61  ;;  %v163_v2 = vld [vmem:[%s4906_s2 + $0x200] sm:$0xff]  ;;  %1572 = vst [vmem:[#allocation16 + $0x208] sm:$0xff] %v1444_v57  ;;  %v1459_v4 = vadd.f32 %v1331_v59, %v1203_v58  ;;  %1895 = vmatprep.mubr.f32.mxu0 %v3932_v7  ;;  %v290_v17 = vld [vmem:[%s4908_s4 + $0x1f8] sm:$0xff]  ;;  %v1680_v18 = vld [vmem:[%s4942_s7 + $0x30] sm:$0xff] }
  0xcf   :  { %v1059_v3 = vld [vmem:[#allocation2 + $0x200] sm:$0xff]  ;;  %v1315_v6 = vmul.f32 0.8, %v163_v2  ;;  %2768 = vmatpush3.msra.mxu0 %v163_v2  ;;  %v242_v19 = vld [vmem:[%s4908_s4 + $0x78] sm:$0xff]  ;;  %v257_v28 = vld [vmem:[%s4908_s4 + $0xf0] sm:$0xff]  ;;  %s2565_s21 = sshll.u32 %s3414_s9, 4  ;;  %s2566_s21 = int_to_ptr.vmem [resolvable:$true] %s2565_s21 }
  0xd0   :  { %v1187_v5 = vmul.f32 0.2, %v1059_v3  ;;  %v195_v8 = vld [vmem:[%s4906_s2 + $0x300] sm:$0xff]  ;;  %1604 = vst [vmem:[#allocation16 + $0x308] sm:$0xff] %v1476_v62  ;;  %v1491_v9 = vadd.f32 %v1363_v1, %v1235_v0  ;;  %1587 = vst [vmem:[#allocation16 + $0x280] sm:$0xff] %v1459_v4  ;;  %2807 = vmatprep.subr.mxu0 %v258_v16  ;;  %v274_v24 = vld [vmem:[%s4908_s4 + $0x178] sm:$0xff]  ;;  %p3237_p7 = scmp.lt.s32.totalorder %s2566_s21, %s2566_s21 }
  0xd1   :  { %v1091_v10 = vld [vmem:[#allocation2 + $0x300] sm:$0xff]  ;;  %v1347_v11 = vmul.f32 0.8, %v195_v8  ;;  %2803 = vmatpush3.msra.mxu1 %v195_v8  ;;  %v626_v23 = vmul.f32 0.8, %v242_v19  ;;  %v289_v29 = vld [vmem:[%s4908_s4 + $0x1f0] sm:$0xff] }
  0xd2   :  { %v1678_v12 = vld [vmem:[%s4942_s7 + $0x20] sm:$0xff]  ;;  %v1443_v14 = vadd.f32 %v1315_v6, %v1187_v5  ;;  %v1219_v15 = vmul.f32 0.2, %v1091_v10  ;;  %1619 = vst [vmem:[#allocation16 + $0x380] sm:$0xff] %v1491_v9  ;;  %2842 = vmatprep.subr.mxu1 %v290_v17  ;;  %1966 = vmatmul.mubr.f32.vlgmr.msra.gmra.mxu1 %v1680_v18  ;;  %v658_v27 = vmul.f32 0.8, %v274_v24 }
  0xd3   :  { %1896 = vmatmul.mubr.f32.vlgmr.msra.gmra.mxu0 %v1678_v12  ;;  %v370_v20 = vld [vmem:[#allocation7 + $0x78] sm:$0xff]  ;;  %2843 = vmatpush3.msra.mxu1 %v274_v24  ;;  %v3969_v30 = vmul.f32 0.8, %v258_v16  ;;  %v241_v32 = vld [vmem:[%s4908_s4 + $0x70] sm:$0xff]  ;;  %v256_v40 = vld [vmem:[%s4908_s4 + $0xe8] sm:$0xff]  ;;  %s3232_s22 = scalar_lea.vmem %s2566_s21, 128 }
  0xd4   :  { %1571 = vst [vmem:[#allocation16 + $0x200] sm:$0xff] %v1443_v14  ;;  %v1475_v21 = vadd.f32 %v1347_v11, %v1219_v15  ;;  %v498_v22 = vmul.f32 0.2, %v370_v20  ;;  %2808 = vmatpush3.msra.mxu0 %v242_v19  ;;  %v402_v25 = vld [vmem:[#allocation7 + $0x178] sm:$0xff]  ;;  %2038 = vmatprep.mubr.f32.mxu0 %v3722_v54  ;;  %v369_v33 = vld [vmem:[#allocation7 + $0x70] sm:$0xff]  ;;  %v288_v41 = vld [vmem:[%s4908_s4 + $0x1e8] sm:$0xff]  ;;  %p3233_p6 = scmp.ne.s32.totalorder %s2566_s21, %s3232_s22  ;;  %p3238_p8 = scmp.lt.s32.totalorder %s3232_s22, %s3232_s22 }
  0xd5   :  { %v530_v26 = vmul.f32 0.2, %v402_v25  ;;  %2809 = vmatprep.subr.mxu0 %v257_v28  ;;  %2844 = vmatprep.subr.mxu1 %v289_v29  ;;  %v497_v35 = vmul.f32 0.2, %v369_v33  ;;  %v625_v36 = vmul.f32 0.8, %v241_v32 }
  0xd6   :  { %1603 = vst [vmem:[#allocation16 + $0x300] sm:$0xff] %v1475_v21  ;;  %v754_v31 = vadd.f32 %v626_v23, %v498_v22  ;;  %2810 = vmatpush3.msra.mxu0 %v241_v32  ;;  %v273_v37 = vld [vmem:[%s4908_s4 + $0x170] sm:$0xff]  ;;  %2108 = vmatprep.mubr.f32.mxu1 %v3731_v63  ;;  %v3984_v42 = vmul.f32 0.8, %v290_v17  ;;  %v3986_v43 = vmul.f32 0.8, %v257_v28  ;;  %p3239_p9 = por %p3238_p8, %p3237_p7 }
  0xd7   :  { %v786_v34 = vadd.f32 %v658_v27, %v530_v26  ;;  %v401_v54 = vld [vmem:[#allocation7 + $0x170] sm:$0xff]  ;;  %v657_v39 = vmul.f32 0.8, %v273_v37  ;;  %2845 = vmatpush3.msra.mxu1 %v273_v37  ;;  %v753_v44 = vadd.f32 %v625_v36, %v497_v35  ;;  %2811 = vmatprep.subr.mxu0 %v256_v40  ;;  %v240_v63 = vld [vmem:[%s4908_s4 + $0x68] sm:$0xff]  ;;  %v255_v53 = vld [vmem:[%s4908_s4 + $0xe0] sm:$0xff] }
  0xd8   :  { %882 = vst [vmem:[#allocation19 + $0x78] sm:$0xff] %v754_v31  ;;  %v529_v38 = vmul.f32 0.2, %v401_v54  ;;  %2846 = vmatprep.subr.mxu1 %v288_v41  ;;  %v368_v45 = vld [vmem:[#allocation7 + $0x68] sm:$0xff]  ;;  %v624_v48 = vmul.f32 0.8, %v240_v63  ;;  %2812 = vmatpush3.msra.mxu0 %v240_v63  ;;  %p3240_p10 = pnand %p3239_p9, %p3233_p6 }
  0xd9   :  { %914 = vst [vmem:[#allocation19 + $0x178] sm:$0xff] %v786_v34  ;;  %v496_v47 = vmul.f32 0.2, %v368_v45  ;;  %v272_v49 = vld [vmem:[%s4908_s4 + $0x168] sm:$0xff]  ;;  %881 = vst [vmem:[#allocation19 + $0x70] sm:$0xff] %v753_v44  ;;  %v287_v55 = vld [vmem:[%s4908_s4 + $0x1e0] sm:$0xff]  ;;  %2813 = vmatprep.subr.mxu0 %v255_v53 }
  0xda   :  { %v785_v46 = vadd.f32 %v657_v39, %v529_v38  ;;  %v400_v50 = vld [vmem:[#allocation7 + $0x168] sm:$0xff]  ;;  %v656_v52 = vmul.f32 0.8, %v272_v49  ;;  %2847 = vmatpush3.msra.mxu1 %v272_v49  ;;  %v4000_v56 = vmul.f32 0.8, %v289_v29  ;;  %v239_v59 = vld [vmem:[%s4908_s4 + $0x60] sm:$0xff] }
  0xdb   :  { %v528_v51 = vmul.f32 0.2, %v400_v50  ;;  %v4002_v57 = vmul.f32 0.8, %v256_v40  ;;  %v752_v58 = vadd.f32 %v624_v48, %v496_v47  ;;  %2848 = vmatprep.subr.mxu1 %v287_v55  ;;  %v367_v60 = vld [vmem:[#allocation7 + $0x60] sm:$0xff]  ;;  %2814 = vmatpush3.msra.mxu0 %v239_v59  ;;  %v254_v5 = vld [vmem:[%s4908_s4 + $0xd8] sm:$0xff] }
  0xdc   :  { %913 = vst [vmem:[#allocation19 + $0x170] sm:$0xff] %v785_v46  ;;  %v495_v62 = vmul.f32 0.2, %v367_v60  ;;  %v623_v0 = vmul.f32 0.8, %v239_v59  ;;  %v271_v1 = vld [vmem:[%s4908_s4 + $0x160] sm:$0xff]  ;;  %2815 = vmatprep.subr.mxu0 %v254_v5 }
  0xdd   :  { %v784_v61 = vadd.f32 %v656_v52, %v528_v51  ;;  %v399_v2 = vld [vmem:[#allocation7 + $0x160] sm:$0xff]  ;;  %880 = vst [vmem:[#allocation19 + $0x68] sm:$0xff] %v752_v58  ;;  %v655_v4 = vmul.f32 0.8, %v271_v1  ;;  %2849 = vmatpush3.msra.mxu1 %v271_v1  ;;  %v286_v6 = vld [vmem:[%s4908_s4 + $0x1d8] sm:$0xff]  ;;  %v253_v21 = vld [vmem:[%s4908_s4 + $0xd0] sm:$0xff] }
  0xde   :  { %v527_v3 = vmul.f32 0.2, %v399_v2  ;;  %v4016_v8 = vmul.f32 0.8, %v288_v41  ;;  %v4018_v9 = vmul.f32 0.8, %v255_v53  ;;  %v751_v10 = vadd.f32 %v623_v0, %v495_v62  ;;  %2850 = vmatprep.subr.mxu1 %v286_v6 }
  0xdf   :  { %912 = vst [vmem:[#allocation19 + $0x168] sm:$0xff] %v784_v61  ;;  %v238_v11 = vld [vmem:[%s4908_s4 + $0x58] sm:$0xff]  ;;  %v285_v22 = vld [vmem:[%s4908_s4 + $0x1d0] sm:$0xff]  ;;  %v4032_v23 = vmul.f32 0.8, %v287_v55  ;;  %v252_v36 = vld [vmem:[%s4908_s4 + $0xc8] sm:$0xff] }
  0xe0   :  { %v366_v12 = vld [vmem:[#allocation7 + $0x58] sm:$0xff]  ;;  %v783_v14 = vadd.f32 %v655_v4, %v527_v3  ;;  %v622_v16 = vmul.f32 0.8, %v238_v11  ;;  %2816 = vmatpush3.msra.mxu0 %v238_v11  ;;  %879 = vst [vmem:[#allocation19 + $0x60] sm:$0xff] %v751_v10  ;;  %v4034_v24 = vmul.f32 0.8, %v254_v5 }
  0xe1   :  { %v494_v15 = vmul.f32 0.2, %v366_v12  ;;  %v270_v17 = vld [vmem:[%s4908_s4 + $0x158] sm:$0xff]  ;;  %2817 = vmatprep.subr.mxu0 %v253_v21  ;;  %v237_v26 = vld [vmem:[%s4908_s4 + $0x50] sm:$0xff]  ;;  %v284_v37 = vld [vmem:[%s4908_s4 + $0x1c8] sm:$0xff] }
  0xe2   :  { %v398_v18 = vld [vmem:[#allocation7 + $0x158] sm:$0xff]  ;;  %v654_v20 = vmul.f32 0.8, %v270_v17  ;;  %2851 = vmatpush3.msra.mxu1 %v270_v17  ;;  %911 = vst [vmem:[#allocation19 + $0x160] sm:$0xff] %v783_v14  ;;  %v365_v27 = vld [vmem:[#allocation7 + $0x50] sm:$0xff]  ;;  %2818 = vmatpush3.msra.mxu0 %v237_v26  ;;  %v236_v40 = vld [vmem:[%s4908_s4 + $0x48] sm:$0xff] }
  0xe3   :  { %v526_v19 = vmul.f32 0.2, %v398_v18  ;;  %v750_v25 = vadd.f32 %v622_v16, %v494_v15  ;;  %2852 = vmatprep.subr.mxu1 %v285_v22  ;;  %v493_v29 = vmul.f32 0.2, %v365_v27  ;;  %v621_v31 = vmul.f32 0.8, %v237_v26  ;;  %2819 = vmatprep.subr.mxu0 %v252_v36 }
  0xe4   :  { %v269_v32 = vld [vmem:[%s4908_s4 + $0x150] sm:$0xff]  ;;  %v4048_v54 = vmul.f32 0.8, %v286_v6  ;;  %v4050_v38 = vmul.f32 0.8, %v253_v21  ;;  %2820 = vmatpush3.msra.mxu0 %v236_v40  ;;  %v268_v46 = vld [vmem:[%s4908_s4 + $0x148] sm:$0xff] }
  0xe5   :  { %v782_v28 = vadd.f32 %v654_v20, %v526_v19  ;;  %v397_v33 = vld [vmem:[#allocation7 + $0x150] sm:$0xff]  ;;  %878 = vst [vmem:[#allocation19 + $0x58] sm:$0xff] %v750_v25  ;;  %v653_v35 = vmul.f32 0.8, %v269_v32  ;;  %2853 = vmatpush3.msra.mxu1 %v269_v32  ;;  %v749_v39 = vadd.f32 %v621_v31, %v493_v29  ;;  %v364_v41 = vld [vmem:[#allocation7 + $0x48] sm:$0xff]  ;;  %v251_v50 = vld [vmem:[%s4908_s4 + $0xc0] sm:$0xff] }
  0xe6   :  { %v525_v34 = vmul.f32 0.2, %v397_v33  ;;  %2854 = vmatprep.subr.mxu1 %v284_v37  ;;  %v492_v63 = vmul.f32 0.2, %v364_v41  ;;  %v620_v45 = vmul.f32 0.8, %v236_v40  ;;  %2821 = vmatprep.subr.mxu0 %v251_v50 }
  0xe7   :  { %910 = vst [vmem:[#allocation19 + $0x158] sm:$0xff] %v782_v28  ;;  %v396_v47 = vld [vmem:[#allocation7 + $0x148] sm:$0xff]  ;;  %877 = vst [vmem:[#allocation19 + $0x50] sm:$0xff] %v749_v39  ;;  %v652_v49 = vmul.f32 0.8, %v268_v46  ;;  %2855 = vmatpush3.msra.mxu1 %v268_v46  ;;  %v283_v51 = vld [vmem:[%s4908_s4 + $0x1c0] sm:$0xff] }
  0xe8   :  { %v781_v44 = vadd.f32 %v653_v35, %v525_v34  ;;  %v524_v48 = vmul.f32 0.2, %v396_v47  ;;  %v4064_v52 = vmul.f32 0.8, %v285_v22  ;;  %v4066_v53 = vmul.f32 0.8, %v252_v36  ;;  %2856 = vmatprep.subr.mxu1 %v283_v51 }
  0xe9   :  { %v748_v55 = vadd.f32 %v620_v45, %v492_v63  ;;  %v235_v58 = vld [vmem:[%s4908_s4 + $0x40] sm:$0xff]  ;;  %v250_v4 = vld [vmem:[%s4908_s4 + $0xb8] sm:$0xff]  ;;  %v4080_v6 = vmul.f32 0.8, %v284_v37  ;;  %v4082_v10 = vmul.f32 0.8, %v251_v50 }
  0xea   :  { %909 = vst [vmem:[#allocation19 + $0x150] sm:$0xff] %v781_v44  ;;  %v363_v59 = vld [vmem:[#allocation7 + $0x40] sm:$0xff]  ;;  %v780_v60 = vadd.f32 %v652_v49, %v524_v48  ;;  %v619_v62 = vmul.f32 0.8, %v235_v58  ;;  %2822 = vmatpush3.msra.mxu0 %v235_v58  ;;  %v282_v5 = vld [vmem:[%s4908_s4 + $0x1b8] sm:$0xff]  ;;  %v249_v22 = vld [vmem:[%s4908_s4 + $0xb0] sm:$0xff] }
  0xeb   :  { %v491_v61 = vmul.f32 0.2, %v363_v59  ;;  %v267_v0 = vld [vmem:[%s4908_s4 + $0x140] sm:$0xff]  ;;  %876 = vst [vmem:[#allocation19 + $0x48] sm:$0xff] %v748_v55  ;;  %2823 = vmatprep.subr.mxu0 %v250_v4  ;;  %v234_v12 = vld [vmem:[%s4908_s4 + $0x38] sm:$0xff]  ;;  %v281_v25 = vld [vmem:[%s4908_s4 + $0x1b0] sm:$0xff] }
  0xec   :  { %v395_v1 = vld [vmem:[#allocation7 + $0x140] sm:$0xff]  ;;  %v651_v3 = vmul.f32 0.8, %v267_v0  ;;  %2857 = vmatpush3.msra.mxu1 %v267_v0  ;;  %908 = vst [vmem:[#allocation19 + $0x148] sm:$0xff] %v780_v60  ;;  %v362_v14 = vld [vmem:[#allocation7 + $0x38] sm:$0xff]  ;;  %2824 = vmatpush3.msra.mxu0 %v234_v12  ;;  %v233_v29 = vld [vmem:[%s4908_s4 + $0x30] sm:$0xff] }
  0xed   :  { %v523_v2 = vmul.f32 0.2, %v395_v1  ;;  %v747_v11 = vadd.f32 %v619_v62, %v491_v61  ;;  %2858 = vmatprep.subr.mxu1 %v282_v5  ;;  %v490_v16 = vmul.f32 0.2, %v362_v14  ;;  %v618_v17 = vmul.f32 0.8, %v234_v12  ;;  %2825 = vmatprep.subr.mxu0 %v249_v22 }
  0xee   :  { %v266_v18 = vld [vmem:[%s4908_s4 + $0x138] sm:$0xff]  ;;  %v4096_v26 = vmul.f32 0.8, %v283_v51  ;;  %v4098_v27 = vmul.f32 0.8, %v250_v4  ;;  %2826 = vmatpush3.msra.mxu0 %v233_v29  ;;  %v265_v35 = vld [vmem:[%s4908_s4 + $0x130] sm:$0xff] }
  0xef   :  { %v779_v15 = vadd.f32 %v651_v3, %v523_v2  ;;  %v394_v19 = vld [vmem:[#allocation7 + $0x138] sm:$0xff]  ;;  %875 = vst [vmem:[#allocation19 + $0x40] sm:$0xff] %v747_v11  ;;  %v650_v21 = vmul.f32 0.8, %v266_v18  ;;  %2859 = vmatpush3.msra.mxu1 %v266_v18  ;;  %v746_v28 = vadd.f32 %v618_v17, %v490_v16  ;;  %v361_v31 = vld [vmem:[#allocation7 + $0x30] sm:$0xff]  ;;  %v248_v40 = vld [vmem:[%s4908_s4 + $0xa8] sm:$0xff] }
  0xf0   :  { %v522_v20 = vmul.f32 0.2, %v394_v19  ;;  %2860 = vmatprep.subr.mxu1 %v281_v25  ;;  %v489_v33 = vmul.f32 0.2, %v361_v31  ;;  %v617_v34 = vmul.f32 0.8, %v233_v29  ;;  %2827 = vmatprep.subr.mxu0 %v248_v40 }
  0xf1   :  { %907 = vst [vmem:[#allocation19 + $0x140] sm:$0xff] %v779_v15  ;;  %v393_v36 = vld [vmem:[#allocation7 + $0x130] sm:$0xff]  ;;  %874 = vst [vmem:[#allocation19 + $0x38] sm:$0xff] %v746_v28  ;;  %v649_v39 = vmul.f32 0.8, %v265_v35  ;;  %2861 = vmatpush3.msra.mxu1 %v265_v35  ;;  %v280_v41 = vld [vmem:[%s4908_s4 + $0x1a8] sm:$0xff] }
  0xf2   :  { %v778_v32 = vadd.f32 %v650_v21, %v522_v20  ;;  %v521_v37 = vmul.f32 0.2, %v393_v36  ;;  %v4112_v44 = vmul.f32 0.8, %v282_v5  ;;  %v4114_v63 = vmul.f32 0.8, %v249_v22  ;;  %2862 = vmatprep.subr.mxu1 %v280_v41 }
  0xf3   :  { %v745_v45 = vadd.f32 %v617_v34, %v489_v33  ;;  %v232_v46 = vld [vmem:[%s4908_s4 + $0x28] sm:$0xff]  ;;  %v247_v60 = vld [vmem:[%s4908_s4 + $0xa0] sm:$0xff]  ;;  %v4128_v62 = vmul.f32 0.8, %v281_v25  ;;  %v4130_v0 = vmul.f32 0.8, %v248_v40 }
  0xf4   :  { %906 = vst [vmem:[#allocation19 + $0x138] sm:$0xff] %v778_v32  ;;  %v360_v47 = vld [vmem:[#allocation7 + $0x28] sm:$0xff]  ;;  %v777_v48 = vadd.f32 %v649_v39, %v521_v37  ;;  %v616_v50 = vmul.f32 0.8, %v232_v46  ;;  %2828 = vmatpush3.msra.mxu0 %v232_v46  ;;  %v279_v61 = vld [vmem:[%s4908_s4 + $0x1a0] sm:$0xff]  ;;  %v246_v17 = vld [vmem:[%s4908_s4 + $0x98] sm:$0xff] }
  0xf5   :  { %v488_v49 = vmul.f32 0.2, %v360_v47  ;;  %v264_v51 = vld [vmem:[%s4908_s4 + $0x128] sm:$0xff]  ;;  %873 = vst [vmem:[#allocation19 + $0x30] sm:$0xff] %v745_v45  ;;  %2829 = vmatprep.subr.mxu0 %v247_v60  ;;  %v231_v2 = vld [vmem:[%s4908_s4 + $0x20] sm:$0xff]  ;;  %v278_v18 = vld [vmem:[%s4908_s4 + $0x198] sm:$0xff] }
  0xf6   :  { %v392_v55 = vld [vmem:[#allocation7 + $0x128] sm:$0xff]  ;;  %v648_v59 = vmul.f32 0.8, %v264_v51  ;;  %2863 = vmatpush3.msra.mxu1 %v264_v51  ;;  %905 = vst [vmem:[#allocation19 + $0x130] sm:$0xff] %v777_v48  ;;  %v359_v3 = vld [vmem:[#allocation7 + $0x20] sm:$0xff]  ;;  %2830 = vmatpush3.msra.mxu0 %v231_v2  ;;  %v230_v22 = vld [vmem:[%s4908_s4 + $0x18] sm:$0xff] }
  0xf7   :  { %v520_v58 = vmul.f32 0.2, %v392_v55  ;;  %v744_v1 = vadd.f32 %v616_v50, %v488_v49  ;;  %2864 = vmatprep.subr.mxu1 %v279_v61  ;;  %v487_v5 = vmul.f32 0.2, %v359_v3  ;;  %v615_v11 = vmul.f32 0.8, %v231_v2  ;;  %2831 = vmatprep.subr.mxu0 %v246_v17 }
  0xf8   :  { %v263_v12 = vld [vmem:[%s4908_s4 + $0x120] sm:$0xff]  ;;  %v4144_v19 = vmul.f32 0.8, %v280_v41  ;;  %v4146_v20 = vmul.f32 0.8, %v247_v60  ;;  %2832 = vmatpush3.msra.mxu0 %v230_v22  ;;  %v262_v32 = vld [vmem:[%s4908_s4 + $0x118] sm:$0xff] }
  0xf9   :  { %v776_v4 = vadd.f32 %v648_v59, %v520_v58  ;;  %v391_v14 = vld [vmem:[#allocation7 + $0x120] sm:$0xff]  ;;  %872 = vst [vmem:[#allocation19 + $0x28] sm:$0xff] %v744_v1  ;;  %v647_v16 = vmul.f32 0.8, %v263_v12  ;;  %2865 = vmatpush3.msra.mxu1 %v263_v12  ;;  %v743_v21 = vadd.f32 %v615_v11, %v487_v5  ;;  %v358_v25 = vld [vmem:[#allocation7 + $0x18] sm:$0xff]  ;;  %v245_v36 = vld [vmem:[%s4908_s4 + $0x90] sm:$0xff] }
  0xfa   :  { %v519_v15 = vmul.f32 0.2, %v391_v14  ;;  %2866 = vmatprep.subr.mxu1 %v278_v18  ;;  %v486_v29 = vmul.f32 0.2, %v358_v25  ;;  %v614_v31 = vmul.f32 0.8, %v230_v22  ;;  %2833 = vmatprep.subr.mxu0 %v245_v36 }
  0xfb   :  { %904 = vst [vmem:[#allocation19 + $0x128] sm:$0xff] %v776_v4  ;;  %v390_v33 = vld [vmem:[#allocation7 + $0x118] sm:$0xff]  ;;  %871 = vst [vmem:[#allocation19 + $0x20] sm:$0xff] %v743_v21  ;;  %v646_v35 = vmul.f32 0.8, %v262_v32  ;;  %2867 = vmatpush3.msra.mxu1 %v262_v32  ;;  %v277_v37 = vld [vmem:[%s4908_s4 + $0x190] sm:$0xff] }
  0xfc   :  { %v775_v28 = vadd.f32 %v647_v16, %v519_v15  ;;  %v518_v34 = vmul.f32 0.2, %v390_v33  ;;  %v4160_v39 = vmul.f32 0.8, %v279_v61  ;;  %v4162_v40 = vmul.f32 0.8, %v246_v17  ;;  %2868 = vmatprep.subr.mxu1 %v277_v37 }
  0xfd   :  { %v742_v41 = vadd.f32 %v614_v31, %v486_v29  ;;  %v229_v45 = vld [vmem:[%s4908_s4 + $0x10] sm:$0xff]  ;;  %v244_v59 = vld [vmem:[%s4908_s4 + $0x88] sm:$0xff]  ;;  %v4176_v61 = vmul.f32 0.8, %v278_v18  ;;  %v4178_v1 = vmul.f32 0.8, %v245_v36 }
  0xfe   :  { %903 = vst [vmem:[#allocation19 + $0x120] sm:$0xff] %v775_v28  ;;  %v357_v46 = vld [vmem:[#allocation7 + $0x10] sm:$0xff]  ;;  %v774_v47 = vadd.f32 %v646_v35, %v518_v34  ;;  %v613_v49 = vmul.f32 0.8, %v229_v45  ;;  %2834 = vmatpush3.msra.mxu0 %v229_v45  ;;  %v276_v60 = vld [vmem:[%s4908_s4 + $0x188] sm:$0xff]  ;;  %v243_v18 = vld [vmem:[%s4908_s4 + $0x80] sm:$0xff] }
  0xff   :  { %v485_v48 = vmul.f32 0.2, %v357_v46  ;;  %v261_v50 = vld [vmem:[%s4908_s4 + $0x110] sm:$0xff]  ;;  %870 = vst [vmem:[#allocation19 + $0x18] sm:$0xff] %v742_v41  ;;  %2835 = vmatprep.subr.mxu0 %v244_v59  ;;  %v228_v3 = vld [vmem:[%s4908_s4 + $0x8] sm:$0xff]  ;;  %v275_v21 = vld [vmem:[%s4908_s4 + $0x180] sm:$0xff] }
 0x100   :  { %v389_v51 = vld [vmem:[#allocation7 + $0x110] sm:$0xff]  ;;  %v645_v58 = vmul.f32 0.8, %v261_v50  ;;  %2869 = vmatpush3.msra.mxu1 %v261_v50  ;;  %902 = vst [vmem:[#allocation19 + $0x118] sm:$0xff] %v774_v47  ;;  %v356_v4 = vld [vmem:[#allocation7 + $0x8] sm:$0xff]  ;;  %2836 = vmatpush3.msra.mxu0 %v228_v3  ;;  %v227_v29 = vld [vmem:[%s4908_s4] sm:$0xff] }
 0x101   :  { %v517_v55 = vmul.f32 0.2, %v389_v51  ;;  %v741_v2 = vadd.f32 %v613_v49, %v485_v48  ;;  %2870 = vmatprep.subr.mxu1 %v276_v60  ;;  %v484_v11 = vmul.f32 0.2, %v356_v4  ;;  %v612_v12 = vmul.f32 0.8, %v228_v3  ;;  %2837 = vmatprep.subr.mxu0 %v243_v18 }
 0x102   :  { %v260_v14 = vld [vmem:[%s4908_s4 + $0x108] sm:$0xff]  ;;  %v4192_v22 = vmul.f32 0.8, %v277_v37  ;;  %v4194_v25 = vmul.f32 0.8, %v244_v59  ;;  %2838 = vmatpush3.msra.mxu0 %v227_v29  ;;  %v259_v35 = vld [vmem:[%s4908_s4 + $0x100] sm:$0xff] }
 0x103   :  { %v773_v5 = vadd.f32 %v645_v58, %v517_v55  ;;  %v388_v15 = vld [vmem:[#allocation7 + $0x108] sm:$0xff]  ;;  %869 = vst [vmem:[#allocation19 + $0x10] sm:$0xff] %v741_v2  ;;  %v644_v17 = vmul.f32 0.8, %v260_v14  ;;  %2871 = vmatpush3.msra.mxu1 %v260_v14  ;;  %v740_v28 = vadd.f32 %v612_v12, %v484_v11  ;;  %v355_v31 = vld [vmem:[#allocation7] sm:$0xff]  ;;  %v322_v46 = vld [vmem:[%s4908_s4 + $0x2f8] sm:$0xff] }
 0x104   :  { %v516_v16 = vmul.f32 0.2, %v388_v15  ;;  %2872 = vmatprep.subr.mxu1 %v275_v21  ;;  %v483_v33 = vmul.f32 0.2, %v355_v31  ;;  %v611_v34 = vmul.f32 0.8, %v227_v29  ;;  %2877 = vmatprep.subr.mxu0 %v322_v46 }
 0x105   :  { %901 = vst [vmem:[#allocation19 + $0x110] sm:$0xff] %v773_v5  ;;  %v387_v36 = vld [vmem:[#allocation7 + $0x100] sm:$0xff]  ;;  %868 = vst [vmem:[#allocation19 + $0x8] sm:$0xff] %v740_v28  ;;  %v643_v41 = vmul.f32 0.8, %v259_v35  ;;  %2873 = vmatpush3.msra.mxu1 %v259_v35  ;;  %v354_v47 = vld [vmem:[%s4908_s4 + $0x3f8] sm:$0xff] }
 0x106   :  { %v772_v32 = vadd.f32 %v644_v17, %v516_v16  ;;  %v515_v37 = vmul.f32 0.2, %v387_v36  ;;  %v3101_v45 = vld [vmem:[%s4942_s7] sm:$0xff]  ;;  %v4211_v48 = vmul.f32 0.8, %v276_v60  ;;  %v739_v50 = vadd.f32 %v611_v34, %v483_v33  ;;  %v3102_v51 = vld [vmem:[%s4942_s7 + $0x10] sm:$0xff]  ;;  %2912 = vmatprep.subr.mxu1 %v354_v47 }
 0x107   :  { %2039 = vmatmul.mubr.f32.vlgmr.msra.gmra.mxu0 %v3101_v45  ;;  %v4213_v49 = vmul.f32 0.8, %v243_v18  ;;  %2109 = vmatmul.mubr.f32.vlgmr.msra.gmra.mxu1 %v3102_v51  ;;  %v306_v55 = vld [vmem:[%s4908_s4 + $0x278] sm:$0xff]  ;;  %v321_v12 = vld [vmem:[%s4908_s4 + $0x2f0] sm:$0xff]  ;;  %v4231_v15 = vmul.f32 0.8, %v275_v21 }
 0x108   :  { %900 = vst [vmem:[#allocation19 + $0x108] sm:$0xff] %v772_v32  ;;  %v434_v58 = vld [vmem:[#allocation7 + $0x278] sm:$0xff]  ;;  %v771_v59 = vadd.f32 %v643_v41, %v515_v37  ;;  %v690_v60 = vmul.f32 0.8, %v306_v55  ;;  %2878 = vmatpush3.msra.mxu0 %v306_v55  ;;  %867 = vst [vmem:[#allocation19] sm:$0xff] %v739_v50  ;;  %v353_v14 = vld [vmem:[%s4908_s4 + $0x3f0] sm:$0xff]  ;;  %2178 = vmatprep.mubr.f32.mxu0 %v3932_v7 }
 0x109   :  { %v562_v2 = vmul.f32 0.2, %v434_v58  ;;  %v338_v3 = vld [vmem:[%s4908_s4 + $0x378] sm:$0xff]  ;;  %v4233_v16 = vmul.f32 0.8, %v322_v46  ;;  %2879 = vmatprep.subr.mxu0 %v321_v12  ;;  %v305_v18 = vld [vmem:[%s4908_s4 + $0x270] sm:$0xff]  ;;  %2248 = vmatprep.mubr.f32.mxu1 %v3944_v13 }
 0x10a   :  { %v466_v4 = vld [vmem:[#allocation7 + $0x378] sm:$0xff]  ;;  %v722_v11 = vmul.f32 0.8, %v338_v3  ;;  %2913 = vmatpush3.msra.mxu1 %v338_v3  ;;  %899 = vst [vmem:[#allocation19 + $0x100] sm:$0xff] %v771_v59  ;;  %v433_v28 = vld [vmem:[#allocation7 + $0x270] sm:$0xff]  ;;  %2880 = vmatpush3.msra.mxu0 %v305_v18  ;;  %v320_v35 = vld [vmem:[%s4908_s4 + $0x2e8] sm:$0xff] }
 0x10b   :  { %v594_v5 = vmul.f32 0.2, %v466_v4  ;;  %v818_v17 = vadd.f32 %v690_v60, %v562_v2  ;;  %2914 = vmatprep.subr.mxu1 %v353_v14  ;;  %v561_v31 = vmul.f32 0.2, %v433_v28  ;;  %v689_v32 = vmul.f32 0.8, %v305_v18  ;;  %2881 = vmatprep.subr.mxu0 %v320_v35 }
 0x10c   :  { %v337_v7 = vld [vmem:[%s4908_s4 + $0x370] sm:$0xff]  ;;  %v352_v36 = vld [vmem:[%s4908_s4 + $0x3e8] sm:$0xff]  ;;  %v4248_v37 = vmul.f32 0.8, %v354_v47  ;;  %v4250_v41 = vmul.f32 0.8, %v321_v12 }
 0x10d   :  { %v850_v29 = vadd.f32 %v722_v11, %v594_v5  ;;  %v465_v21 = vld [vmem:[#allocation7 + $0x370] sm:$0xff]  ;;  %946 = vst [vmem:[#allocation19 + $0x278] sm:$0xff] %v818_v17  ;;  %v721_v34 = vmul.f32 0.8, %v337_v7  ;;  %2915 = vmatpush3.msra.mxu1 %v337_v7  ;;  %v817_v45 = vadd.f32 %v689_v32, %v561_v31  ;;  %v304_v13 = vld [vmem:[%s4908_s4 + $0x268] sm:$0xff]  ;;  %v319_v60 = vld [vmem:[%s4908_s4 + $0x2e0] sm:$0xff] }
 0x10e   :  { %v593_v33 = vmul.f32 0.2, %v465_v21  ;;  %2916 = vmatprep.subr.mxu1 %v352_v36  ;;  %v432_v46 = vld [vmem:[#allocation7 + $0x268] sm:$0xff]  ;;  %v688_v55 = vmul.f32 0.8, %v304_v13  ;;  %2882 = vmatpush3.msra.mxu0 %v304_v13  ;;  %v351_v3 = vld [vmem:[%s4908_s4 + $0x3e0] sm:$0xff] }
 0x10f   :  { %978 = vst [vmem:[#allocation19 + $0x378] sm:$0xff] %v850_v29  ;;  %v560_v51 = vmul.f32 0.2, %v432_v46  ;;  %v336_v47 = vld [vmem:[%s4908_s4 + $0x368] sm:$0xff]  ;;  %945 = vst [vmem:[#allocation19 + $0x270] sm:$0xff] %v817_v45  ;;  %2883 = vmatprep.subr.mxu0 %v319_v60  ;;  %v303_v12 = vld [vmem:[%s4908_s4 + $0x260] sm:$0xff] }
 0x110   :  { %v849_v50 = vadd.f32 %v721_v34, %v593_v33  ;;  %v464_v58 = vld [vmem:[#allocation7 + $0x368] sm:$0xff]  ;;  %v720_v2 = vmul.f32 0.8, %v336_v47  ;;  %2917 = vmatpush3.msra.mxu1 %v336_v47  ;;  %v4264_v4 = vmul.f32 0.8, %v353_v14  ;;  %v431_v17 = vld [vmem:[#allocation7 + $0x260] sm:$0xff]  ;;  %2884 = vmatpush3.msra.mxu0 %v303_v12 }
 0x111   :  { %v592_v59 = vmul.f32 0.2, %v464_v58  ;;  %v4266_v5 = vmul.f32 0.8, %v320_v35  ;;  %v816_v11 = vadd.f32 %v688_v55, %v560_v51  ;;  %2918 = vmatprep.subr.mxu1 %v351_v3  ;;  %v559_v28 = vmul.f32 0.2, %v431_v17 }
 0x112   :  { %977 = vst [vmem:[#allocation19 + $0x370] sm:$0xff] %v849_v50  ;;  %v687_v29 = vmul.f32 0.8, %v303_v12  ;;  %v335_v14 = vld [vmem:[%s4908_s4 + $0x360] sm:$0xff]  ;;  %v318_v21 = vld [vmem:[%s4908_s4 + $0x2d8] sm:$0xff] }
 0x113   :  { %v848_v18 = vadd.f32 %v720_v2, %v592_v59  ;;  %v463_v31 = vld [vmem:[#allocation7 + $0x360] sm:$0xff]  ;;  %944 = vst [vmem:[#allocation19 + $0x268] sm:$0xff] %v816_v11  ;;  %v719_v7 = vmul.f32 0.8, %v335_v14  ;;  %2919 = vmatpush3.msra.mxu1 %v335_v14  ;;  %v350_v33 = vld [vmem:[%s4908_s4 + $0x3d8] sm:$0xff]  ;;  %2885 = vmatprep.subr.mxu0 %v318_v21  ;;  %v317_v2 = vld [vmem:[%s4908_s4 + $0x2d0] sm:$0xff] }
 0x114   :  { %v591_v32 = vmul.f32 0.2, %v463_v31  ;;  %v4280_v34 = vmul.f32 0.8, %v352_v36  ;;  %v4282_v35 = vmul.f32 0.8, %v319_v60  ;;  %v815_v45 = vadd.f32 %v687_v29, %v559_v28  ;;  %2920 = vmatprep.subr.mxu1 %v350_v33 }
 0x115   :  { %976 = vst [vmem:[#allocation19 + $0x368] sm:$0xff] %v848_v18  ;;  %v302_v13 = vld [vmem:[%s4908_s4 + $0x258] sm:$0xff]  ;;  %v349_v60 = vld [vmem:[%s4908_s4 + $0x3d0] sm:$0xff]  ;;  %v4296_v11 = vmul.f32 0.8, %v351_v3 }
 0x116   :  { %v430_v46 = vld [vmem:[#allocation7 + $0x258] sm:$0xff]  ;;  %v847_v50 = vadd.f32 %v719_v7, %v591_v32  ;;  %v686_v55 = vmul.f32 0.8, %v302_v13  ;;  %2886 = vmatpush3.msra.mxu0 %v302_v13  ;;  %943 = vst [vmem:[#allocation19 + $0x260] sm:$0xff] %v815_v45  ;;  %v4298_v12 = vmul.f32 0.8, %v318_v21 }
 0x117   :  { %v558_v51 = vmul.f32 0.2, %v430_v46  ;;  %v334_v36 = vld [vmem:[%s4908_s4 + $0x358] sm:$0xff]  ;;  %2887 = vmatprep.subr.mxu0 %v317_v2  ;;  %v301_v18 = vld [vmem:[%s4908_s4 + $0x250] sm:$0xff]  ;;  %v316_v45 = vld [vmem:[%s4908_s4 + $0x2c8] sm:$0xff] }
 0x118   :  { %v462_v47 = vld [vmem:[#allocation7 + $0x358] sm:$0xff]  ;;  %v718_v59 = vmul.f32 0.8, %v334_v36  ;;  %2921 = vmatpush3.msra.mxu1 %v334_v36  ;;  %975 = vst [vmem:[#allocation19 + $0x360] sm:$0xff] %v847_v50  ;;  %v429_v28 = vld [vmem:[#allocation7 + $0x250] sm:$0xff]  ;;  %2888 = vmatpush3.msra.mxu0 %v301_v18  ;;  %v348_v13 = vld [vmem:[%s4908_s4 + $0x3c8] sm:$0xff] }
 0x119   :  { %v590_v58 = vmul.f32 0.2, %v462_v47  ;;  %v814_v17 = vadd.f32 %v686_v55, %v558_v51  ;;  %2922 = vmatprep.subr.mxu1 %v349_v60  ;;  %v557_v14 = vmul.f32 0.2, %v429_v28  ;;  %v685_v31 = vmul.f32 0.8, %v301_v18  ;;  %2889 = vmatprep.subr.mxu0 %v316_v45 }
 0x11a   :  { %v333_v3 = vld [vmem:[%s4908_s4 + $0x350] sm:$0xff]  ;;  %v4312_v46 = vmul.f32 0.8, %v350_v33  ;;  %v4314_v50 = vmul.f32 0.8, %v317_v2  ;;  %v300_v55 = vld [vmem:[%s4908_s4 + $0x248] sm:$0xff] }
 0x11b   :  { %v846_v29 = vadd.f32 %v718_v59, %v590_v58  ;;  %v461_v32 = vld [vmem:[#allocation7 + $0x350] sm:$0xff]  ;;  %942 = vst [vmem:[#allocation19 + $0x258] sm:$0xff] %v814_v17  ;;  %v717_v21 = vmul.f32 0.8, %v333_v3  ;;  %2923 = vmatpush3.msra.mxu1 %v333_v3  ;;  %v813_v51 = vadd.f32 %v685_v31, %v557_v14  ;;  %v428_v36 = vld [vmem:[#allocation7 + $0x248] sm:$0xff]  ;;  %2890 = vmatpush3.msra.mxu0 %v300_v55  ;;  %v315_v28 = vld [vmem:[%s4908_s4 + $0x2c0] sm:$0xff] }
 0x11c   :  { %v589_v7 = vmul.f32 0.2, %v461_v32  ;;  %4943 = vst [vmem:[#allocation30_spill] sm:$0xff] %v4312_v46  ;;  %4944 = vst [vmem:[#allocation31_spill] sm:$0xff] %v4314_v50  ;;  %2924 = vmatprep.subr.mxu1 %v348_v13  ;;  %v556_v58 = vmul.f32 0.2, %v428_v36  ;;  %2891 = vmatprep.subr.mxu0 %v315_v28 }
 0x11d   :  { %974 = vst [vmem:[#allocation19 + $0x358] sm:$0xff] %v846_v29  ;;  %v684_v59 = vmul.f32 0.8, %v300_v55  ;;  %v332_v33 = vld [vmem:[%s4908_s4 + $0x348] sm:$0xff]  ;;  %941 = vst [vmem:[#allocation19 + $0x250] sm:$0xff] %v813_v51  ;;  %v347_v29 = vld [vmem:[%s4908_s4 + $0x3c0] sm:$0xff] }
 0x11e   :  { %v845_v47 = vadd.f32 %v717_v21, %v589_v7  ;;  %v460_v17 = vld [vmem:[#allocation7 + $0x348] sm:$0xff]  ;;  %v716_v18 = vmul.f32 0.8, %v332_v33  ;;  %2925 = vmatpush3.msra.mxu1 %v332_v33  ;;  %v4328_v14 = vmul.f32 0.8, %v349_v60  ;;  %v299_v32 = vld [vmem:[%s4908_s4 + $0x240] sm:$0xff] }
 0x11f   :  { %v588_v2 = vmul.f32 0.2, %v460_v17  ;;  %v4330_v31 = vmul.f32 0.8, %v316_v45  ;;  %v812_v3 = vadd.f32 %v684_v59, %v556_v58  ;;  %2926 = vmatprep.subr.mxu1 %v347_v29  ;;  %v427_v7 = vld [vmem:[#allocation7 + $0x240] sm:$0xff]  ;;  %2892 = vmatpush3.msra.mxu0 %v299_v32  ;;  %v314_v58 = vld [vmem:[%s4908_s4 + $0x2b8] sm:$0xff] }
 0x120   :  { %4945 = vst [vmem:[#allocation32_spill] sm:$0xff] %v4328_v14  ;;  %973 = vst [vmem:[#allocation19 + $0x350] sm:$0xff] %v845_v47  ;;  %v555_v51 = vmul.f32 0.2, %v427_v7  ;;  %v683_v55 = vmul.f32 0.8, %v299_v32  ;;  %2893 = vmatprep.subr.mxu0 %v314_v58 }
 0x121   :  { %4946 = vst [vmem:[#allocation33_spill] sm:$0xff] %v4330_v31  ;;  %v844_v21 = vadd.f32 %v716_v18, %v588_v2  ;;  %v331_v60 = vld [vmem:[%s4908_s4 + $0x340] sm:$0xff]  ;;  %940 = vst [vmem:[#allocation19 + $0x248] sm:$0xff] %v812_v3  ;;  %v346_v59 = vld [vmem:[%s4908_s4 + $0x3b8] sm:$0xff]  ;;  %v4344_v33 = vmul.f32 0.8, %v348_v13 }
 0x122   :  { %v459_v36 = vld [vmem:[#allocation7 + $0x340] sm:$0xff]  ;;  %v715_v47 = vmul.f32 0.8, %v331_v60  ;;  %2927 = vmatpush3.msra.mxu1 %v331_v60  ;;  %v4346_v17 = vmul.f32 0.8, %v315_v28  ;;  %v811_v2 = vadd.f32 %v683_v55, %v555_v51  ;;  %v298_v18 = vld [vmem:[%s4908_s4 + $0x238] sm:$0xff] }
 0x123   :  { %v587_v45 = vmul.f32 0.2, %v459_v36  ;;  %4947 = vst [vmem:[#allocation34_spill] sm:$0xff] %v4344_v33  ;;  %972 = vst [vmem:[#allocation19 + $0x348] sm:$0xff] %v844_v21  ;;  %2928 = vmatprep.subr.mxu1 %v346_v59  ;;  %v426_v3 = vld [vmem:[#allocation7 + $0x238] sm:$0xff]  ;;  %2894 = vmatpush3.msra.mxu0 %v298_v18  ;;  %v313_v55 = vld [vmem:[%s4908_s4 + $0x2b0] sm:$0xff] }
 0x124   :  { %4948 = vst [vmem:[#allocation35_spill] sm:$0xff] %v4346_v17  ;;  %v554_v7 = vmul.f32 0.2, %v426_v3  ;;  %v682_v60 = vmul.f32 0.8, %v298_v18  ;;  %v330_v13 = vld [vmem:[%s4908_s4 + $0x338] sm:$0xff]  ;;  %2895 = vmatprep.subr.mxu0 %v313_v55 }
 0x125   :  { %v4351_v32 = vadd.f32 %v715_v47, %v587_v45  ;;  %v458_v21 = vld [vmem:[#allocation7 + $0x338] sm:$0xff]  ;;  %939 = vst [vmem:[#allocation19 + $0x240] sm:$0xff] %v811_v2  ;;  %v714_v51 = vmul.f32 0.8, %v330_v13  ;;  %2929 = vmatpush3.msra.mxu1 %v330_v13  ;;  %v345_v36 = vld [vmem:[%s4908_s4 + $0x3b0] sm:$0xff]  ;;  %v415_v50 = vld [vmem:[#allocation7 + $0x1e0] sm:$0xff] }
 0x126   :  { %v586_v28 = vmul.f32 0.2, %v458_v21  ;;  %v4362_v45 = vmul.f32 0.8, %v347_v29  ;;  %v4365_v47 = vmul.f32 0.8, %v314_v58  ;;  %v4367_v18 = vadd.f32 %v682_v60, %v554_v7  ;;  %2930 = vmatprep.subr.mxu1 %v345_v36 }
 0x127   :  { %4949 = vst [vmem:[#allocation36_spill] sm:$0xff] %v4351_v32  ;;  %971 = vst [vmem:[#allocation19 + $0x340] sm:$0xff] %v4351_v32  ;;  %v297_v2 = vld [vmem:[%s4908_s4 + $0x230] sm:$0xff]  ;;  %v312_v32 = vld [vmem:[%s4908_s4 + $0x2a8] sm:$0xff] }
 0x128   :  { %4950 = vst [vmem:[#allocation37_spill] sm:$0xff] %v4362_v45  ;;  %4951 = vst [vmem:[#allocation38_spill] sm:$0xff] %v4365_v47  ;;  %v425_v3 = vld [vmem:[#allocation7 + $0x230] sm:$0xff]  ;;  %v4372_v13 = vadd.f32 %v714_v51, %v586_v28  ;;  %v681_v17 = vmul.f32 0.8, %v297_v2  ;;  %2896 = vmatpush3.msra.mxu0 %v297_v2  ;;  %v344_v28 = vld [vmem:[%s4908_s4 + $0x3a8] sm:$0xff] }
 0x129   :  { %4952 = vst [vmem:[#allocation39_spill] sm:$0xff] %v4367_v18  ;;  %v553_v21 = vmul.f32 0.2, %v425_v3  ;;  %v329_v29 = vld [vmem:[%s4908_s4 + $0x330] sm:$0xff]  ;;  %938 = vst [vmem:[#allocation19 + $0x238] sm:$0xff] %v4367_v18  ;;  %2897 = vmatprep.subr.mxu0 %v312_v32  ;;  %v414_v46 = vld [vmem:[#allocation7 + $0x1d8] sm:$0xff] }
 0x12a   :  { %4953 = vst [vmem:[#allocation40_spill] sm:$0xff] %v4372_v13  ;;  %v457_v58 = vld [vmem:[#allocation7 + $0x330] sm:$0xff]  ;;  %v713_v60 = vmul.f32 0.8, %v329_v29  ;;  %2931 = vmatpush3.msra.mxu1 %v329_v29  ;;  %v4384_v51 = vmul.f32 0.8, %v346_v59 }
 0x12b   :  { %v585_v7 = vmul.f32 0.2, %v457_v58  ;;  %970 = vst [vmem:[#allocation19 + $0x338] sm:$0xff] %v4372_v13  ;;  %v4387_v2 = vmul.f32 0.8, %v313_v55  ;;  %v4389_v3 = vadd.f32 %v681_v17, %v553_v21  ;;  %2932 = vmatprep.subr.mxu1 %v344_v28  ;;  %v296_v29 = vld [vmem:[%s4908_s4 + $0x228] sm:$0xff] }
 0x12c   :  { %4954 = vst [vmem:[#allocation41_spill] sm:$0xff] %v4384_v51  ;;  %v424_v58 = vld [vmem:[#allocation7 + $0x228] sm:$0xff]  ;;  %v680_v45 = vmul.f32 0.8, %v296_v29  ;;  %2898 = vmatpush3.msra.mxu0 %v296_v29  ;;  %v311_v13 = vld [vmem:[%s4908_s4 + $0x2a0] sm:$0xff] }
 0x12d   :  { %4955 = vst [vmem:[#allocation42_spill] sm:$0xff] %v4387_v2  ;;  %4956 = vst [vmem:[#allocation43_spill] sm:$0xff] %v4389_v3  ;;  %v4394_v18 = vadd.f32 %v713_v60, %v585_v7  ;;  %v552_v47 = vmul.f32 0.2, %v424_v58  ;;  %v328_v59 = vld [vmem:[%s4908_s4 + $0x328] sm:$0xff]  ;;  %v343_v7 = vld [vmem:[%s4908_s4 + $0x3a0] sm:$0xff]  ;;  %2899 = vmatprep.subr.mxu0 %v311_v13 }
 0x12e   :  { %v456_v55 = vld [vmem:[#allocation7 + $0x328] sm:$0xff]  ;;  %937 = vst [vmem:[#allocation19 + $0x230] sm:$0xff] %v4389_v3  ;;  %v712_v21 = vmul.f32 0.8, %v328_v59  ;;  %2933 = vmatpush3.msra.mxu1 %v328_v59  ;;  %v4406_v60 = vmul.f32 0.8, %v345_v36 }
 0x12f   :  { %4957 = vst [vmem:[#allocation44_spill] sm:$0xff] %v4394_v18  ;;  %v584_v17 = vmul.f32 0.2, %v456_v55  ;;  %969 = vst [vmem:[#allocation19 + $0x330] sm:$0xff] %v4394_v18  ;;  %v4409_v29 = vmul.f32 0.8, %v312_v32  ;;  %v4411_v58 = vadd.f32 %v680_v45, %v552_v47  ;;  %2934 = vmatprep.subr.mxu1 %v343_v7 }
 0x130   :  { %4958 = vst [vmem:[#allocation45_spill] sm:$0xff] %v4406_v60  ;;  %v295_v59 = vld [vmem:[%s4908_s4 + $0x220] sm:$0xff]  ;;  %v310_v18 = vld [vmem:[%s4908_s4 + $0x298] sm:$0xff]  ;;  %v416_v14 = vld [vmem:[#allocation7 + $0x1e8] sm:$0xff] }
 0x131   :  { %4959 = vst [vmem:[#allocation46_spill] sm:$0xff] %v4409_v29  ;;  %4960 = vst [vmem:[#allocation47_spill] sm:$0xff] %v4411_v58  ;;  %v423_v55 = vld [vmem:[#allocation7 + $0x220] sm:$0xff]  ;;  %v4416_v3 = vadd.f32 %v712_v21, %v584_v17  ;;  %v679_v51 = vmul.f32 0.8, %v295_v59  ;;  %2900 = vmatpush3.msra.mxu0 %v295_v59  ;;  %v342_v17 = vld [vmem:[%s4908_s4 + $0x398] sm:$0xff] }
 0x132   :  { %v551_v2 = vmul.f32 0.2, %v423_v55  ;;  %v327_v36 = vld [vmem:[%s4908_s4 + $0x320] sm:$0xff]  ;;  %936 = vst [vmem:[#allocation19 + $0x228] sm:$0xff] %v4411_v58  ;;  %v4428_v21 = vmul.f32 0.8, %v344_v28  ;;  %2901 = vmatprep.subr.mxu0 %v310_v18 }
 0x133   :  { %4961 = vst [vmem:[#allocation48_spill] sm:$0xff] %v4416_v3  ;;  %v455_v32 = vld [vmem:[#allocation7 + $0x320] sm:$0xff]  ;;  %v711_v47 = vmul.f32 0.8, %v327_v36  ;;  %2935 = vmatpush3.msra.mxu1 %v327_v36  ;;  %968 = vst [vmem:[#allocation19 + $0x328] sm:$0xff] %v4416_v3  ;;  %v294_v36 = vld [vmem:[%s4908_s4 + $0x218] sm:$0xff] }
 0x134   :  { %v583_v45 = vmul.f32 0.2, %v455_v32  ;;  %4962 = vst [vmem:[#allocation49_spill] sm:$0xff] %v4428_v21  ;;  %v4431_v59 = vmul.f32 0.8, %v311_v13  ;;  %v4433_v55 = vadd.f32 %v679_v51, %v551_v2  ;;  %2936 = vmatprep.subr.mxu1 %v342_v17  ;;  %v422_v32 = vld [vmem:[#allocation7 + $0x218] sm:$0xff]  ;;  %2902 = vmatpush3.msra.mxu0 %v294_v36 }
 0x135   :  { %v550_v29 = vmul.f32 0.2, %v422_v32  ;;  %v678_v60 = vmul.f32 0.8, %v294_v36  ;;  %v326_v28 = vld [vmem:[%s4908_s4 + $0x318] sm:$0xff]  ;;  %v309_v3 = vld [vmem:[%s4908_s4 + $0x290] sm:$0xff] }
 0x136   :  { %4963 = vst [vmem:[#allocation50_spill] sm:$0xff] %v4431_v59  ;;  %4964 = vst [vmem:[#allocation51_spill] sm:$0xff] %v4433_v55  ;;  %v4438_v58 = vadd.f32 %v711_v47, %v583_v45  ;;  %v454_v13 = vld [vmem:[#allocation7 + $0x318] sm:$0xff]  ;;  %v710_v2 = vmul.f32 0.8, %v326_v28  ;;  %2937 = vmatpush3.msra.mxu1 %v326_v28  ;;  %v341_v45 = vld [vmem:[%s4908_s4 + $0x390] sm:$0xff]  ;;  %2903 = vmatprep.subr.mxu0 %v309_v3 }
 0x137   :  { %935 = vst [vmem:[#allocation19 + $0x220] sm:$0xff] %v4433_v55  ;;  %v582_v51 = vmul.f32 0.2, %v454_v13  ;;  %v4450_v47 = vmul.f32 0.8, %v343_v7  ;;  %v4455_v32 = vadd.f32 %v678_v60, %v550_v29  ;;  %2938 = vmatprep.subr.mxu1 %v341_v45  ;;  %v293_v28 = vld [vmem:[%s4908_s4 + $0x210] sm:$0xff] }
 0x138   :  { %4965 = vst [vmem:[#allocation52_spill] sm:$0xff] %v4438_v58  ;;  %967 = vst [vmem:[#allocation19 + $0x320] sm:$0xff] %v4438_v58  ;;  %v4453_v36 = vmul.f32 0.8, %v310_v18  ;;  %v421_v13 = vld [vmem:[#allocation7 + $0x210] sm:$0xff]  ;;  %2904 = vmatpush3.msra.mxu0 %v293_v28  ;;  %v308_v58 = vld [vmem:[%s4908_s4 + $0x288] sm:$0xff] }
 0x139   :  { %4966 = vst [vmem:[#allocation53_spill] sm:$0xff] %v4450_v47  ;;  %4968 = vst [vmem:[#allocation55_spill] sm:$0xff] %v4455_v32  ;;  %v4460_v55 = vadd.f32 %v710_v2, %v582_v51  ;;  %v549_v59 = vmul.f32 0.2, %v421_v13  ;;  %v677_v21 = vmul.f32 0.8, %v293_v28  ;;  %2905 = vmatprep.subr.mxu0 %v308_v58 }
 0x13a   :  { %4967 = vst [vmem:[#allocation54_spill] sm:$0xff] %v4453_v36  ;;  %v325_v7 = vld [vmem:[%s4908_s4 + $0x310] sm:$0xff]  ;;  %934 = vst [vmem:[#allocation19 + $0x218] sm:$0xff] %v4455_v32  ;;  %v4472_v51 = vld [vmem:[%s4908_s4 + $0x388] sm:$0xff]  ;;  %v4474_v2 = vmul.f32 0.8, %v342_v17 }
 0x13b   :  { %4969 = vst [vmem:[#allocation56_spill] sm:$0xff] %v4460_v55  ;;  %v453_v18 = vld [vmem:[#allocation7 + $0x310] sm:$0xff]  ;;  %v709_v29 = vmul.f32 0.8, %v325_v7  ;;  %2939 = vmatpush3.msra.mxu1 %v325_v7  ;;  %966 = vst [vmem:[#allocation19 + $0x318] sm:$0xff] %v4460_v55  ;;  %v4479_v13 = vadd.f32 %v677_v21, %v549_v59  ;;  %v292_v7 = vld [vmem:[%s4908_s4 + $0x208] sm:$0xff] }
 0x13c   :  { %v581_v60 = vmul.f32 0.2, %v453_v18  ;;  %4970 = vst [vmem:[#allocation57_spill] sm:$0xff] %v4474_v2  ;;  %v4477_v28 = vmul.f32 0.8, %v309_v3  ;;  %2940 = vmatprep.subr.mxu1 %v4472_v51  ;;  %v420_v18 = vld [vmem:[#allocation7 + $0x208] sm:$0xff]  ;;  %2906 = vmatpush3.msra.mxu0 %v292_v7 }
 0x13d   :  { %4972 = vst [vmem:[#allocation59_spill] sm:$0xff] %v4479_v13  ;;  %v548_v36 = vmul.f32 0.2, %v420_v18  ;;  %v676_v47 = vmul.f32 0.8, %v292_v7  ;;  %v324_v3 = vld [vmem:[%s4908_s4 + $0x308] sm:$0xff] }
 0x13e   :  { %4971 = vst [vmem:[#allocation58_spill] sm:$0xff] %v4477_v28  ;;  %v4485_v32 = vadd.f32 %v709_v29, %v581_v60  ;;  %v452_v17 = vld [vmem:[#allocation7 + $0x308] sm:$0xff]  ;;  %933 = vst [vmem:[#allocation19 + $0x210] sm:$0xff] %v4479_v13  ;;  %v708_v59 = vmul.f32 0.8, %v324_v3  ;;  %2941 = vmatpush3.msra.mxu1 %v324_v3  ;;  %v4494_v55 = vld [vmem:[%s4908_s4 + $0x280] sm:$0xff] }
 0x13f   :  { %v580_v21 = vmul.f32 0.2, %v452_v17  ;;  %v4499_v60 = vld [vmem:[%s4908_s4 + $0x380] sm:$0xff]  ;;  %v4501_v29 = vmul.f32 0.8, %v341_v45  ;;  %v4506_v18 = vadd.f32 %v676_v47, %v548_v36  ;;  %2907 = vmatprep.subr.mxu0 %v4494_v55 }
 0x140   :  { %4973 = vst [vmem:[#allocation60_spill] sm:$0xff] %v4485_v32  ;;  %965 = vst [vmem:[#allocation19 + $0x310] sm:$0xff] %v4485_v32  ;;  %v4504_v7 = vmul.f32 0.8, %v308_v58  ;;  %2942 = vmatprep.subr.mxu1 %v4499_v60  ;;  %v291_v3 = vld [vmem:[%s4908_s4 + $0x200] sm:$0xff] }
 0x141   :  { %4974 = vst [vmem:[#allocation61_spill] sm:$0xff] %v4501_v29  ;;  %4976 = vst [vmem:[#allocation63_spill] sm:$0xff] %v4506_v18  ;;  %v419_v17 = vld [vmem:[#allocation7 + $0x200] sm:$0xff]  ;;  %v4513_v13 = vadd.f32 %v708_v59, %v580_v21  ;;  %v675_v45 = vmul.f32 0.8, %v291_v3  ;;  %2908 = vmatpush3.msra.mxu0 %v291_v3  ;;  %v386_v21 = vld [vmem:[#allocation7 + $0xf8] sm:$0xff] }
 0x142   :  { %4975 = vst [vmem:[#allocation62_spill] sm:$0xff] %v4504_v7  ;;  %v547_v28 = vmul.f32 0.2, %v419_v17  ;;  %v323_v58 = vld [vmem:[%s4908_s4 + $0x300] sm:$0xff]  ;;  %932 = vst [vmem:[#allocation19 + $0x208] sm:$0xff] %v4506_v18  ;;  %v3104_v18 = vld [vmem:[%s4942_s7 + $0x30] sm:$0xff] }
 0x143   :  { %4977 = vst [vmem:[#allocation64_spill] sm:$0xff] %v4513_v13  ;;  %v451_v47 = vld [vmem:[#allocation7 + $0x300] sm:$0xff]  ;;  %v707_v32 = vmul.f32 0.8, %v323_v58  ;;  %2943 = vmatpush3.msra.mxu1 %v323_v58  ;;  %v418_v59 = vld [vmem:[#allocation7 + $0x1f8] sm:$0xff]  ;;  %964 = vst [vmem:[#allocation19 + $0x308] sm:$0xff] %v4513_v13 }
 0x144   :  { %v579_v36 = vmul.f32 0.2, %v451_v47  ;;  %v3103_v7 = vld [vmem:[%s4942_s7 + $0x20] sm:$0xff]  ;;  %v4523_v3 = vadd.f32 %v675_v45, %v547_v28  ;;  %v514_v17 = vmul.f32 0.2, %v386_v21  ;;  %2249 = vmatmul.mubr.f32.vlgmr.msra.gmra.mxu1 %v3104_v18  ;;  %v385_v47 = vld [vmem:[#allocation7 + $0xf0] sm:$0xff] }
 0x145   :  { %2179 = vmatmul.mubr.f32.vlgmr.msra.gmra.mxu0 %v3103_v7  ;;  %v546_v29 = vmul.f32 0.2, %v418_v59  ;;  %v417_v58 = vld [vmem:[#allocation7 + $0x1f0] sm:$0xff]  ;;  %v513_v33 = vmul.f32 0.2, %v385_v47  ;;  %v384_v7 = vld [vmem:[#allocation7 + $0xe8] sm:$0xff] }
 0x146   :  { %v4528_v2 = vadd.f32 %v707_v32, %v579_v36  ;;  %v545_v31 = vmul.f32 0.2, %v417_v58  ;;  %931 = vst [vmem:[#allocation19 + $0x200] sm:$0xff] %v4523_v3  ;;  %v770_v28 = vadd.f32 %v3969_v30, %v514_v17  ;;  %v512_v21 = vmul.f32 0.2, %v384_v7  ;;  %v383_v13 = vld [vmem:[#allocation7 + $0xe0] sm:$0xff] }
 0x147   :  { %v802_v45 = vadd.f32 %v3984_v42, %v546_v29  ;;  %v544_v59 = vmul.f32 0.2, %v416_v14  ;;  %v769_v18 = vadd.f32 %v3986_v43, %v513_v33  ;;  %v511_v36 = vmul.f32 0.2, %v383_v13  ;;  %v382_v58 = vld [vmem:[#allocation7 + $0xd8] sm:$0xff]  ;;  %v381_v17 = vld [vmem:[#allocation7 + $0xd0] sm:$0xff] }
 0x148   :  { %4978 = vst [vmem:[#allocation65_spill] sm:$0xff] %v4528_v2  ;;  %963 = vst [vmem:[#allocation19 + $0x300] sm:$0xff] %v4528_v2  ;;  %v801_v32 = vadd.f32 %v4000_v56, %v545_v31  ;;  %v543_v47 = vmul.f32 0.2, %v415_v50  ;;  %2947 = vmatprep.subr.mxu0 %v770_v28  ;;  %v768_v30 = vadd.f32 %v4002_v57, %v512_v21  ;;  %v510_v14 = vmul.f32 0.2, %v382_v58 }
 0x149   :  { %898 = vst [vmem:[#allocation19 + $0xf8] sm:$0xff] %v770_v28  ;;  %930 = vst [vmem:[#allocation19 + $0x1f8] sm:$0xff] %v802_v45  ;;  %2982 = vmatprep.subr.mxu1 %v802_v45  ;;  %v800_v42 = vadd.f32 %v4016_v8, %v544_v59  ;;  %v542_v29 = vmul.f32 0.2, %v414_v46  ;;  %v413_v7 = vld [vmem:[#allocation7 + $0x1d0] sm:$0xff]  ;;  %v3105_v2 = vld [vmem:[#allocation19 + $0x78] sm:$0xff]  ;;  %v767_v56 = vadd.f32 %v4018_v9, %v511_v36 }
 0x14a   :  { %2948 = vmatpush3.msra.mxu0 %v3105_v2  ;;  %v3106_v43 = vld [vmem:[#allocation19 + $0x178] sm:$0xff]  ;;  %897 = vst [vmem:[#allocation19 + $0xf0] sm:$0xff] %v769_v18  ;;  %929 = vst [vmem:[#allocation19 + $0x1f0] sm:$0xff] %v801_v32  ;;  %v799_v50 = vadd.f32 %v4032_v23, %v543_v47  ;;  %v509_v31 = vmul.f32 0.2, %v381_v17  ;;  %v380_v13 = vld [vmem:[#allocation7 + $0xc8] sm:$0xff]  ;;  %v766_v8 = vadd.f32 %v4034_v24, %v510_v14 }
 0x14b   :  { %2983 = vmatpush3.msra.mxu1 %v3106_v43  ;;  %v541_v33 = vmul.f32 0.2, %v413_v7  ;;  %v412_v57 = vld [vmem:[#allocation7 + $0x1c8] sm:$0xff]  ;;  %2949 = vmatprep.subr.mxu0 %v769_v18  ;;  %896 = vst [vmem:[#allocation19 + $0xe8] sm:$0xff] %v768_v30  ;;  %928 = vst [vmem:[#allocation19 + $0x1e8] sm:$0xff] %v800_v42  ;;  %v798_v46 = vadd.f32 %v4048_v54, %v542_v29  ;;  %v379_v45 = vld [vmem:[#allocation7 + $0xc0] sm:$0xff] }
 0x14c   :  { %2984 = vmatprep.subr.mxu1 %v801_v32  ;;  %v508_v2 = vmul.f32 0.2, %v380_v13  ;;  %v540_v28 = vmul.f32 0.2, %v412_v57  ;;  %v411_v21 = vld [vmem:[#allocation7 + $0x1c0] sm:$0xff]  ;;  %v3107_v59 = vld [vmem:[#allocation19 + $0x70] sm:$0xff]  ;;  %v4543_v23 = vadd.f32 %v4050_v38, %v509_v31 }
 0x14d   :  { %2950 = vmatpush3.msra.mxu0 %v3107_v59  ;;  %v3108_v9 = vld [vmem:[#allocation19 + $0x170] sm:$0xff]  ;;  %895 = vst [vmem:[#allocation19 + $0xe0] sm:$0xff] %v767_v56  ;;  %927 = vst [vmem:[#allocation19 + $0x1e0] sm:$0xff] %v799_v50  ;;  %v4546_v18 = vadd.f32 %v4064_v52, %v541_v33  ;;  %v507_v32 = vmul.f32 0.2, %v379_v45  ;;  %v3109_v52 = vld [vmem:[#allocation19 + $0x68] sm:$0xff] }
 0x14e   :  { %2985 = vmatpush3.msra.mxu1 %v3108_v9  ;;  %v539_v24 = vmul.f32 0.2, %v411_v21  ;;  %v378_v36 = vld [vmem:[#allocation7 + $0xb8] sm:$0xff]  ;;  %2951 = vmatprep.subr.mxu0 %v768_v30  ;;  %894 = vst [vmem:[#allocation19 + $0xd8] sm:$0xff] %v766_v8  ;;  %926 = vst [vmem:[#allocation19 + $0x1d8] sm:$0xff] %v798_v46  ;;  %v4549_v47 = vadd.f32 %v4066_v53, %v508_v2  ;;  %v4552_v58 = vadd.f32 %v4080_v6, %v540_v28  ;;  %v377_v29 = vld [vmem:[#allocation7 + $0xb0] sm:$0xff] }
 0x14f   :  { %v410_v54 = vld [vmem:[#allocation7 + $0x1b8] sm:$0xff]  ;;  %2986 = vmatprep.subr.mxu1 %v800_v42  ;;  %v506_v14 = vmul.f32 0.2, %v378_v36  ;;  %v409_v17 = vld [vmem:[#allocation7 + $0x1b0] sm:$0xff]  ;;  %2952 = vmatpush3.msra.mxu0 %v3109_v52  ;;  %893 = vst [vmem:[#allocation19 + $0xd0] sm:$0xff] %v4543_v23  ;;  %925 = vst [vmem:[#allocation19 + $0x1d0] sm:$0xff] %v4546_v18  ;;  %v4557_v30 = vadd.f32 %v4082_v10, %v507_v32 }
 0x150   :  { %v538_v38 = vmul.f32 0.2, %v410_v54  ;;  %v3110_v7 = vld [vmem:[#allocation19 + $0x168] sm:$0xff]  ;;  %v4560_v53 = vadd.f32 %v4096_v26, %v539_v24  ;;  %v505_v6 = vmul.f32 0.2, %v377_v29  ;;  %2953 = vmatprep.subr.mxu0 %v767_v56  ;;  %892 = vst [vmem:[#allocation19 + $0xc8] sm:$0xff] %v4549_v47 }
 0x151   :  { %2987 = vmatpush3.msra.mxu1 %v3110_v7  ;;  %v537_v42 = vmul.f32 0.2, %v409_v17  ;;  %v376_v43 = vld [vmem:[#allocation7 + $0xa8] sm:$0xff]  ;;  %924 = vst [vmem:[#allocation19 + $0x1c8] sm:$0xff] %v4552_v58  ;;  %v4565_v33 = vadd.f32 %v4098_v27, %v506_v14  ;;  %v375_v26 = vld [vmem:[#allocation7 + $0xa0] sm:$0xff]  ;;  %891 = vst [vmem:[#allocation19 + $0xc0] sm:$0xff] %v4557_v30 }
 0x152   :  { %v408_v31 = vld [vmem:[#allocation7 + $0x1a8] sm:$0xff]  ;;  %2988 = vmatprep.subr.mxu1 %v799_v50  ;;  %v4568_v13 = vadd.f32 %v4112_v44, %v538_v38  ;;  %v504_v10 = vmul.f32 0.2, %v376_v43  ;;  %v407_v2 = vld [vmem:[#allocation7 + $0x1a0] sm:$0xff]  ;;  %923 = vst [vmem:[#allocation19 + $0x1c0] sm:$0xff] %v4560_v53  ;;  %v4573_v56 = vadd.f32 %v4114_v63, %v505_v6  ;;  %v374_v21 = vld [vmem:[#allocation7 + $0x98] sm:$0xff] }
 0x153   :  { %v536_v57 = vmul.f32 0.2, %v408_v31  ;;  %v3111_v28 = vld [vmem:[#allocation19 + $0x60] sm:$0xff]  ;;  %v4576_v27 = vadd.f32 %v4128_v62, %v537_v42  ;;  %v503_v44 = vmul.f32 0.2, %v375_v26  ;;  %v406_v59 = vld [vmem:[#allocation7 + $0x198] sm:$0xff] }
 0x154   :  { %2954 = vmatpush3.msra.mxu0 %v3111_v28  ;;  %v3112_v45 = vld [vmem:[#allocation19 + $0x160] sm:$0xff]  ;;  %v535_v50 = vmul.f32 0.2, %v407_v2  ;;  %890 = vst [vmem:[#allocation19 + $0xb8] sm:$0xff] %v4565_v33  ;;  %922 = vst [vmem:[#allocation19 + $0x1b8] sm:$0xff] %v4568_v13  ;;  %v4581_v9 = vadd.f32 %v4130_v0, %v504_v10  ;;  %v373_v62 = vld [vmem:[#allocation7 + $0x90] sm:$0xff] }
 0x155   :  { %2989 = vmatpush3.msra.mxu1 %v3112_v45  ;;  %2955 = vmatprep.subr.mxu0 %v766_v8  ;;  %v4584_v32 = vadd.f32 %v4144_v19, %v536_v57  ;;  %v502_v63 = vmul.f32 0.2, %v374_v21  ;;  %v534_v24 = vmul.f32 0.2, %v406_v59  ;;  %v405_v36 = vld [vmem:[#allocation7 + $0x190] sm:$0xff]  ;;  %v3113_v54 = vld [vmem:[#allocation19 + $0x58] sm:$0xff]  ;;  %v4589_v8 = vadd.f32 %v4146_v20, %v503_v44 }
 0x156   :  { %2990 = vmatprep.subr.mxu1 %v798_v46  ;;  %2956 = vmatpush3.msra.mxu0 %v3113_v54  ;;  %v3114_v14 = vld [vmem:[#allocation19 + $0x158] sm:$0xff]  ;;  %889 = vst [vmem:[#allocation19 + $0xb0] sm:$0xff] %v4573_v56  ;;  %921 = vst [vmem:[#allocation19 + $0x1b0] sm:$0xff] %v4576_v27  ;;  %v4592_v0 = vadd.f32 %v4160_v39, %v535_v50  ;;  %v501_v19 = vmul.f32 0.2, %v373_v62  ;;  %v372_v38 = vld [vmem:[#allocation7 + $0x88] sm:$0xff] }
 0x157   :  { %2991 = vmatpush3.msra.mxu1 %v3114_v14  ;;  %v533_v46 = vmul.f32 0.2, %v405_v36  ;;  %v404_v29 = vld [vmem:[#allocation7 + $0x188] sm:$0xff]  ;;  %2957 = vmatprep.subr.mxu0 %v4543_v23  ;;  %888 = vst [vmem:[#allocation19 + $0xa8] sm:$0xff] %v4581_v9  ;;  %920 = vst [vmem:[#allocation19 + $0x1a8] sm:$0xff] %v4584_v32  ;;  %v4599_v17 = vadd.f32 %v4162_v40, %v502_v63  ;;  %v4602_v20 = vadd.f32 %v4176_v61, %v534_v24  ;;  %v371_v7 = vld [vmem:[#allocation7 + $0x80] sm:$0xff] }
 0x158   :  { %2992 = vmatprep.subr.mxu1 %v4546_v18  ;;  %v500_v39 = vmul.f32 0.2, %v372_v38  ;;  %v532_v52 = vmul.f32 0.2, %v404_v29  ;;  %v403_v6 = vld [vmem:[#allocation7 + $0x180] sm:$0xff]  ;;  %v3115_v42 = vld [vmem:[#allocation19 + $0x50] sm:$0xff]  ;;  %v4607_v23 = vadd.f32 %v4178_v1, %v501_v19 }
 0x159   :  { %2958 = vmatpush3.msra.mxu0 %v3115_v42  ;;  %v3116_v43 = vld [vmem:[#allocation19 + $0x150] sm:$0xff]  ;;  %887 = vst [vmem:[#allocation19 + $0xa0] sm:$0xff] %v4589_v8  ;;  %919 = vst [vmem:[#allocation19 + $0x1a0] sm:$0xff] %v4592_v0  ;;  %v4610_v40 = vadd.f32 %v4192_v22, %v533_v46  ;;  %v499_v61 = vmul.f32 0.2, %v371_v7  ;;  %v3118_v26 = vld [vmem:[#allocation19 + $0x148] sm:$0xff] }
 0x15a   :  { %2993 = vmatpush3.msra.mxu1 %v3116_v43  ;;  %v531_v18 = vmul.f32 0.2, %v403_v6  ;;  %v4613_v31 = vmul.f32 0.8, %v4472_v51  ;;  %v4616_v10 = vmul.f32 0.8, %v4494_v55  ;;  %2959 = vmatprep.subr.mxu0 %v4549_v47  ;;  %v4623_v1 = vadd.f32 %v4194_v25, %v500_v39 }
 0x15b   :  { %2994 = vmatprep.subr.mxu1 %v4552_v58  ;;  %886 = vst [vmem:[#allocation19 + $0x98] sm:$0xff] %v4599_v17  ;;  %918 = vst [vmem:[#allocation19 + $0x198] sm:$0xff] %v4602_v20  ;;  %v4626_v22 = vadd.f32 %v4211_v48, %v532_v52  ;;  %v450_v57 = vld [vmem:[#allocation7 + $0x2f8] sm:$0xff]  ;;  %v3117_v51 = vld [vmem:[#allocation19 + $0x48] sm:$0xff]  ;;  %v4631_v55 = vadd.f32 %v4213_v49, %v499_v61  ;;  %v4641_v49 = vmul.f32 0.8, %v4499_v60 }
 0x15c   :  { %2960 = vmatpush3.msra.mxu0 %v3117_v51  ;;  %2995 = vmatpush3.msra.mxu1 %v3118_v26  ;;  %885 = vst [vmem:[#allocation19 + $0x90] sm:$0xff] %v4607_v23  ;;  %917 = vst [vmem:[#allocation19 + $0x190] sm:$0xff] %v4610_v40  ;;  %v4634_v47 = vadd.f32 %v4231_v15, %v531_v18  ;;  %v578_v25 = vmul.f32 0.2, %v450_v57  ;;  %v482_v58 = vld [vmem:[#allocation7 + $0x3f8] sm:$0xff]  ;;  %v449_v2 = vld [vmem:[#allocation7 + $0x2f0] sm:$0xff] }
 0x15d   :  { %v481_v48 = vld [vmem:[#allocation7 + $0x3f0] sm:$0xff]  ;;  %2961 = vmatprep.subr.mxu0 %v4557_v30  ;;  %2996 = vmatprep.subr.mxu1 %v4560_v53  ;;  %884 = vst [vmem:[#allocation19 + $0x88] sm:$0xff] %v4623_v1  ;;  %916 = vst [vmem:[#allocation19 + $0x188] sm:$0xff] %v4626_v22  ;;  %v610_v28 = vmul.f32 0.2, %v482_v58  ;;  %v3119_v15 = vld [vmem:[#allocation19 + $0x40] sm:$0xff] }
 0x15e   :  { %v577_v45 = vmul.f32 0.2, %v449_v2  ;;  %v609_v44 = vmul.f32 0.2, %v481_v48  ;;  %2962 = vmatpush3.msra.mxu0 %v3119_v15  ;;  %v3120_v50 = vld [vmem:[#allocation19 + $0x140] sm:$0xff]  ;;  %883 = vst [vmem:[#allocation19 + $0x80] sm:$0xff] %v4631_v55  ;;  %v4646_v30 = vadd.f32 %v4233_v16, %v578_v25 }
 0x15f   :  { %2997 = vmatpush3.msra.mxu1 %v3120_v50  ;;  %915 = vst [vmem:[#allocation19 + $0x180] sm:$0xff] %v4634_v47  ;;  %v448_v53 = vld [vmem:[#allocation7 + $0x2e8] sm:$0xff]  ;;  %v447_v59 = vld [vmem:[#allocation7 + $0x2e0] sm:$0xff]  ;;  %2963 = vmatprep.subr.mxu0 %v4565_v33  ;;  %v4651_v60 = vadd.f32 %v4248_v37, %v610_v28  ;;  %v446_v16 = vld [vmem:[#allocation7 + $0x2d8] sm:$0xff] }
 0x160   :  { %v480_v21 = vld [vmem:[#allocation7 + $0x3e8] sm:$0xff]  ;;  %2998 = vmatprep.subr.mxu1 %v4568_v13  ;;  %v4654_v63 = vadd.f32 %v4250_v41, %v577_v45  ;;  %v4657_v24 = vadd.f32 %v4264_v4, %v609_v44  ;;  %v576_v62 = vmul.f32 0.2, %v448_v53  ;;  %v479_v36 = vld [vmem:[#allocation7 + $0x3e0] sm:$0xff]  ;;  %v478_v54 = vld [vmem:[#allocation7 + $0x3d8] sm:$0xff]  ;;  %962 = vst [vmem:[#allocation19 + $0x2f8] sm:$0xff] %v4646_v30 }
 0x161   :  { %v3121_v14 = vld [vmem:[#allocation19 + $0x38] sm:$0xff]  ;;  %v608_v33 = vmul.f32 0.2, %v480_v21  ;;  %v575_v13 = vmul.f32 0.2, %v447_v59  ;;  %994 = vst [vmem:[#allocation19 + $0x3f8] sm:$0xff] %v4651_v60 }
 0x162   :  { %2964 = vmatpush3.msra.mxu0 %v3121_v14  ;;  %v3122_v19 = vld [vmem:[#allocation19 + $0x138] sm:$0xff]  ;;  %v607_v37 = vmul.f32 0.2, %v479_v36  ;;  %961 = vst [vmem:[#allocation19 + $0x2f0] sm:$0xff] %v4654_v63  ;;  %993 = vst [vmem:[#allocation19 + $0x3f0] sm:$0xff] %v4657_v24  ;;  %v4666_v41 = vadd.f32 %v4266_v5, %v576_v62  ;;  %v445_v38 = vld [vmem:[#allocation7 + $0x2d0] sm:$0xff] }
 0x163   :  { %2999 = vmatpush3.msra.mxu1 %v3122_v19  ;;  %2965 = vmatprep.subr.mxu0 %v4573_v56  ;;  %v574_v4 = vmul.f32 0.2, %v446_v16  ;;  %v606_v46 = vmul.f32 0.2, %v478_v54  ;;  %v477_v29 = vld [vmem:[#allocation7 + $0x3d0] sm:$0xff]  ;;  %v4669_v56 = vadd.f32 %v4280_v34, %v608_v33  ;;  %v444_v5 = vld [vmem:[#allocation7 + $0x2c8] sm:$0xff] }
 0x164   :  { %3000 = vmatprep.subr.mxu1 %v4576_v27  ;;  %v3123_v39 = vld [vmem:[#allocation19 + $0x30] sm:$0xff]  ;;  %v4672_v27 = vadd.f32 %v4282_v35, %v575_v13  ;;  %v4675_v7 = vadd.f32 %v4296_v11, %v607_v37  ;;  %v573_v6 = vmul.f32 0.2, %v445_v38  ;;  %v476_v42 = vld [vmem:[#allocation7 + $0x3c8] sm:$0xff]  ;;  %v443_v43 = vld [vmem:[#allocation7 + $0x2c0] sm:$0xff]  ;;  %960 = vst [vmem:[#allocation19 + $0x2e8] sm:$0xff] %v4666_v41 }
 0x165   :  { %2966 = vmatpush3.msra.mxu0 %v3123_v39  ;;  %v3124_v52 = vld [vmem:[#allocation19 + $0x130] sm:$0xff]  ;;  %v4681_v61 = vadd.f32 %v4298_v12, %v574_v4  ;;  %v4979_v34 = vld [vmem:[#allocation30_spill] sm:$0xff]  ;;  %v605_v35 = vmul.f32 0.2, %v477_v29  ;;  %v572_v57 = vmul.f32 0.2, %v444_v5 }
 0x166   :  { %3001 = vmatpush3.msra.mxu1 %v3124_v52  ;;  %2967 = vmatprep.subr.mxu0 %v4581_v9  ;;  %v4684_v18 = vadd.f32 %v4979_v34, %v606_v46  ;;  %v475_v11 = vld [vmem:[#allocation7 + $0x3c0] sm:$0xff]  ;;  %v442_v51 = vld [vmem:[#allocation7 + $0x2b8] sm:$0xff]  ;;  %v3125_v26 = vld [vmem:[#allocation19 + $0x28] sm:$0xff]  ;;  %992 = vst [vmem:[#allocation19 + $0x3e8] sm:$0xff] %v4669_v56  ;;  %v571_v58 = vmul.f32 0.2, %v443_v43 }
 0x167   :  { %3002 = vmatprep.subr.mxu1 %v4584_v32  ;;  %2968 = vmatpush3.msra.mxu0 %v3125_v26  ;;  %v3126_v25 = vld [vmem:[#allocation19 + $0x128] sm:$0xff]  ;;  %959 = vst [vmem:[#allocation19 + $0x2e0] sm:$0xff] %v4672_v27  ;;  %991 = vst [vmem:[#allocation19 + $0x3e0] sm:$0xff] %v4675_v7  ;;  %v604_v32 = vmul.f32 0.2, %v476_v42  ;;  %v4981_v48 = vld [vmem:[#allocation32_spill] sm:$0xff] }
 0x168   :  { %3003 = vmatpush3.msra.mxu1 %v3126_v25  ;;  %v4980_v9 = vld [vmem:[#allocation31_spill] sm:$0xff]  ;;  %v603_v2 = vmul.f32 0.2, %v475_v11  ;;  %2969 = vmatprep.subr.mxu0 %v4589_v8  ;;  %958 = vst [vmem:[#allocation19 + $0x2d8] sm:$0xff] %v4681_v61  ;;  %990 = vst [vmem:[#allocation19 + $0x3d8] sm:$0xff] %v4684_v18  ;;  %v4697_v28 = vadd.f32 %v4981_v48, %v605_v35  ;;  %v4982_v45 = vld [vmem:[#allocation33_spill] sm:$0xff] }
 0x169   :  { %v4690_v12 = vadd.f32 %v4980_v9, %v573_v6  ;;  %3004 = vmatprep.subr.mxu1 %v4592_v0  ;;  %v4700_v44 = vadd.f32 %v4982_v45, %v572_v57  ;;  %v570_v15 = vmul.f32 0.2, %v442_v51  ;;  %v474_v50 = vld [vmem:[#allocation7 + $0x3b8] sm:$0xff]  ;;  %v441_v53 = vld [vmem:[#allocation7 + $0x2b0] sm:$0xff]  ;;  %v3127_v59 = vld [vmem:[#allocation19 + $0x20] sm:$0xff] }
 0x16a   :  { %v473_v21 = vld [vmem:[#allocation7 + $0x3b0] sm:$0xff]  ;;  %2970 = vmatpush3.msra.mxu0 %v3127_v59  ;;  %v3128_v62 = vld [vmem:[#allocation19 + $0x120] sm:$0xff]  ;;  %v602_v19 = vmul.f32 0.2, %v474_v50  ;;  %989 = vst [vmem:[#allocation19 + $0x3d0] sm:$0xff] %v4697_v28  ;;  %v3129_v52 = vld [vmem:[#allocation19 + $0x18] sm:$0xff] }
 0x16b   :  { %3005 = vmatpush3.msra.mxu1 %v3128_v62  ;;  %957 = vst [vmem:[#allocation19 + $0x2d0] sm:$0xff] %v4690_v12  ;;  %v4983_v8 = vld [vmem:[#allocation34_spill] sm:$0xff]  ;;  %v4984_v36 = vld [vmem:[#allocation35_spill] sm:$0xff]  ;;  %v4985_v54 = vld [vmem:[#allocation37_spill] sm:$0xff]  ;;  %2971 = vmatprep.subr.mxu0 %v4599_v17  ;;  %v569_v38 = vmul.f32 0.2, %v441_v53 }
 0x16c   :  { %v4704_v0 = vadd.f32 %v4983_v8, %v604_v32  ;;  %v4707_v16 = vadd.f32 %v4984_v36, %v571_v58  ;;  %v4710_v14 = vadd.f32 %v4985_v54, %v603_v2  ;;  %v440_v33 = vld [vmem:[#allocation7 + $0x2a8] sm:$0xff]  ;;  %v439_v37 = vld [vmem:[#allocation7 + $0x2a0] sm:$0xff]  ;;  %3006 = vmatprep.subr.mxu1 %v4602_v20  ;;  %956 = vst [vmem:[#allocation19 + $0x2c8] sm:$0xff] %v4700_v44  ;;  %v601_v29 = vmul.f32 0.2, %v473_v21  ;;  %v438_v34 = vld [vmem:[#allocation7 + $0x298] sm:$0xff] }
 0x16d   :  { %v472_v13 = vld [vmem:[#allocation7 + $0x3a8] sm:$0xff]  ;;  %v568_v39 = vmul.f32 0.2, %v440_v33  ;;  %2972 = vmatpush3.msra.mxu0 %v3129_v52  ;;  %v3130_v6 = vld [vmem:[#allocation19 + $0x118] sm:$0xff]  ;;  %v567_v42 = vmul.f32 0.2, %v439_v37 }
 0x16e   :  { %v4986_v4 = vld [vmem:[#allocation38_spill] sm:$0xff]  ;;  %3007 = vmatpush3.msra.mxu1 %v3130_v6  ;;  %988 = vst [vmem:[#allocation19 + $0x3c8] sm:$0xff] %v4704_v0  ;;  %955 = vst [vmem:[#allocation19 + $0x2c0] sm:$0xff] %v4707_v16  ;;  %v4987_v17 = vld [vmem:[#allocation41_spill] sm:$0xff]  ;;  %v600_v5 = vmul.f32 0.2, %v472_v13  ;;  %2973 = vmatprep.subr.mxu0 %v4607_v23 }
 0x16f   :  { %v4717_v46 = vadd.f32 %v4986_v4, %v570_v15  ;;  %987 = vst [vmem:[#allocation19 + $0x3c0] sm:$0xff] %v4710_v14  ;;  %v4723_v20 = vadd.f32 %v4987_v17, %v602_v19  ;;  %v471_v43 = vld [vmem:[#allocation7 + $0x3a0] sm:$0xff]  ;;  %3008 = vmatprep.subr.mxu1 %v4610_v40  ;;  %v470_v58 = vld [vmem:[#allocation7 + $0x398] sm:$0xff]  ;;  %v437_v23 = vld [vmem:[#allocation7 + $0x290] sm:$0xff]  ;;  %v566_v21 = vmul.f32 0.2, %v438_v34 }
 0x170   :  { %v1683_v35 = vld [vmem:[%s4988_s8 + $0x8] sm:$0xff]  ;;  %v4990_v51 = vld [vmem:[#allocation45_spill] sm:$0xff]  ;;  %v599_v32 = vmul.f32 0.2, %v471_v43  ;;  %v469_v2 = vld [vmem:[#allocation7 + $0x390] sm:$0xff] }
 0x171   :  { %954 = vst [vmem:[#allocation19 + $0x2b8] sm:$0xff] %v4717_v46  ;;  %v4989_v57 = vld [vmem:[#allocation42_spill] sm:$0xff]  ;;  %v4735_v26 = vadd.f32 %v4990_v51, %v601_v29  ;;  %v3131_v40 = vld [vmem:[#allocation19 + $0x10] sm:$0xff]  ;;  %986 = vst [vmem:[#allocation19 + $0x3b8] sm:$0xff] %v4723_v20  ;;  %v598_v59 = vmul.f32 0.2, %v470_v58  ;;  %2321 = vmatprep.mubr.f32.mxu0 %v1683_v35 }
 0x172   :  { %v4732_v11 = vadd.f32 %v4989_v57, %v569_v38  ;;  %v4991_v25 = vld [vmem:[#allocation46_spill] sm:$0xff]  ;;  %2974 = vmatpush3.msra.mxu0 %v3131_v40  ;;  %v3132_v48 = vld [vmem:[#allocation19 + $0x110] sm:$0xff]  ;;  %v4992_v45 = vld [vmem:[#allocation49_spill] sm:$0xff]  ;;  %v565_v19 = vmul.f32 0.2, %v437_v23 }
 0x173   :  { %v4738_v9 = vadd.f32 %v4991_v25, %v568_v39  ;;  %3009 = vmatpush3.msra.mxu1 %v3132_v48  ;;  %v4742_v15 = vadd.f32 %v4992_v45, %v600_v5  ;;  %v4993_v50 = vld [vmem:[#allocation50_spill] sm:$0xff]  ;;  %2975 = vmatprep.subr.mxu0 %v4623_v1  ;;  %985 = vst [vmem:[#allocation19 + $0x3b0] sm:$0xff] %v4735_v26  ;;  %v4994_v36 = vld [vmem:[#allocation53_spill] sm:$0xff]  ;;  %v597_v33 = vmul.f32 0.2, %v469_v2  ;;  %v1685_v1 = vld [vmem:[%s4988_s8 + $0x18] sm:$0xff] }
 0x174   :  { %v4745_v53 = vadd.f32 %v4993_v50, %v567_v42  ;;  %v436_v62 = vld [vmem:[#allocation7 + $0x288] sm:$0xff]  ;;  %3010 = vmatprep.subr.mxu1 %v4626_v22  ;;  %953 = vst [vmem:[#allocation19 + $0x2b0] sm:$0xff] %v4732_v11  ;;  %v4753_v54 = vadd.f32 %v4994_v36, %v599_v32  ;;  %v4996_v29 = vld [vmem:[#allocation57_spill] sm:$0xff]  ;;  %2391 = vmatprep.mubr.f32.mxu1 %v1685_v1  ;;  %v5012_v50 = vld [vmem:[#allocation60_spill] sm:$0xff] }
 0x175   :  { %v468_v8 = vld [vmem:[#allocation7 + $0x388] sm:$0xff]  ;;  %952 = vst [vmem:[#allocation19 + $0x2a8] sm:$0xff] %v4738_v9  ;;  %v564_v13 = vmul.f32 0.2, %v436_v62  ;;  %984 = vst [vmem:[#allocation19 + $0x3a8] sm:$0xff] %v4742_v15  ;;  %v4764_v39 = vadd.f32 %v4996_v29, %v598_v59  ;;  %v435_v6 = vld [vmem:[#allocation7 + $0x280] sm:$0xff] }
 0x176   :  { %v3133_v37 = vld [vmem:[#allocation19 + $0x8] sm:$0xff]  ;;  %951 = vst [vmem:[#allocation19 + $0x2a0] sm:$0xff] %v4745_v53  ;;  %v596_v52 = vmul.f32 0.2, %v468_v8  ;;  %v467_v17 = vld [vmem:[#allocation7 + $0x380] sm:$0xff]  ;;  %983 = vst [vmem:[#allocation19 + $0x3a0] sm:$0xff] %v4753_v54 }
 0x177   :  { %2976 = vmatpush3.msra.mxu0 %v3133_v37  ;;  %v3134_v4 = vld [vmem:[#allocation19 + $0x108] sm:$0xff]  ;;  %v1682_v5 = vld [vmem:[%s4988_s8] sm:$0xff]  ;;  %982 = vst [vmem:[#allocation19 + $0x398] sm:$0xff] %v4764_v39  ;;  %v595_v23 = vmul.f32 0.2, %v467_v17  ;;  %v5014_v59 = vld [vmem:[#allocation64_spill] sm:$0xff] }
 0x178   :  { %3011 = vmatpush3.msra.mxu1 %v3134_v4  ;;  %v4995_v22 = vld [vmem:[#allocation54_spill] sm:$0xff]  ;;  %2977 = vmatprep.subr.mxu0 %v4631_v55  ;;  %v1684_v42 = vld [vmem:[%s4988_s8 + $0x10] sm:$0xff]  ;;  %v4998_v57 = vld [vmem:[#allocation61_spill] sm:$0xff]  ;;  %v4787_v58 = vadd.f32 %v4613_v31, %v596_v52 }
 0x179   :  { %v4761_v38 = vadd.f32 %v4995_v22, %v566_v21  ;;  %3012 = vmatprep.subr.mxu1 %v4634_v47  ;;  %v4997_v43 = vld [vmem:[#allocation58_spill] sm:$0xff]  ;;  %v4779_v51 = vadd.f32 %v4998_v57, %v597_v33  ;;  %v563_v47 = vmul.f32 0.2, %v435_v6  ;;  %v4797_v31 = vadd.f32 %v4641_v49, %v595_v23  ;;  %v3137_v35 = vld [vmem:[#allocation19 + $0x278] sm:$0xff]  ;;  %v3140_v49 = vld [vmem:[#allocation19 + $0x370] sm:$0xff]  ;;  %v2734_v33 = vpop.f32.mrf.mxu1 }
 0x17a   :  { %v4776_v34 = vadd.f32 %v4997_v43, %v565_v19  ;;  %v4999_v25 = vld [vmem:[#allocation62_spill] sm:$0xff]  ;;  %980 = vst [vmem:[#allocation19 + $0x388] sm:$0xff] %v4787_v58  ;;  %v3138_v48 = vld [vmem:[#allocation19 + $0x378] sm:$0xff]  ;;  %v5013_v21 = vld [vmem:[#allocation63_spill] sm:$0xff]  ;;  %v2699_v19 = vpop.f32.mrf.mxu0 }
 0x17b   :  { %v4782_v55 = vadd.f32 %v4999_v25, %v564_v13  ;;  %v3135_v32 = vld [vmem:[#allocation19] sm:$0xff]  ;;  %950 = vst [vmem:[#allocation19 + $0x298] sm:$0xff] %v4761_v38  ;;  %981 = vst [vmem:[#allocation19 + $0x390] sm:$0xff] %v4779_v51  ;;  %v4793_v40 = vadd.f32 %v4616_v10, %v563_v47  ;;  %v3139_v10 = vld [vmem:[#allocation19 + $0x270] sm:$0xff]  ;;  %v2735_v37 = vpop.f32.mrf.mxu1 }
 0x17c   :  { %2978 = vmatpush3.msra.mxu0 %v3135_v32  ;;  %v3136_v2 = vld [vmem:[#allocation19 + $0x100] sm:$0xff]  ;;  %949 = vst [vmem:[#allocation19 + $0x290] sm:$0xff] %v4776_v34  ;;  %979 = vst [vmem:[#allocation19 + $0x380] sm:$0xff] %v4797_v31  ;;  %v1689_v62 = vld [vmem:[%s4988_s8 + $0x38] sm:$0xff]  ;;  %v2700_v13 = vpop.f32.mrf.mxu0  ;;  %v2736_v1 = vadd.f32 %v2735_v37, %v2734_v33 }
 0x17d   :  { %3013 = vmatpush3.msra.mxu1 %v3136_v2  ;;  %948 = vst [vmem:[#allocation19 + $0x288] sm:$0xff] %v4782_v55  ;;  %2322 = vmatmul.mubr.f32.vlgmr.msra.gmra.mxu0 %v1682_v5  ;;  %947 = vst [vmem:[#allocation19 + $0x280] sm:$0xff] %v4793_v40  ;;  %v3143_v45 = vld [vmem:[#allocation19 + $0x260] sm:$0xff]  ;;  %v1688_v36 = vld [vmem:[%s4988_s8 + $0x30] sm:$0xff]  ;;  %v2701_v4 = vadd.f32 %v2700_v13, %v2699_v19 }
 0x17e   :  { %2392 = vmatmul.mubr.f32.vlgmr.msra.gmra.mxu1 %v1684_v42  ;;  %3017 = vmatprep.subr.mxu0 %v4646_v30  ;;  %v3141_v30 = vld [vmem:[#allocation19 + $0x268] sm:$0xff]  ;;  %v1686_v8 = vld [vmem:[%s4988_s8 + $0x20] sm:$0xff] }
 0x17f   :  { %3052 = vmatprep.subr.mxu1 %v4651_v60  ;;  %3018 = vmatpush3.msra.mxu0 %v3137_v35  ;;  %v3142_v60 = vld [vmem:[#allocation19 + $0x368] sm:$0xff]  ;;  %v2665_v5 = vld [vmem:[%s4907_s3] ss:$0 sm:$0xff] }
 0x180   :  { %3053 = vmatpush3.msra.mxu1 %v3138_v48  ;;  %3019 = vmatprep.subr.mxu0 %v4654_v63  ;;  %v3144_v63 = vld [vmem:[#allocation19 + $0x360] sm:$0xff]  ;;  %v1641_v57 = vld [vmem:[%s4909_s5] sm:$0x1] }
 0x181   :  { %3054 = vmatprep.subr.mxu1 %v4657_v24  ;;  %3020 = vmatpush3.msra.mxu0 %v3139_v10  ;;  %v3145_v24 = vld [vmem:[#allocation19 + $0x258] sm:$0xff]  ;;  %v1642_v25 = vmul.f32 0.8, %v1641_v57 }
 0x182   :  { %3055 = vmatpush3.msra.mxu1 %v3140_v49  ;;  %3021 = vmatprep.subr.mxu0 %v4666_v41  ;;  %v3146_v41 = vld [vmem:[#allocation19 + $0x358] sm:$0xff] }
 0x183   :  { %3056 = vmatprep.subr.mxu1 %v4669_v56  ;;  %3022 = vmatpush3.msra.mxu0 %v3141_v30  ;;  %v3147_v56 = vld [vmem:[#allocation19 + $0x250] sm:$0xff] }
 0x184   :  { %3057 = vmatpush3.msra.mxu1 %v3142_v60  ;;  %3023 = vmatprep.subr.mxu0 %v4672_v27  ;;  %v3148_v27 = vld [vmem:[#allocation19 + $0x350] sm:$0xff] }
 0x185   :  { %3058 = vmatprep.subr.mxu1 %v4675_v7  ;;  %3024 = vmatpush3.msra.mxu0 %v3143_v45  ;;  %v3149_v7 = vld [vmem:[#allocation19 + $0x248] sm:$0xff] }
 0x186   :  { %3059 = vmatpush3.msra.mxu1 %v3144_v63  ;;  %3025 = vmatprep.subr.mxu0 %v4681_v61  ;;  %v3150_v61 = vld [vmem:[#allocation19 + $0x348] sm:$0xff]  ;;  %v2666_v63 = vld [vmem:[%s4909_s5] ss:$0 sm:$0xff] }
 0x187   :  { %3060 = vmatprep.subr.mxu1 %v4684_v18  ;;  %3026 = vmatpush3.msra.mxu0 %v3145_v24  ;;  %v3151_v18 = vld [vmem:[#allocation19 + $0x240] sm:$0xff] }
 0x188   :  { %3061 = vmatpush3.msra.mxu1 %v3146_v41  ;;  %3027 = vmatprep.subr.mxu0 %v4690_v12  ;;  %v5000_v12 = vld [vmem:[#allocation36_spill] sm:$0xff] }
 0x189   :  { %3062 = vmatprep.subr.mxu1 %v4697_v28  ;;  %3028 = vmatpush3.msra.mxu0 %v3147_v56  ;;  %v5001_v28 = vld [vmem:[#allocation39_spill] sm:$0xff] }
 0x18a   :  { %3063 = vmatpush3.msra.mxu1 %v3148_v27  ;;  %3029 = vmatprep.subr.mxu0 %v4700_v44  ;;  %v5002_v44 = vld [vmem:[#allocation40_spill] sm:$0xff] }
 0x18b   :  { %3064 = vmatprep.subr.mxu1 %v4704_v0  ;;  %3030 = vmatpush3.msra.mxu0 %v3149_v7  ;;  %v5003_v0 = vld [vmem:[#allocation43_spill] sm:$0xff]  ;;  %v1668_v7 = vlaneseq }
 0x18c   :  { %3065 = vmatpush3.msra.mxu1 %v3150_v61  ;;  %3031 = vmatprep.subr.mxu0 %v4707_v16  ;;  %v5004_v16 = vld [vmem:[#allocation44_spill] sm:$0xff] }
 0x18d   :  { %3066 = vmatprep.subr.mxu1 %v4710_v14  ;;  %3032 = vmatpush3.msra.mxu0 %v3151_v18  ;;  %v5005_v14 = vld [vmem:[#allocation47_spill] sm:$0xff] }
 0x18e   :  { %3067 = vmatpush3.msra.mxu1 %v5000_v12  ;;  %3033 = vmatprep.subr.mxu0 %v4717_v46  ;;  %v5006_v46 = vld [vmem:[#allocation48_spill] sm:$0xff]  ;;  %v1669_v12 = vshrl.u32 %v1668_v7, 7 }
 0x18f   :  { %3068 = vmatprep.subr.mxu1 %v4723_v20  ;;  %3034 = vmatpush3.msra.mxu0 %v5001_v28  ;;  %v5007_v20 = vld [vmem:[#allocation51_spill] sm:$0xff] }
 0x190   :  { %3069 = vmatpush3.msra.mxu1 %v5002_v44  ;;  %3035 = vmatprep.subr.mxu0 %v4732_v11  ;;  %v5008_v11 = vld [vmem:[#allocation52_spill] sm:$0xff] }
 0x191   :  { %3070 = vmatprep.subr.mxu1 %v4735_v26  ;;  %3036 = vmatpush3.msra.mxu0 %v5003_v0  ;;  %v5009_v26 = vld [vmem:[#allocation55_spill] sm:$0xff] }
 0x192   :  { %3071 = vmatpush3.msra.mxu1 %v5004_v16  ;;  %3037 = vmatprep.subr.mxu0 %v4738_v9  ;;  %v5010_v9 = vld [vmem:[#allocation56_spill] sm:$0xff] }
 0x193   :  { %3072 = vmatprep.subr.mxu1 %v4742_v15  ;;  %3038 = vmatpush3.msra.mxu0 %v5005_v14  ;;  %v5011_v15 = vld [vmem:[#allocation59_spill] sm:$0xff]  ;;  %v2769_v22 = vpop.f32.mrf.mxu0  ;;  %v1670_v14 = vsub.s32 0, %v1669_v12 }
 0x194   :  { %3073 = vmatpush3.msra.mxu1 %v5006_v46  ;;  %3039 = vmatprep.subr.mxu0 %v4745_v53  ;;  %v1687_v53 = vld [vmem:[%s4988_s8 + $0x28] sm:$0xff] }
 0x195   :  { %3074 = vmatprep.subr.mxu1 %v4753_v54  ;;  %3040 = vmatpush3.msra.mxu0 %v5007_v20  ;;  %v5015_v54 = vld [vmem:[#allocation65_spill] sm:$0xff]  ;;  %v2770_v29 = vpop.f32.mrf.mxu0 }
 0x196   :  { %3075 = vmatpush3.msra.mxu1 %v5008_v11  ;;  %3041 = vmatprep.subr.mxu0 %v4761_v38  ;;  %v2804_v38 = vpop.f32.mrf.mxu1  ;;  %v2771_v52 = vadd.f32 %v2770_v29, %v2769_v22 }
 0x197   :  { %3076 = vmatprep.subr.mxu1 %v4764_v39  ;;  %3042 = vmatpush3.msra.mxu0 %v5009_v26  ;;  %v1828_v39 = vadd.f32 %v2736_v1, %v2701_v4 }
 0x198   :  { %3077 = vmatpush3.msra.mxu1 %v5010_v9  ;;  %3043 = vmatprep.subr.mxu0 %v4776_v34  ;;  %v2805_v6 = vpop.f32.mrf.mxu1  ;;  %v1639_v34 = vld [vmem:[#allocation8] sm:$0x1] }
 0x199   :  { %3078 = vmatprep.subr.mxu1 %v4779_v51  ;;  %3044 = vmatpush3.msra.mxu0 %v5011_v15  ;;  %v1898_v17 = vadd.f32 %v2771_v52, %v1828_v39  ;;  %v1640_v51 = vmul.f32 0.2, %v1639_v34 }
 0x19a   :  { %3079 = vmatpush3.msra.mxu1 %v5012_v50  ;;  %3045 = vmatprep.subr.mxu0 %v4782_v55 }
 0x19b   :  { %3080 = vmatprep.subr.mxu1 %v4787_v58  ;;  %3046 = vmatpush3.msra.mxu0 %v5013_v21  ;;  %v1643_v55 = vadd.f32 %v1642_v25, %v1640_v51 }
 0x19c   :  { %3081 = vmatpush3.msra.mxu1 %v5014_v59  ;;  %3047 = vmatprep.subr.mxu0 %v4793_v40 }
 0x19d   :  { %3082 = vmatprep.subr.mxu1 %v4797_v31  ;;  %3048 = vmatpush3.msra.mxu0 %v4523_v3  ;;  %v2806_v3 = vadd.f32 %v2805_v6, %v2804_v38  ;;  %1644 = vst [vmem:[#allocation20] sm:$0x1] %v1643_v55  ;;  %v1671_v15 = vrot.slane %v1643_v55, %v1670_v14 }
 0x19e   :  { %2461 = vmatprep.mubr.f32.mxu0 %v1687_v53  ;;  %3083 = vmatpush3.msra.mxu1 %v5015_v54 }
 0x19f   :  { %2531 = vmatprep.mubr.f32.mxu1 %v1689_v62  ;;  %2462 = vmatmul.mubr.f32.vlgmr.msra.gmra.mxu0 %v1686_v8  ;;  %v1968_v42 = vadd.f32 %v2806_v3, %v1898_v17  ;;  %v1645_v62 = vld [vmem:[#allocation5] sm:$0x1] }
 0x1a0   :  { %2532 = vmatmul.mubr.f32.vlgmr.msra.gmra.mxu1 %v1688_v36  ;;  %v1647_v8 = vld [vmem:[%s4907_s3] sm:$0x1]  ;;  %v1646_v36 = vmul.f32 0.2, %v1645_v62 }
 0x1a1   :  { %v1971_v43 = vadd.f32 %v2665_v5, %v1968_v42  ;;  %v1648_v54 = vmul.f32 0.8, %v1647_v8 }
 0x1a3   :  { %1972 = vst [vmem:[#allocation10] sm:$0xff] %v1971_v43  ;;  %v1649_v19 = vadd.f32 %v1648_v54, %v1646_v36 }
 0x1a5   :  { %1650 = vst [vmem:[#allocation17] sm:$0x1] %v1649_v19 }
 0x1c7   :  { %v2839_v47 = vpop.f32.mrf.mxu0  ;;  %v2874_v32 = vpop.f32.mrf.mxu1 }
 0x1c9   :  { %v2840_v58 = vpop.f32.mrf.mxu0  ;;  %v2875_v23 = vpop.f32.mrf.mxu1 }
 0x1ca   :  { %v2841_v2 = vadd.f32 %v2840_v58, %v2839_v47  ;;  %v2876_v40 = vadd.f32 %v2875_v23, %v2874_v32 }
 0x1cc   :  { %v2111_v10 = vadd.f32 %v2876_v40, %v2841_v2 }
 0x204   :  { %v2944_v35 = vpop.f32.mrf.mxu1 }
 0x205   :  { %v2909_v31 = vpop.f32.mrf.mxu0 }
 0x206   :  { %v2945_v30 = vpop.f32.mrf.mxu1 }
 0x207   :  { %v2910_v48 = vpop.f32.mrf.mxu0  ;;  %v2946_v60 = vadd.f32 %v2945_v30, %v2944_v35 }
 0x208   :  { %v2911_v49 = vadd.f32 %v2910_v48, %v2909_v31 }
 0x20a   :  { %v2181_v45 = vadd.f32 %v2911_v49, %v2111_v10 }
 0x20c   :  { %v2251_v24 = vadd.f32 %v2946_v60, %v2181_v45 }
 0x20e   :  { %v2254_v41 = vadd.f32 %v2666_v63, %v2251_v24 }
 0x210   :  { %2255 = vst [vmem:[#allocation11] sm:$0xff] %v2254_v41 }
 0x23d   :  { %v2979_v56 = vpop.f32.mrf.mxu0 }
 0x23e   :  { %v3014_v27 = vpop.f32.mrf.mxu1 }
 0x23f   :  { %v2980_v61 = vpop.f32.mrf.mxu0 }
 0x240   :  { %v3015_v18 = vpop.f32.mrf.mxu1  ;;  %v2981_v28 = vadd.f32 %v2980_v61, %v2979_v56 }
 0x241   :  { %v3016_v44 = vadd.f32 %v3015_v18, %v3014_v27 }
 0x243   :  { %v2394_v11 = vadd.f32 %v3016_v44, %v2981_v28 }
 0x25f   :  { %v3049_v0 = vpop.f32.mrf.mxu0 }
 0x260   :  { %v3084_v16 = vpop.f32.mrf.mxu1 }
 0x261   :  { %v3050_v46 = vpop.f32.mrf.mxu0 }
 0x262   :  { %v3085_v20 = vpop.f32.mrf.mxu1  ;;  %v3051_v26 = vadd.f32 %v3050_v46, %v3049_v0 }
 0x263   :  { %v3086_v50 = vadd.f32 %v3085_v20, %v3084_v16 }
 0x264   :  { %v2464_v9 = vadd.f32 %v3051_v26, %v2394_v11 }
 0x266   :  { %v2534_v53 = vadd.f32 %v3086_v50, %v2464_v9 }
 0x268   :  { %v2537_v21 = vadd.f32 %v2534_v53, %v1671_v15 }
 0x26a   :  { %2538 = vst [vmem:[#allocation13] sm:$0xff] %v2537_v21  ;;  %v2544_v59 = vmul.f32 %v2537_v21, %v2254_v41 }
 0x26c   :  { %2545 = vadd.xlane.f32.xlu0 %v2544_v59 }
 0x26d   :  { %3243 = shalt.err (!%p3240_p10)
}
 0x26e   :  { %2568 = dma.vmem_to_hbm [thread:$0]  %s2566_s21, 128, %s4915_s11, [#allocation12]  }
 0x26f   :  { %s3415_s24 = smov [#allocation17]   ;;  %s3416_s25 = smov [#allocation10]  }
 0x270   :  { %s2607_s3 = sshll.u32 %s3415_s24, 4  ;;  %s2555_s26 = sshll.u32 %s3416_s25, 4  ;;  %s2608_s3 = int_to_ptr.vmem [resolvable:$true] %s2607_s3  ;;  %s2556_s26 = int_to_ptr.vmem [resolvable:$true] %s2555_s26 }
 0x271   :  { %s3252_s28 = scalar_lea.vmem %s2608_s3, 16  ;;  %s3256_s6 = scalar_lea.vmem %s2608_s3, 32 }
 0x272   :  { %p3253_p11 = scmp.ne.s32.totalorder %s2608_s3, %s3252_s28  ;;  %p3257_p12 = scmp.lt.s32.totalorder %s2608_s3, %s2608_s3 }
 0x273   :  { %p3258_p13 = scmp.lt.s32.totalorder %s3256_s6, %s3252_s28 }
 0x275   :  { %p3259_p0 = por %p3258_p13, %p3257_p12 }
 0x277   :  { %p3260_p1 = pnand %p3259_p0, %p3253_p11 }
 0x279   :  { %3263 = shalt.err (!%p3260_p1)
}
 0x27a   :  { %2610 = dma.vmem_to_hbm [thread:$0]  %s2608_s3, 16, %s4919_s15, [#allocation18]  }
 0x27b   :  { %s3272_s4 = scalar_lea.vmem %s2556_s26, 128  ;;  %p3277_p3 = scmp.lt.s32.totalorder %s2556_s26, %s2556_s26 }
 0x27c   :  { %p3273_p2 = scmp.ne.s32.totalorder %s2556_s26, %s3272_s4  ;;  %p3278_p4 = scmp.lt.s32.totalorder %s3272_s4, %s3272_s4 }
 0x27e   :  { %p3279_p5 = por %p3278_p4, %p3277_p3 }
 0x280   :  { %p3280_p6 = pnand %p3279_p5, %p3273_p2 }
 0x282   :  { %3283 = shalt.err (!%p3280_p6)
}
 0x283   :  { %2558 = dma.vmem_to_hbm [thread:$0]  %s2556_s26, 128, %s4914_s10, [#allocation4]  }
 0x284   :  { %s3417_s7 = smov [#allocation13]  }
 0x285   :  { %s2575_s30 = sshll.u32 %s3417_s7, 4  ;;  %s2576_s30 = int_to_ptr.vmem [resolvable:$true] %s2575_s30 }
 0x286   :  { %s3292_s8 = scalar_lea.vmem %s2576_s30, 128  ;;  %p3297_p8 = scmp.lt.s32.totalorder %s2576_s30, %s2576_s30 }
 0x287   :  { %p3293_p7 = scmp.ne.s32.totalorder %s2576_s30, %s3292_s8  ;;  %p3298_p9 = scmp.lt.s32.totalorder %s3292_s8, %s3292_s8 }
 0x289   :  { %p3299_p10 = por %p3298_p9, %p3297_p8 }
 0x28b   :  { %p3300_p11 = pnand %p3299_p10, %p3293_p7 }
 0x28d   :  { %3303 = shalt.err (!%p3300_p11)
}
 0x28e   :  { %2578 = dma.vmem_to_hbm [thread:$0]  %s2576_s30, 128, %s4916_s12, [#allocation12]  }
 0x28f   :  { %s3418_s5 = smov [#allocation19]   ;;  %s3419_s9 = smov [#allocation20]  }
 0x290   :  { %s2616_s20 = sshll.u32 %s3418_s5, 4  ;;  %s2629_s21 = sshll.u32 %s3419_s9, 4  ;;  %s2617_s20 = int_to_ptr.vmem [resolvable:$true] %s2616_s20  ;;  %s2630_s21 = int_to_ptr.vmem [resolvable:$true] %s2629_s21 }
 0x291   :  { %s3312_s10 = scalar_lea.vmem %s2617_s20, 16384  ;;  %p3317_p13 = scmp.lt.s32.totalorder %s2617_s20, %s2617_s20 }
 0x292   :  { %p3313_p12 = scmp.ne.s32.totalorder %s2617_s20, %s3312_s10  ;;  %p3318_p0 = scmp.lt.s32.totalorder %s3312_s10, %s3312_s10 }
 0x294   :  { %p3319_p1 = por %p3318_p0, %p3317_p13 }
 0x296   :  { %p3320_p2 = pnand %p3319_p1, %p3313_p12 }
 0x298   :  { %3323 = shalt.err (!%p3320_p2)
}
 0x299   :  { %2622 = dma.vmem_to_hbm [thread:$0]  %s2617_s20, 16384, %s4920_s16, [#allocation18], %s3410_s19, %s3410_s19, %s3411_s1  }
 0x29a   :  { %s3332_s12 = scalar_lea.vmem %s2630_s21, 16  ;;  %s3336_s23 = scalar_lea.vmem %s2630_s21, 32 }
 0x29b   :  { %p3333_p3 = scmp.ne.s32.totalorder %s2630_s21, %s3332_s12  ;;  %p3337_p4 = scmp.lt.s32.totalorder %s2630_s21, %s2630_s21 }
 0x29c   :  { %p3338_p5 = scmp.lt.s32.totalorder %s3336_s23, %s3332_s12 }
 0x29e   :  { %p3339_p6 = por %p3338_p5, %p3337_p4 }
 0x2a0   :  { %p3340_p7 = pnand %p3339_p6, %p3333_p3 }
 0x2a2   :  { %3343 = shalt.err (!%p3340_p7)
}
 0x2a3   :  { %2632 = dma.vmem_to_hbm [thread:$0]  %s2630_s21, 16, %s4921_s17, [#allocation21]  }
 0x2a4   :  { %s3420_s25 = smov [#allocation14]   ;;  %s3421_s28 = smov [#allocation16]  }
 0x2a5   :  { %s2585_s26 = sshll.u32 %s3420_s25, 4  ;;  %s2594_s6 = sshll.u32 %s3421_s28, 4  ;;  %s2586_s26 = int_to_ptr.vmem [resolvable:$true] %s2585_s26  ;;  %s2595_s6 = int_to_ptr.vmem [resolvable:$true] %s2594_s6 }
 0x2a6   :  { %s3352_s16 = scalar_lea.vmem %s2586_s26, 128  ;;  %p3357_p9 = scmp.lt.s32.totalorder %s2586_s26, %s2586_s26 }
 0x2a7   :  { %p3353_p8 = scmp.ne.s32.totalorder %s2586_s26, %s3352_s16  ;;  %p3358_p10 = scmp.lt.s32.totalorder %s3352_s16, %s3352_s16 }
 0x2a9   :  { %p3359_p11 = por %p3358_p10, %p3357_p9 }
 0x2ab   :  { %p3360_p12 = pnand %p3359_p11, %p3353_p8 }
 0x2f5   :  { %v2546_v33 = vpop.xlane.xlu0 %2545 }
 0x2f6   :  { %v2547_v13 = vmul.f32 14.285714, %v2546_v33 }
 0x2f8   :  { %2548 = vst [vmem:[#allocation14] sm:$0xff] %v2547_v13 }
 0x2f9   :  { %3363 = shalt.err (!%p3360_p12)
}
 0x2fa   :  { %2588 = dma.vmem_to_hbm [thread:$0]  %s2586_s26, 128, %s4917_s13, [#allocation15]  }
 0x2fb   :  { %s3372_s17 = scalar_lea.vmem %s2595_s6, 16384  ;;  %p3377_p0 = scmp.lt.s32.totalorder %s2595_s6, %s2595_s6 }
 0x2fc   :  { %p3373_p13 = scmp.ne.s32.totalorder %s2595_s6, %s3372_s17  ;;  %p3378_p1 = scmp.lt.s32.totalorder %s3372_s17, %s3372_s17 }
 0x2fe   :  { %p3379_p2 = por %p3378_p1, %p3377_p0 }
 0x300   :  { %p3380_p3 = pnand %p3379_p2, %p3373_p13 }
 0x302   :  { %3383 = shalt.err (!%p3380_p3)
}
 0x303   :  { %2600 = dma.vmem_to_hbm [thread:$0]  %s2595_s6, 16384, %s4918_s14, [#allocation15], %s3410_s19, %s3410_s19, %s3411_s1  }
 0x304   :  { %3398 = dma.done.wait [#allocation4], 128  }
 0x305   :  { %3399 = vsyncadd [#allocation4], 4294967168 }
 0x306   :  { %3400 = dma.done.wait [#allocation12], 256  }
 0x307   :  { %3401 = vsyncadd [#allocation12], 4294967040 }
 0x308   :  { %3402 = dma.done.wait [#allocation15], 16512  }
 0x309   :  { %3403 = vsyncadd [#allocation15], 4294950784 }
 0x30a   :  { %3404 = dma.done.wait [#allocation18], 16400  }
 0x30b   :  { %3405 = vsyncadd [#allocation18], 4294950896 }
 0x30c   :  { %3406 = dma.done.wait [#allocation21], 16  }
 0x30d   :  { %3407 = vsyncadd [#allocation21], 4294967280 }
 0x30e   :  { %2657 = vsyncpa [#allocation3], 1 }
 0x30f   :  { %2658 = vsyncpa [#allocation6], 1 }
 0x310   :  { %2659 = vsyncpa [#allocation9], 1 }
 0x311   :  { %2660 = vsyncpa [#allocation4], 1 }
 0x312   :  { %2661 = vsyncpa [#allocation12], 1 }
 0x313   :  { %2662 = vsyncpa [#allocation15], 1 }
 0x314   :  { %2663 = vsyncpa [#allocation18], 1 }
 0x315   :  { %2664 = vsyncpa [#allocation21], 1 }

</bundles_post_ra>
